<compile_context>
chip_gen: v7x
topology: tpu7x:2x2x1
jax: 0.10.0
libtpu: 0.0.40
codegen_flags: <defaults>
</compile_context>

<pallas_src>
import jax
import jax.numpy as jnp
from jax.experimental import pallas as pl
from jax.experimental.pallas import tpu as pltpu


# ----------------------------------------------------------------------------
# Pallas kernel (one kernel handles weighted / unweighted / fused-side variants)
# ----------------------------------------------------------------------------
def _make_layer_kernel(*, num_rel, apply_relu, use_weight, fuse_side):
    def kernel(*refs):
        it = iter(refs)
        adj_ref = next(it)                        # (R, tm, tk)     int8 (0/1 exact)
        h_ref = next(it)                          # (tk, Fin)       bf16
        w_ref = next(it) if use_weight else None  # (R, Fin, Fout)  bf16
        b_ref = next(it)                          # (1, Fout)       f32
        if fuse_side:
            sx_ref = next(it)                     # (tm, Fs_in)     bf16 (row tile)
            sw_ref = next(it)                     # (Fs_in, Fs_out) bf16
            sb_ref = next(it)                     # (1, Fs_out)     f32
        o_ref = next(it)                          # (tm, Fout)
        so_ref = next(it) if fuse_side else None  # (tm, Fs_out)
        slab_ref = next(it)                       # (R, tm, Fin)    f32 scratch
        deg_ref = next(it)                        # (R, tm, 1)      f32 scratch

        k = pl.program_id(1)

        @pl.when(k == 0)
        def _init():
            slab_ref[...] = jnp.zeros_like(slab_ref)
            deg_ref[...] = jnp.zeros_like(deg_ref)
            if fuse_side:
                # Side linear: sx/sw/sb index_maps are constant in k, so the
                # operands are already resident here; doing the GEMM + store at
                # k==0 hides it under the first adjacency DMA instead of the
                # heavy finalize epilogue.
                so = jnp.dot(sx_ref[...], sw_ref[...],
                             preferred_element_type=jnp.float32) + sb_ref[...]
                so_ref[...] = so.astype(so_ref.dtype)

        # Accumulate per-relation aggregation and in-degree over src (k) tiles.
        # Adjacency streams from HBM as int8 (half the bytes of bf16) and is
        # upcast per relation right before the MXU dot (VPU work, has slack).
        h_blk = h_ref[...]
        for r in range(num_rel):
            a_r = adj_ref[r].astype(jnp.bfloat16)
            slab_ref[r] += jnp.dot(a_r, h_blk, preferred_element_type=jnp.float32)
            deg_ref[r] += jnp.sum(a_r.astype(jnp.float32), axis=-1, keepdims=True)

        @pl.when(k == pl.num_programs(1) - 1)
        def _finalize():
            # norm='right' of dgl.GraphConv: divide by in-degree clamped to >= 1.
            inv = 1.0 / jnp.maximum(deg_ref[...], 1.0)        # (R, tm, 1)   f32
            scaled = slab_ref[...] * inv                      # (R, tm, Fin) f32
            if use_weight:
                # Per-relation contraction: no in-kernel concatenate / relayout.
                out = jnp.dot(scaled[0].astype(jnp.bfloat16), w_ref[0],
                              preferred_element_type=jnp.float32)
                for r in range(1, num_rel):
                    out = out + jnp.dot(scaled[r].astype(jnp.bfloat16), w_ref[r],
                                        preferred_element_type=jnp.float32)
            else:
                out = scaled[0]
                for r in range(1, num_rel):
                    out = out + scaled[r]
            out = out + b_ref[...]
            if apply_relu:
                out = jnp.maximum(out, 0.0)
            o_ref[...] = out.astype(o_ref.dtype)

    return kernel


# ----------------------------------------------------------------------------
# Tile selection & VMEM budgeting
# ----------------------------------------------------------------------------
def _pick_row_tile(n, max_tile=512):
    """dst-row tile: multiple of 32 (int8 sublane packing) dividing N; prefer
    >= 2 tiles so the leading 'parallel' axis shards over v7x's 2 TCs."""
    limit = min(n, max_tile)
    cands = [c for c in range(32, limit + 1, 32) if n % c == 0]
    if not cands:
        return n                                   # full dim is always legal
    smaller = [c for c in cands if c < n]
    return max(smaller) if smaller else max(cands)


def _pick_k_tile(n, max_tile=1024):
    """src (reduction) tile: full N if it fits, else largest multiple of 128
    dividing N within the budget."""
    if n <= max_tile:
        return n
    cands = [c for c in range(128, max_tile + 1, 128) if n % c == 0]
    return max(cands) if cands else n


def _estimate_vmem_bytes(R, tm, tk, fin, fout, side_dims):
    lane = lambda d: max(d, 128)                   # narrow last dims pad to 128 lanes
    b = 0
    b += 2 * R * tm * tk * 1                       # adj int8 (double buffered)
    b += 2 * tk * lane(fin) * 2                    # h bf16
    b += 2 * R * fin * lane(fout) * 2              # per-relation weights bf16
    b += 2 * 8 * lane(fout) * 4                    # bias f32
    b += 2 * tm * lane(fout) * 4                   # output block
    if side_dims is not None:
        fs_in, fs_out = side_dims
        b += 2 * tm * lane(fs_in) * 2
        b += 2 * fs_in * lane(fs_out) * 2
        b += 2 * 8 * lane(fs_out) * 4
        b += 2 * tm * lane(fs_out) * 4
    b += R * tm * lane(fin) * 4                    # slab scratch
    b += R * tm * 128 * 4                          # degree scratch (lane padded)
    return b


# ----------------------------------------------------------------------------
# Wrapper around pallas_call
# ----------------------------------------------------------------------------
def rgcn_layer(adj_i8, h, weight, bias, *, apply_relu, side=None,
               out_dtype=jnp.float32, max_tile_m=512, max_tile_k=1024):
    """One RelGraphConvLayer over a single node type.

    adj_i8  : (R, N, N) int8   dst x src 0/1 adjacency per relation
    h       : (N, Fin)  bf16
    weight  : (R, Fin, Fout) bf16 or None (weight=False layer)
    bias    : (1, Fout) f32
    side    : optional (x, W, b) for a fused row-wise linear (second output)
    """
    R, N, _ = adj_i8.shape
    fin = h.shape[1]
    fout = bias.shape[-1]
    use_weight = weight is not None
    if not use_weight:
        assert fin == fout, "weight=False layer requires Fin == Fout"

    tm = _pick_row_tile(N, max_tile_m)
    tk = _pick_k_tile(N, max_tile_k)
    assert N % tm == 0 and N % tk == 0
    grid = (N // tm, N // tk)       # (parallel dst-row tiles, reduction src tiles)

    in_specs = [
        pl.BlockSpec((R, tm, tk), lambda i, k: (0, i, k)),
        pl.BlockSpec((tk, fin), lambda i, k: (k, 0)),
    ]
    args = [adj_i8, h]
    if use_weight:
        in_specs.append(pl.BlockSpec((R, fin, fout), lambda i, k: (0, 0, 0)))
        args.append(weight)
    in_specs.append(pl.BlockSpec((1, fout), lambda i, k: (0, 0)))
    args.append(bias)

    fuse_side = side is not None
    o_spec = pl.BlockSpec((tm, fout), lambda i, k: (i, 0))
    if fuse_side:
        sx, sw, sb = side
        fs_in, fs_out = sw.shape
        in_specs += [
            pl.BlockSpec((tm, fs_in), lambda i, k: (i, 0)),
            pl.BlockSpec((fs_in, fs_out), lambda i, k: (0, 0)),
            pl.BlockSpec((1, fs_out), lambda i, k: (0, 0)),
        ]
        args += [sx, sw, sb]
        out_shape = (jax.ShapeDtypeStruct((N, fout), out_dtype),
                     jax.ShapeDtypeStruct((N, fs_out), jnp.float32))
        out_specs = [o_spec, pl.BlockSpec((tm, fs_out), lambda i, k: (i, 0))]
        side_dims = (fs_in, fs_out)
    else:
        out_shape = jax.ShapeDtypeStruct((N, fout), out_dtype)
        out_specs = o_spec
        side_dims = None

    kernel = _make_layer_kernel(num_rel=R, apply_relu=apply_relu,
                                use_weight=use_weight, fuse_side=fuse_side)

    est = _estimate_vmem_bytes(R, tm, tk, fin, fout, side_dims)
    # 2x headroom, floor 16 MiB, cap 48 MiB (safe within v7x's 64 MiB physical).
    vmem_limit = int(min(max(2 * est, 16 * 1024 * 1024), 48 * 1024 * 1024))

    return pl.pallas_call(
        kernel,
        out_shape=out_shape,
        grid_spec=pltpu.PrefetchScalarGridSpec(
            num_scalar_prefetch=0,
            grid=grid,
            in_specs=in_specs,
            out_specs=out_specs,
            scratch_shapes=[pltpu.VMEM((R, tm, fin), jnp.float32),
                            pltpu.VMEM((R, tm, 1), jnp.float32)],
        ),
        compiler_params=pltpu.CompilerParams(
            dimension_semantics=("parallel", "arbitrary"),
            vmem_limit_bytes=vmem_limit),
    )(*args)


# ----------------------------------------------------------------------------
# Full RGCN_NC forward
# ----------------------------------------------------------------------------
def rgcn_nc_forward(adj_i8, embeds, params):
    """adj_i8: (R, N, N) int8 0/1 adjacency (dst x src). In-degree / norm='right'
    scaling is computed inside the kernels — no wrapper-side pass over adj."""
    h0 = embeds.astype(jnp.bfloat16)     # RelGraphEmbed()

    # layers[0]: in_dim -> hidden, weight=False, relu.
    # Fused side write: g.data['w'] = h0 @ W_fc (bias-free Linear).
    h1, data_w = rgcn_layer(
        adj_i8, h0, None, params["b0"], apply_relu=True,
        side=(h0, params["W_fc"].astype(jnp.bfloat16), params["zero_fc_b"]),
        out_dtype=jnp.bfloat16)

    # layers[1]: hidden -> hidden, per-relation weight, relu.
    h2 = rgcn_layer(
        adj_i8, h1, params["W1"].astype(jnp.bfloat16), params["b1"],
        apply_relu=True, out_dtype=jnp.bfloat16)

    # out_layer: hidden -> out_dim, per-relation weight, no activation.
    # Fused side write: g.data['h'] = h2 @ W_out + b_out.
    output, data_h = rgcn_layer(
        adj_i8, h2, params["W2"].astype(jnp.bfloat16), params["b2"],
        apply_relu=False,
        side=(h2, params["W_out"].astype(jnp.bfloat16), params["b_out"]),
        out_dtype=jnp.float32)

    return output, data_h, data_w


# ----------------------------------------------------------------------------
# Deterministic parameter construction
# ----------------------------------------------------------------------------
def xavier_uniform(key, shape, gain):
    if len(shape) == 2:
        fan_in, fan_out = shape
    else:  # (R, Fin, Fout)
        fan_in, fan_out = shape[1], shape[2]
    bound = gain * (6.0 / (fan_in + fan_out)) ** 0.5
    return jax.random.uniform(key, shape, jnp.float32, -bound, bound)


if __name__ == "__main__":
    N, R = 64, 3            # nodes, relations (single synthetic node type)
    in_dim = hidden = 32    # weight=False first layer requires in_dim == hidden_dim
    out_dim = 16
    gain = 2.0 ** 0.5       # calculate_gain('relu')

    key = jax.random.PRNGKey(0)
    k_adj, k_emb, k_w1, k_w2, k_wout, k_bout, k_wfc = jax.random.split(key, 7)

    # synthetic heterograph: R dense dst x src adjacencies (~10% density),
    # stored directly as int8 (0/1) — no separate f32->narrow cast pass.
    adj_i8 = (jax.random.uniform(k_adj, (R, N, N)) < 0.10).astype(jnp.int8)
    embeds = xavier_uniform(k_emb, (N, in_dim), gain)   # RelGraphEmbed parameter

    params = {
        "b0": jnp.zeros((1, hidden), jnp.float32),                    # layer0 h_bias (zeros)
        "W1": xavier_uniform(k_w1, (R, hidden, hidden), gain),        # layer1 per-relation weight
        "b1": jnp.zeros((1, hidden), jnp.float32),
        "W2": xavier_uniform(k_w2, (R, hidden, out_dim), gain),       # out_layer per-relation weight
        "b2": jnp.zeros((1, out_dim), jnp.float32),
        "W_out": xavier_uniform(k_wout, (hidden, hidden), 1.0),       # nn.Linear(hidden, hidden)
        "b_out": jax.random.uniform(k_bout, (1, hidden), jnp.float32,
                                    -1.0 / hidden ** 0.5, 1.0 / hidden ** 0.5),
        "W_fc": xavier_uniform(k_wfc, (in_dim, hidden), 1.0),         # nn.Linear(in_dim, hidden, bias=False)
        "zero_fc_b": jnp.zeros((1, hidden), jnp.float32),
    }

    fwd = jax.jit(rgcn_nc_forward)
    output, data_h, data_w = fwd(adj_i8, embeds, params)
    jax.block_until_ready((output, data_h, data_w))

    assert output.shape == (N, out_dim)
    assert data_h.shape == (N, hidden)
    assert data_w.shape == (N, hidden)
    assert bool(jnp.all(jnp.isfinite(output)))
    assert bool(jnp.all(jnp.isfinite(data_h)))
    assert bool(jnp.all(jnp.isfinite(data_w)))
    print("KERNEL_OK")
</pallas_src>

<mosaic_0001>
module attributes {stable_mosaic.version = 11 : i64} {
  func.func @kernel(%arg0: i32, %arg1: i32, %arg2: memref<3x32x64xi8, #tpu.memory_space<vmem>>, %arg3: memref<64x32xbf16, #tpu.memory_space<vmem>>, %arg4: memref<1x32xf32, #tpu.memory_space<vmem>>, %arg5: memref<32x32xbf16, #tpu.memory_space<vmem>>, %arg6: memref<32x32xbf16, #tpu.memory_space<vmem>>, %arg7: memref<1x32xf32, #tpu.memory_space<vmem>>, %arg8: memref<32x32xbf16, #tpu.memory_space<vmem>>, %arg9: memref<32x32xf32, #tpu.memory_space<vmem>>, %arg10: memref<3x32x32xf32, #tpu.memory_space<vmem>>, %arg11: memref<3x32x1xf32, #tpu.memory_space<vmem>>) attributes {dimension_semantics = [#tpu.dimension_semantics<parallel>, #tpu.dimension_semantics<arbitrary>], iteration_bounds = array<i64: 2, 1>, scalar_prefetch = 0 : i64, scratch_operands = 2 : i64, tpu.core_type = #tpu.core_type<tc>, window_params = [{transform_indices = @transform_0, window_bounds = array<i64: 3, 32, 64>}, {transform_indices = @transform_1, window_bounds = array<i64: 64, 32>}, {pipeline_mode = #tpu.pipeline_mode<synchronous>, transform_indices = @transform_2, window_bounds = array<i64: 1, 32>}, {transform_indices = @transform_3, window_bounds = array<i64: 32, 32>}, {pipeline_mode = #tpu.pipeline_mode<synchronous>, transform_indices = @transform_4, window_bounds = array<i64: 32, 32>}, {pipeline_mode = #tpu.pipeline_mode<synchronous>, transform_indices = @transform_5, window_bounds = array<i64: 1, 32>}, {transform_indices = @transform_6, window_bounds = array<i64: 32, 32>}, {transform_indices = @transform_7, window_bounds = array<i64: 32, 32>}]} {
    %c0_i32 = arith.constant 0 : i32
    %0 = arith.cmpi eq, %arg1, %c0_i32 : i32
    %1 = arith.extui %0 : i1 to i32
    %c0_i32_0 = arith.constant 0 : i32
    %2 = arith.cmpi ne, %1, %c0_i32_0 : i32
    scf.if %2 {
      %cst_52 = arith.constant 0.000000e+00 : f32
      %64 = vector.broadcast %cst_52 : f32 to vector<3x32x32xf32>
      %c0_53 = arith.constant 0 : index
      %c0_54 = arith.constant 0 : index
      %c0_55 = arith.constant 0 : index
      %65 = vector.load %arg10[%c0_53, %c0_54, %c0_55] : memref<3x32x32xf32, #tpu.memory_space<vmem>>, vector<3x32x32xf32>
      tpu.vector_store %arg10[%c0_53, %c0_54, %c0_55], %64 {strides = array<i32>} : memref<3x32x32xf32, #tpu.memory_space<vmem>>, vector<3x32x32xf32>,
      %cst_56 = arith.constant 0.000000e+00 : f32
      %66 = vector.broadcast %cst_56 : f32 to vector<3x32x1xf32>
      %c0_57 = arith.constant 0 : index
      %c0_58 = arith.constant 0 : index
      %c0_59 = arith.constant 0 : index
      %67 = vector.load %arg11[%c0_57, %c0_58, %c0_59] : memref<3x32x1xf32, #tpu.memory_space<vmem>>, vector<3x32x1xf32>
      tpu.vector_store %arg11[%c0_57, %c0_58, %c0_59], %66 {strides = array<i32>} : memref<3x32x1xf32, #tpu.memory_space<vmem>>, vector<3x32x1xf32>,
      %c0_60 = arith.constant 0 : index
      %c0_61 = arith.constant 0 : index
      %68 = vector.load %arg5[%c0_60, %c0_61] : memref<32x32xbf16, #tpu.memory_space<vmem>>, vector<32x32xbf16>
      %c0_62 = arith.constant 0 : index
      %c0_63 = arith.constant 0 : index
      %69 = vector.load %arg6[%c0_62, %c0_63] : memref<32x32xbf16, #tpu.memory_space<vmem>>, vector<32x32xbf16>
      %cst_64 = arith.constant dense<0.000000e+00> : vector<32x32xf32>
      %70 = tpu.matmul %68, %69, %cst_64 {dimension_numbers = #tpu.dot_dimension_numbers<[1], [0], [0], [1], [0, 0, 1, 1], [], []>} : vector<32x32xbf16>, vector<32x32xbf16>, vector<32x32xf32> -> vector<32x32xf32>
      %c0_65 = arith.constant 0 : index
      %c0_66 = arith.constant 0 : index
      %71 = vector.load %arg7[%c0_65, %c0_66] : memref<1x32xf32, #tpu.memory_space<vmem>>, vector<1x32xf32>
      %72 = vector.broadcast %71 : vector<1x32xf32> to vector<32x32xf32>
      %73 = arith.addf %70, %72 : vector<32x32xf32>
      %c0_67 = arith.constant 0 : index
      %c0_68 = arith.constant 0 : index
      %74 = vector.load %arg9[%c0_67, %c0_68] : memref<32x32xf32, #tpu.memory_space<vmem>>, vector<32x32xf32>
      tpu.vector_store %arg9[%c0_67, %c0_68], %73 {strides = array<i32>} : memref<32x32xf32, #tpu.memory_space<vmem>>, vector<32x32xf32>,
    } else {
    }
    %c0 = arith.constant 0 : index
    %c0_1 = arith.constant 0 : index
    %3 = vector.load %arg3[%c0, %c0_1] : memref<64x32xbf16, #tpu.memory_space<vmem>>, vector<64x32xbf16>
    %c0_2 = arith.constant 0 : index
    %c0_3 = arith.constant 0 : index
    %c0_4 = arith.constant 0 : index
    %4 = vector.load %arg2[%c0_2, %c0_3, %c0_4] : memref<3x32x64xi8, #tpu.memory_space<vmem>>, vector<1x32x64xi8>
    %5 = vector.shape_cast %4 : vector<1x32x64xi8> to vector<32x64xi8>
    %6 = arith.sitofp %5 : vector<32x64xi8> to vector<32x64xbf16>
    %c0_5 = arith.constant 0 : index
    %c0_6 = arith.constant 0 : index
    %c0_7 = arith.constant 0 : index
    %7 = vector.load %arg10[%c0_5, %c0_6, %c0_7] : memref<3x32x32xf32, #tpu.memory_space<vmem>>, vector<1x32x32xf32>
    %8 = vector.shape_cast %7 : vector<1x32x32xf32> to vector<32x32xf32>
    %cst = arith.constant dense<0.000000e+00> : vector<32x32xf32>
    %9 = tpu.matmul %6, %3, %cst {dimension_numbers = #tpu.dot_dimension_numbers<[1], [0], [0], [1], [0, 0, 1, 1], [], []>} : vector<32x64xbf16>, vector<64x32xbf16>, vector<32x32xf32> -> vector<32x32xf32>
    %10 = arith.addf %8, %9 : vector<32x32xf32>
    %c0_8 = arith.constant 0 : index
    %c0_9 = arith.constant 0 : index
    %c0_10 = arith.constant 0 : index
    %11 = vector.load %arg10[%c0_8, %c0_9, %c0_10] : memref<3x32x32xf32, #tpu.memory_space<vmem>>, vector<1x32x32xf32>
    %12 = vector.shape_cast %11 : vector<1x32x32xf32> to vector<32x32xf32>
    %13 = vector.shape_cast %10 : vector<32x32xf32> to vector<1x32x32xf32>
    tpu.vector_store %arg10[%c0_8, %c0_9, %c0_10], %13 {strides = array<i32>} : memref<3x32x32xf32, #tpu.memory_space<vmem>>, vector<1x32x32xf32>,
    %c0_11 = arith.constant 0 : index
    %c0_12 = arith.constant 0 : index
    %c0_13 = arith.constant 0 : index
    %14 = vector.load %arg11[%c0_11, %c0_12, %c0_13] : memref<3x32x1xf32, #tpu.memory_space<vmem>>, vector<1x32x1xf32>
    %15 = vector.shape_cast %14 : vector<1x32x1xf32> to vector<32x1xf32>
    %16 = arith.extf %6 : vector<32x64xbf16> to vector<32x64xf32>
    %cst_14 = arith.constant dense<0.000000e+00> : vector<32xf32>
    %17 = vector.multi_reduction <add>, %16, %cst_14 [1] : vector<32x64xf32> to vector<32xf32>
    %18 = vector.shape_cast %17 : vector<32xf32> to vector<32x1xf32>
    %19 = arith.addf %15, %18 : vector<32x1xf32>
    %c0_15 = arith.constant 0 : index
    %c0_16 = arith.constant 0 : index
    %c0_17 = arith.constant 0 : index
    %20 = vector.load %arg11[%c0_15, %c0_16, %c0_17] : memref<3x32x1xf32, #tpu.memory_space<vmem>>, vector<1x32x1xf32>
    %21 = vector.shape_cast %20 : vector<1x32x1xf32> to vector<32x1xf32>
    %22 = vector.shape_cast %19 : vector<32x1xf32> to vector<1x32x1xf32>
    tpu.vector_store %arg11[%c0_15, %c0_16, %c0_17], %22 {strides = array<i32>} : memref<3x32x1xf32, #tpu.memory_space<vmem>>, vector<1x32x1xf32>,
    %c1 = arith.constant 1 : index
    %c0_18 = arith.constant 0 : index
    %c0_19 = arith.constant 0 : index
    %23 = vector.load %arg2[%c1, %c0_18, %c0_19] : memref<3x32x64xi8, #tpu.memory_space<vmem>>, vector<1x32x64xi8>
    %24 = vector.shape_cast %23 : vector<1x32x64xi8> to vector<32x64xi8>
    %25 = arith.sitofp %24 : vector<32x64xi8> to vector<32x64xbf16>
    %c1_20 = arith.constant 1 : index
    %c0_21 = arith.constant 0 : index
    %c0_22 = arith.constant 0 : index
    %26 = vector.load %arg10[%c1_20, %c0_21, %c0_22] : memref<3x32x32xf32, #tpu.memory_space<vmem>>, vector<1x32x32xf32>
    %27 = vector.shape_cast %26 : vector<1x32x32xf32> to vector<32x32xf32>
    %cst_23 = arith.constant dense<0.000000e+00> : vector<32x32xf32>
    %28 = tpu.matmul %25, %3, %cst_23 {dimension_numbers = #tpu.dot_dimension_numbers<[1], [0], [0], [1], [0, 0, 1, 1], [], []>} : vector<32x64xbf16>, vector<64x32xbf16>, vector<32x32xf32> -> vector<32x32xf32>
    %29 = arith.addf %27, %28 : vector<32x32xf32>
    %c1_24 = arith.constant 1 : index
    %c0_25 = arith.constant 0 : index
    %c0_26 = arith.constant 0 : index
    %30 = vector.load %arg10[%c1_24, %c0_25, %c0_26] : memref<3x32x32xf32, #tpu.memory_space<vmem>>, vector<1x32x32xf32>
    %31 = vector.shape_cast %30 : vector<1x32x32xf32> to vector<32x32xf32>
    %32 = vector.shape_cast %29 : vector<32x32xf32> to vector<1x32x32xf32>
    tpu.vector_store %arg10[%c1_24, %c0_25, %c0_26], %32 {strides = array<i32>} : memref<3x32x32xf32, #tpu.memory_space<vmem>>, vector<1x32x32xf32>,
    %c1_27 = arith.constant 1 : index
    %c0_28 = arith.constant 0 : index
    %c0_29 = arith.constant 0 : index
    %33 = vector.load %arg11[%c1_27, %c0_28, %c0_29] : memref<3x32x1xf32, #tpu.memory_space<vmem>>, vector<1x32x1xf32>
    %34 = vector.shape_cast %33 : vector<1x32x1xf32> to vector<32x1xf32>
    %35 = arith.extf %25 : vector<32x64xbf16> to vector<32x64xf32>
    %cst_30 = arith.constant dense<0.000000e+00> : vector<32xf32>
    %36 = vector.multi_reduction <add>, %35, %cst_30 [1] : vector<32x64xf32> to vector<32xf32>
    %37 = vector.shape_cast %36 : vector<32xf32> to vector<32x1xf32>
    %38 = arith.addf %34, %37 : vector<32x1xf32>
    %c1_31 = arith.constant 1 : index
    %c0_32 = arith.constant 0 : index
    %c0_33 = arith.constant 0 : index
    %39 = vector.load %arg11[%c1_31, %c0_32, %c0_33] : memref<3x32x1xf32, #tpu.memory_space<vmem>>, vector<1x32x1xf32>
    %40 = vector.shape_cast %39 : vector<1x32x1xf32> to vector<32x1xf32>
    %41 = vector.shape_cast %38 : vector<32x1xf32> to vector<1x32x1xf32>
    tpu.vector_store %arg11[%c1_31, %c0_32, %c0_33], %41 {strides = array<i32>} : memref<3x32x1xf32, #tpu.memory_space<vmem>>, vector<1x32x1xf32>,
    %c2 = arith.constant 2 : index
    %c0_34 = arith.constant 0 : index
    %c0_35 = arith.constant 0 : index
    %42 = vector.load %arg2[%c2, %c0_34, %c0_35] : memref<3x32x64xi8, #tpu.memory_space<vmem>>, vector<1x32x64xi8>
    %43 = vector.shape_cast %42 : vector<1x32x64xi8> to vector<32x64xi8>
    %44 = arith.sitofp %43 : vector<32x64xi8> to vector<32x64xbf16>
    %c2_36 = arith.constant 2 : index
    %c0_37 = arith.constant 0 : index
    %c0_38 = arith.constant 0 : index
    %45 = vector.load %arg10[%c2_36, %c0_37, %c0_38] : memref<3x32x32xf32, #tpu.memory_space<vmem>>, vector<1x32x32xf32>
    %46 = vector.shape_cast %45 : vector<1x32x32xf32> to vector<32x32xf32>
    %cst_39 = arith.constant dense<0.000000e+00> : vector<32x32xf32>
    %47 = tpu.matmul %44, %3, %cst_39 {dimension_numbers = #tpu.dot_dimension_numbers<[1], [0], [0], [1], [0, 0, 1, 1], [], []>} : vector<32x64xbf16>, vector<64x32xbf16>, vector<32x32xf32> -> vector<32x32xf32>
    %48 = arith.addf %46, %47 : vector<32x32xf32>
    %c2_40 = arith.constant 2 : index
    %c0_41 = arith.constant 0 : index
    %c0_42 = arith.constant 0 : index
    %49 = vector.load %arg10[%c2_40, %c0_41, %c0_42] : memref<3x32x32xf32, #tpu.memory_space<vmem>>, vector<1x32x32xf32>
    %50 = vector.shape_cast %49 : vector<1x32x32xf32> to vector<32x32xf32>
    %51 = vector.shape_cast %48 : vector<32x32xf32> to vector<1x32x32xf32>
    tpu.vector_store %arg10[%c2_40, %c0_41, %c0_42], %51 {strides = array<i32>} : memref<3x32x32xf32, #tpu.memory_space<vmem>>, vector<1x32x32xf32>,
    %c2_43 = arith.constant 2 : index
    %c0_44 = arith.constant 0 : index
    %c0_45 = arith.constant 0 : index
    %52 = vector.load %arg11[%c2_43, %c0_44, %c0_45] : memref<3x32x1xf32, #tpu.memory_space<vmem>>, vector<1x32x1xf32>
    %53 = vector.shape_cast %52 : vector<1x32x1xf32> to vector<32x1xf32>
    %54 = arith.extf %44 : vector<32x64xbf16> to vector<32x64xf32>
    %cst_46 = arith.constant dense<0.000000e+00> : vector<32xf32>
    %55 = vector.multi_reduction <add>, %54, %cst_46 [1] : vector<32x64xf32> to vector<32xf32>
    %56 = vector.shape_cast %55 : vector<32xf32> to vector<32x1xf32>
    %57 = arith.addf %53, %56 : vector<32x1xf32>
    %c2_47 = arith.constant 2 : index
    %c0_48 = arith.constant 0 : index
    %c0_49 = arith.constant 0 : index
    %58 = vector.load %arg11[%c2_47, %c0_48, %c0_49] : memref<3x32x1xf32, #tpu.memory_space<vmem>>, vector<1x32x1xf32>
    %59 = vector.shape_cast %58 : vector<1x32x1xf32> to vector<32x1xf32>
    %60 = vector.shape_cast %57 : vector<32x1xf32> to vector<1x32x1xf32>
    tpu.vector_store %arg11[%c2_47, %c0_48, %c0_49], %60 {strides = array<i32>} : memref<3x32x1xf32, #tpu.memory_space<vmem>>, vector<1x32x1xf32>,
    %c0_i32_50 = arith.constant 0 : i32
    %61 = arith.cmpi eq, %arg1, %c0_i32_50 : i32
    %62 = arith.extui %61 : i1 to i32
    %c0_i32_51 = arith.constant 0 : i32
    %63 = arith.cmpi ne, %62, %c0_i32_51 : i32
    scf.if %63 {
      %c0_52 = arith.constant 0 : index
      %c0_53 = arith.constant 0 : index
      %c0_54 = arith.constant 0 : index
      %64 = vector.load %arg11[%c0_52, %c0_53, %c0_54] : memref<3x32x1xf32, #tpu.memory_space<vmem>>, vector<3x32x1xf32>
      %cst_55 = arith.constant 1.000000e+00 : f32
      %65 = vector.broadcast %cst_55 : f32 to vector<3x32x1xf32>
      %66 = arith.maximumf %64, %65 : vector<3x32x1xf32>
      %cst_56 = arith.constant 1.000000e+00 : f32
      %67 = vector.broadcast %cst_56 : f32 to vector<3x32x1xf32>
      %68 = arith.divf %67, %66 : vector<3x32x1xf32>
      %c0_57 = arith.constant 0 : index
      %c0_58 = arith.constant 0 : index
      %c0_59 = arith.constant 0 : index
      %69 = vector.load %arg10[%c0_57, %c0_58, %c0_59] : memref<3x32x32xf32, #tpu.memory_space<vmem>>, vector<3x32x32xf32>
      %70 = vector.broadcast %68 : vector<3x32x1xf32> to vector<3x32x32xf32>
      %71 = arith.mulf %69, %70 : vector<3x32x32xf32>
      %72 = vector.extract_strided_slice %71 {offsets = [0, 0, 0], sizes = [1, 32, 32], strides = [1, 1, 1]} : vector<3x32x32xf32> to vector<1x32x32xf32>
      %73 = vector.shape_cast %72 : vector<1x32x32xf32> to vector<32x32xf32>
      %74 = vector.extract_strided_slice %71 {offsets = [1, 0, 0], sizes = [1, 32, 32], strides = [1, 1, 1]} : vector<3x32x32xf32> to vector<1x32x32xf32>
      %75 = vector.shape_cast %74 : vector<1x32x32xf32> to vector<32x32xf32>
      %76 = arith.addf %73, %75 : vector<32x32xf32>
      %77 = vector.extract_strided_slice %71 {offsets = [2, 0, 0], sizes = [1, 32, 32], strides = [1, 1, 1]} : vector<3x32x32xf32> to vector<1x32x32xf32>
      %78 = vector.shape_cast %77 : vector<1x32x32xf32> to vector<32x32xf32>
      %79 = arith.addf %76, %78 : vector<32x32xf32>
      %c0_60 = arith.constant 0 : index
      %c0_61 = arith.constant 0 : index
      %80 = vector.load %arg4[%c0_60, %c0_61] : memref<1x32xf32, #tpu.memory_space<vmem>>, vector<1x32xf32>
      %81 = vector.broadcast %80 : vector<1x32xf32> to vector<32x32xf32>
      %82 = arith.addf %79, %81 : vector<32x32xf32>
      %cst_62 = arith.constant 0.000000e+00 : f32
      %83 = vector.broadcast %cst_62 : f32 to vector<32x32xf32>
      %84 = arith.maximumf %82, %83 : vector<32x32xf32>
      %85 = arith.truncf %84 : vector<32x32xf32> to vector<32x32xbf16>
      %c0_63 = arith.constant 0 : index
      %c0_64 = arith.constant 0 : index
      %86 = vector.load %arg8[%c0_63, %c0_64] : memref<32x32xbf16, #tpu.memory_space<vmem>>, vector<32x32xbf16>
      tpu.vector_store %arg8[%c0_63, %c0_64], %85 {strides = array<i32>} : memref<32x32xbf16, #tpu.memory_space<vmem>>, vector<32x32xbf16>,
    } else {
    }
    return
  }
  func.func @transform_0(%arg0: i32, %arg1: i32) -> (i32, i32, i32) {
    %c0_i32 = arith.constant 0 : i32
    %c0_i32_0 = arith.constant 0 : i32
    return %c0_i32, %arg0, %arg1 : i32, i32, i32
  }
  func.func @transform_1(%arg0: i32, %arg1: i32) -> (i32, i32) {
    %c0_i32 = arith.constant 0 : i32
    %c0_i32_0 = arith.constant 0 : i32
    return %arg1, %c0_i32 : i32, i32
  }
  func.func @transform_2(%arg0: i32, %arg1: i32) -> (i32, i32) {
    %c0_i32 = arith.constant 0 : i32
    %c0_i32_0 = arith.constant 0 : i32
    %c0_i32_1 = arith.constant 0 : i32
    return %c0_i32, %c0_i32_0 : i32, i32
  }
  func.func @transform_3(%arg0: i32, %arg1: i32) -> (i32, i32) {
    %c0_i32 = arith.constant 0 : i32
    %c0_i32_0 = arith.constant 0 : i32
    return %arg0, %c0_i32 : i32, i32
  }
  func.func @transform_4(%arg0: i32, %arg1: i32) -> (i32, i32) {
    %c0_i32 = arith.constant 0 : i32
    %c0_i32_0 = arith.constant 0 : i32
    %c0_i32_1 = arith.constant 0 : i32
    return %c0_i32, %c0_i32_0 : i32, i32
  }
  func.func @transform_5(%arg0: i32, %arg1: i32) -> (i32, i32) {
    %c0_i32 = arith.constant 0 : i32
    %c0_i32_0 = arith.constant 0 : i32
    %c0_i32_1 = arith.constant 0 : i32
    return %c0_i32, %c0_i32_0 : i32, i32
  }
  func.func @transform_6(%arg0: i32, %arg1: i32) -> (i32, i32) {
    %c0_i32 = arith.constant 0 : i32
    %c0_i32_0 = arith.constant 0 : i32
    return %arg0, %c0_i32 : i32, i32
  }
  func.func @transform_7(%arg0: i32, %arg1: i32) -> (i32, i32) {
    %c0_i32 = arith.constant 0 : i32
    %c0_i32_0 = arith.constant 0 : i32
    return %arg0, %c0_i32 : i32, i32
  }
}

module attributes {stable_mosaic.version = 11 : i64} {
  func.func @kernel(%arg0: i32, %arg1: i32, %arg2: memref<3x32x64xi8, #tpu.memory_space<vmem>>, %arg3: memref<64x32xbf16, #tpu.memory_space<vmem>>, %arg4: memref<3x32x32xbf16, #tpu.memory_space<vmem>>, %arg5: memref<1x32xf32, #tpu.memory_space<vmem>>, %arg6: memref<32x32xbf16, #tpu.memory_space<vmem>>, %arg7: memref<3x32x32xf32, #tpu.memory_space<vmem>>, %arg8: memref<3x32x1xf32, #tpu.memory_space<vmem>>) attributes {dimension_semantics = [#tpu.dimension_semantics<parallel>, #tpu.dimension_semantics<arbitrary>], iteration_bounds = array<i64: 2, 1>, scalar_prefetch = 0 : i64, scratch_operands = 2 : i64, tpu.core_type = #tpu.core_type<tc>, window_params = [{transform_indices = @transform_0, window_bounds = array<i64: 3, 32, 64>}, {transform_indices = @transform_1, window_bounds = array<i64: 64, 32>}, {pipeline_mode = #tpu.pipeline_mode<synchronous>, transform_indices = @transform_2, window_bounds = array<i64: 3, 32, 32>}, {pipeline_mode = #tpu.pipeline_mode<synchronous>, transform_indices = @transform_3, window_bounds = array<i64: 1, 32>}, {transform_indices = @transform_4, window_bounds = array<i64: 32, 32>}]} {
    %c0_i32 = arith.constant 0 : i32
    %0 = arith.cmpi eq, %arg1, %c0_i32 : i32
    %1 = arith.extui %0 : i1 to i32
    %c0_i32_0 = arith.constant 0 : i32
    %2 = arith.cmpi ne, %1, %c0_i32_0 : i32
    scf.if %2 {
      %cst_52 = arith.constant 0.000000e+00 : f32
      %64 = vector.broadcast %cst_52 : f32 to vector<3x32x32xf32>
      %c0_53 = arith.constant 0 : index
      %c0_54 = arith.constant 0 : index
      %c0_55 = arith.constant 0 : index
      %65 = vector.load %arg7[%c0_53, %c0_54, %c0_55] : memref<3x32x32xf32, #tpu.memory_space<vmem>>, vector<3x32x32xf32>
      tpu.vector_store %arg7[%c0_53, %c0_54, %c0_55], %64 {strides = array<i32>} : memref<3x32x32xf32, #tpu.memory_space<vmem>>, vector<3x32x32xf32>,
      %cst_56 = arith.constant 0.000000e+00 : f32
      %66 = vector.broadcast %cst_56 : f32 to vector<3x32x1xf32>
      %c0_57 = arith.constant 0 : index
      %c0_58 = arith.constant 0 : index
      %c0_59 = arith.constant 0 : index
      %67 = vector.load %arg8[%c0_57, %c0_58, %c0_59] : memref<3x32x1xf32, #tpu.memory_space<vmem>>, vector<3x32x1xf32>
      tpu.vector_store %arg8[%c0_57, %c0_58, %c0_59], %66 {strides = array<i32>} : memref<3x32x1xf32, #tpu.memory_space<vmem>>, vector<3x32x1xf32>,
    } else {
    }
    %c0 = arith.constant 0 : index
    %c0_1 = arith.constant 0 : index
    %3 = vector.load %arg3[%c0, %c0_1] : memref<64x32xbf16, #tpu.memory_space<vmem>>, vector<64x32xbf16>
    %c0_2 = arith.constant 0 : index
    %c0_3 = arith.constant 0 : index
    %c0_4 = arith.constant 0 : index
    %4 = vector.load %arg2[%c0_2, %c0_3, %c0_4] : memref<3x32x64xi8, #tpu.memory_space<vmem>>, vector<1x32x64xi8>
    %5 = vector.shape_cast %4 : vector<1x32x64xi8> to vector<32x64xi8>
    %6 = arith.sitofp %5 : vector<32x64xi8> to vector<32x64xbf16>
    %c0_5 = arith.constant 0 : index
    %c0_6 = arith.constant 0 : index
    %c0_7 = arith.constant 0 : index
    %7 = vector.load %arg7[%c0_5, %c0_6, %c0_7] : memref<3x32x32xf32, #tpu.memory_space<vmem>>, vector<1x32x32xf32>
    %8 = vector.shape_cast %7 : vector<1x32x32xf32> to vector<32x32xf32>
    %cst = arith.constant dense<0.000000e+00> : vector<32x32xf32>
    %9 = tpu.matmul %6, %3, %cst {dimension_numbers = #tpu.dot_dimension_numbers<[1], [0], [0], [1], [0, 0, 1, 1], [], []>} : vector<32x64xbf16>, vector<64x32xbf16>, vector<32x32xf32> -> vector<32x32xf32>
    %10 = arith.addf %8, %9 : vector<32x32xf32>
    %c0_8 = arith.constant 0 : index
    %c0_9 = arith.constant 0 : index
    %c0_10 = arith.constant 0 : index
    %11 = vector.load %arg7[%c0_8, %c0_9, %c0_10] : memref<3x32x32xf32, #tpu.memory_space<vmem>>, vector<1x32x32xf32>
    %12 = vector.shape_cast %11 : vector<1x32x32xf32> to vector<32x32xf32>
    %13 = vector.shape_cast %10 : vector<32x32xf32> to vector<1x32x32xf32>
    tpu.vector_store %arg7[%c0_8, %c0_9, %c0_10], %13 {strides = array<i32>} : memref<3x32x32xf32, #tpu.memory_space<vmem>>, vector<1x32x32xf32>,
    %c0_11 = arith.constant 0 : index
    %c0_12 = arith.constant 0 : index
    %c0_13 = arith.constant 0 : index
    %14 = vector.load %arg8[%c0_11, %c0_12, %c0_13] : memref<3x32x1xf32, #tpu.memory_space<vmem>>, vector<1x32x1xf32>
    %15 = vector.shape_cast %14 : vector<1x32x1xf32> to vector<32x1xf32>
    %16 = arith.extf %6 : vector<32x64xbf16> to vector<32x64xf32>
    %cst_14 = arith.constant dense<0.000000e+00> : vector<32xf32>
    %17 = vector.multi_reduction <add>, %16, %cst_14 [1] : vector<32x64xf32> to vector<32xf32>
    %18 = vector.shape_cast %17 : vector<32xf32> to vector<32x1xf32>
    %19 = arith.addf %15, %18 : vector<32x1xf32>
    %c0_15 = arith.constant 0 : index
    %c0_16 = arith.constant 0 : index
    %c0_17 = arith.constant 0 : index
    %20 = vector.load %arg8[%c0_15, %c0_16, %c0_17] : memref<3x32x1xf32, #tpu.memory_space<vmem>>, vector<1x32x1xf32>
    %21 = vector.shape_cast %20 : vector<1x32x1xf32> to vector<32x1xf32>
    %22 = vector.shape_cast %19 : vector<32x1xf32> to vector<1x32x1xf32>
    tpu.vector_store %arg8[%c0_15, %c0_16, %c0_17], %22 {strides = array<i32>} : memref<3x32x1xf32, #tpu.memory_space<vmem>>, vector<1x32x1xf32>,
    %c1 = arith.constant 1 : index
    %c0_18 = arith.constant 0 : index
    %c0_19 = arith.constant 0 : index
    %23 = vector.load %arg2[%c1, %c0_18, %c0_19] : memref<3x32x64xi8, #tpu.memory_space<vmem>>, vector<1x32x64xi8>
    %24 = vector.shape_cast %23 : vector<1x32x64xi8> to vector<32x64xi8>
    %25 = arith.sitofp %24 : vector<32x64xi8> to vector<32x64xbf16>
    %c1_20 = arith.constant 1 : index
    %c0_21 = arith.constant 0 : index
    %c0_22 = arith.constant 0 : index
    %26 = vector.load %arg7[%c1_20, %c0_21, %c0_22] : memref<3x32x32xf32, #tpu.memory_space<vmem>>, vector<1x32x32xf32>
    %27 = vector.shape_cast %26 : vector<1x32x32xf32> to vector<32x32xf32>
    %cst_23 = arith.constant dense<0.000000e+00> : vector<32x32xf32>
    %28 = tpu.matmul %25, %3, %cst_23 {dimension_numbers = #tpu.dot_dimension_numbers<[1], [0], [0], [1], [0, 0, 1, 1], [], []>} : vector<32x64xbf16>, vector<64x32xbf16>, vector<32x32xf32> -> vector<32x32xf32>
    %29 = arith.addf %27, %28 : vector<32x32xf32>
    %c1_24 = arith.constant 1 : index
    %c0_25 = arith.constant 0 : index
    %c0_26 = arith.constant 0 : index
    %30 = vector.load %arg7[%c1_24, %c0_25, %c0_26] : memref<3x32x32xf32, #tpu.memory_space<vmem>>, vector<1x32x32xf32>
    %31 = vector.shape_cast %30 : vector<1x32x32xf32> to vector<32x32xf32>
    %32 = vector.shape_cast %29 : vector<32x32xf32> to vector<1x32x32xf32>
    tpu.vector_store %arg7[%c1_24, %c0_25, %c0_26], %32 {strides = array<i32>} : memref<3x32x32xf32, #tpu.memory_space<vmem>>, vector<1x32x32xf32>,
    %c1_27 = arith.constant 1 : index
    %c0_28 = arith.constant 0 : index
    %c0_29 = arith.constant 0 : index
    %33 = vector.load %arg8[%c1_27, %c0_28, %c0_29] : memref<3x32x1xf32, #tpu.memory_space<vmem>>, vector<1x32x1xf32>
    %34 = vector.shape_cast %33 : vector<1x32x1xf32> to vector<32x1xf32>
    %35 = arith.extf %25 : vector<32x64xbf16> to vector<32x64xf32>
    %cst_30 = arith.constant dense<0.000000e+00> : vector<32xf32>
    %36 = vector.multi_reduction <add>, %35, %cst_30 [1] : vector<32x64xf32> to vector<32xf32>
    %37 = vector.shape_cast %36 : vector<32xf32> to vector<32x1xf32>
    %38 = arith.addf %34, %37 : vector<32x1xf32>
    %c1_31 = arith.constant 1 : index
    %c0_32 = arith.constant 0 : index
    %c0_33 = arith.constant 0 : index
    %39 = vector.load %arg8[%c1_31, %c0_32, %c0_33] : memref<3x32x1xf32, #tpu.memory_space<vmem>>, vector<1x32x1xf32>
    %40 = vector.shape_cast %39 : vector<1x32x1xf32> to vector<32x1xf32>
    %41 = vector.shape_cast %38 : vector<32x1xf32> to vector<1x32x1xf32>
    tpu.vector_store %arg8[%c1_31, %c0_32, %c0_33], %41 {strides = array<i32>} : memref<3x32x1xf32, #tpu.memory_space<vmem>>, vector<1x32x1xf32>,
    %c2 = arith.constant 2 : index
    %c0_34 = arith.constant 0 : index
    %c0_35 = arith.constant 0 : index
    %42 = vector.load %arg2[%c2, %c0_34, %c0_35] : memref<3x32x64xi8, #tpu.memory_space<vmem>>, vector<1x32x64xi8>
    %43 = vector.shape_cast %42 : vector<1x32x64xi8> to vector<32x64xi8>
    %44 = arith.sitofp %43 : vector<32x64xi8> to vector<32x64xbf16>
    %c2_36 = arith.constant 2 : index
    %c0_37 = arith.constant 0 : index
    %c0_38 = arith.constant 0 : index
    %45 = vector.load %arg7[%c2_36, %c0_37, %c0_38] : memref<3x32x32xf32, #tpu.memory_space<vmem>>, vector<1x32x32xf32>
    %46 = vector.shape_cast %45 : vector<1x32x32xf32> to vector<32x32xf32>
    %cst_39 = arith.constant dense<0.000000e+00> : vector<32x32xf32>
    %47 = tpu.matmul %44, %3, %cst_39 {dimension_numbers = #tpu.dot_dimension_numbers<[1], [0], [0], [1], [0, 0, 1, 1], [], []>} : vector<32x64xbf16>, vector<64x32xbf16>, vector<32x32xf32> -> vector<32x32xf32>
    %48 = arith.addf %46, %47 : vector<32x32xf32>
    %c2_40 = arith.constant 2 : index
    %c0_41 = arith.constant 0 : index
    %c0_42 = arith.constant 0 : index
    %49 = vector.load %arg7[%c2_40, %c0_41, %c0_42] : memref<3x32x32xf32, #tpu.memory_space<vmem>>, vector<1x32x32xf32>
    %50 = vector.shape_cast %49 : vector<1x32x32xf32> to vector<32x32xf32>
    %51 = vector.shape_cast %48 : vector<32x32xf32> to vector<1x32x32xf32>
    tpu.vector_store %arg7[%c2_40, %c0_41, %c0_42], %51 {strides = array<i32>} : memref<3x32x32xf32, #tpu.memory_space<vmem>>, vector<1x32x32xf32>,
    %c2_43 = arith.constant 2 : index
    %c0_44 = arith.constant 0 : index
    %c0_45 = arith.constant 0 : index
    %52 = vector.load %arg8[%c2_43, %c0_44, %c0_45] : memref<3x32x1xf32, #tpu.memory_space<vmem>>, vector<1x32x1xf32>
    %53 = vector.shape_cast %52 : vector<1x32x1xf32> to vector<32x1xf32>
    %54 = arith.extf %44 : vector<32x64xbf16> to vector<32x64xf32>
    %cst_46 = arith.constant dense<0.000000e+00> : vector<32xf32>
    %55 = vector.multi_reduction <add>, %54, %cst_46 [1] : vector<32x64xf32> to vector<32xf32>
    %56 = vector.shape_cast %55 : vector<32xf32> to vector<32x1xf32>
    %57 = arith.addf %53, %56 : vector<32x1xf32>
    %c2_47 = arith.constant 2 : index
    %c0_48 = arith.constant 0 : index
    %c0_49 = arith.constant 0 : index
    %58 = vector.load %arg8[%c2_47, %c0_48, %c0_49] : memref<3x32x1xf32, #tpu.memory_space<vmem>>, vector<1x32x1xf32>
    %59 = vector.shape_cast %58 : vector<1x32x1xf32> to vector<32x1xf32>
    %60 = vector.shape_cast %57 : vector<32x1xf32> to vector<1x32x1xf32>
    tpu.vector_store %arg8[%c2_47, %c0_48, %c0_49], %60 {strides = array<i32>} : memref<3x32x1xf32, #tpu.memory_space<vmem>>, vector<1x32x1xf32>,
    %c0_i32_50 = arith.constant 0 : i32
    %61 = arith.cmpi eq, %arg1, %c0_i32_50 : i32
    %62 = arith.extui %61 : i1 to i32
    %c0_i32_51 = arith.constant 0 : i32
    %63 = arith.cmpi ne, %62, %c0_i32_51 : i32
    scf.if %63 {
      %c0_52 = arith.constant 0 : index
      %c0_53 = arith.constant 0 : index
      %c0_54 = arith.constant 0 : index
      %64 = vector.load %arg8[%c0_52, %c0_53, %c0_54] : memref<3x32x1xf32, #tpu.memory_space<vmem>>, vector<3x32x1xf32>
      %cst_55 = arith.constant 1.000000e+00 : f32
      %65 = vector.broadcast %cst_55 : f32 to vector<3x32x1xf32>
      %66 = arith.maximumf %64, %65 : vector<3x32x1xf32>
      %cst_56 = arith.constant 1.000000e+00 : f32
      %67 = vector.broadcast %cst_56 : f32 to vector<3x32x1xf32>
      %68 = arith.divf %67, %66 : vector<3x32x1xf32>
      %c0_57 = arith.constant 0 : index
      %c0_58 = arith.constant 0 : index
      %c0_59 = arith.constant 0 : index
      %69 = vector.load %arg7[%c0_57, %c0_58, %c0_59] : memref<3x32x32xf32, #tpu.memory_space<vmem>>, vector<3x32x32xf32>
      %70 = vector.broadcast %68 : vector<3x32x1xf32> to vector<3x32x32xf32>
      %71 = arith.mulf %69, %70 : vector<3x32x32xf32>
      %72 = vector.extract_strided_slice %71 {offsets = [0, 0, 0], sizes = [1, 32, 32], strides = [1, 1, 1]} : vector<3x32x32xf32> to vector<1x32x32xf32>
      %73 = vector.shape_cast %72 : vector<1x32x32xf32> to vector<32x32xf32>
      %74 = arith.truncf %73 : vector<32x32xf32> to vector<32x32xbf16>
      %c0_60 = arith.constant 0 : index
      %c0_61 = arith.constant 0 : index
      %c0_62 = arith.constant 0 : index
      %75 = vector.load %arg4[%c0_60, %c0_61, %c0_62] : memref<3x32x32xbf16, #tpu.memory_space<vmem>>, vector<1x32x32xbf16>
      %76 = vector.shape_cast %75 : vector<1x32x32xbf16> to vector<32x32xbf16>
      %cst_63 = arith.constant dense<0.000000e+00> : vector<32x32xf32>
      %77 = tpu.matmul %74, %76, %cst_63 {dimension_numbers = #tpu.dot_dimension_numbers<[1], [0], [0], [1], [0, 0, 1, 1], [], []>} : vector<32x32xbf16>, vector<32x32xbf16>, vector<32x32xf32> -> vector<32x32xf32>
      %78 = vector.extract_strided_slice %71 {offsets = [1, 0, 0], sizes = [1, 32, 32], strides = [1, 1, 1]} : vector<3x32x32xf32> to vector<1x32x32xf32>
      %79 = vector.shape_cast %78 : vector<1x32x32xf32> to vector<32x32xf32>
      %80 = arith.truncf %79 : vector<32x32xf32> to vector<32x32xbf16>
      %c1_64 = arith.constant 1 : index
      %c0_65 = arith.constant 0 : index
      %c0_66 = arith.constant 0 : index
      %81 = vector.load %arg4[%c1_64, %c0_65, %c0_66] : memref<3x32x32xbf16, #tpu.memory_space<vmem>>, vector<1x32x32xbf16>
      %82 = vector.shape_cast %81 : vector<1x32x32xbf16> to vector<32x32xbf16>
      %cst_67 = arith.constant dense<0.000000e+00> : vector<32x32xf32>
      %83 = tpu.matmul %80, %82, %cst_67 {dimension_numbers = #tpu.dot_dimension_numbers<[1], [0], [0], [1], [0, 0, 1, 1], [], []>} : vector<32x32xbf16>, vector<32x32xbf16>, vector<32x32xf32> -> vector<32x32xf32>
      %84 = arith.addf %77, %83 : vector<32x32xf32>
      %85 = vector.extract_strided_slice %71 {offsets = [2, 0, 0], sizes = [1, 32, 32], strides = [1, 1, 1]} : vector<3x32x32xf32> to vector<1x32x32xf32>
      %86 = vector.shape_cast %85 : vector<1x32x32xf32> to vector<32x32xf32>
      %87 = arith.truncf %86 : vector<32x32xf32> to vector<32x32xbf16>
      %c2_68 = arith.constant 2 : index
      %c0_69 = arith.constant 0 : index
      %c0_70 = arith.constant 0 : index
      %88 = vector.load %arg4[%c2_68, %c0_69, %c0_70] : memref<3x32x32xbf16, #tpu.memory_space<vmem>>, vector<1x32x32xbf16>
      %89 = vector.shape_cast %88 : vector<1x32x32xbf16> to vector<32x32xbf16>
      %cst_71 = arith.constant dense<0.000000e+00> : vector<32x32xf32>
      %90 = tpu.matmul %87, %89, %cst_71 {dimension_numbers = #tpu.dot_dimension_numbers<[1], [0], [0], [1], [0, 0, 1, 1], [], []>} : vector<32x32xbf16>, vector<32x32xbf16>, vector<32x32xf32> -> vector<32x32xf32>
      %91 = arith.addf %84, %90 : vector<32x32xf32>
      %c0_72 = arith.constant 0 : index
      %c0_73 = arith.constant 0 : index
      %92 = vector.load %arg5[%c0_72, %c0_73] : memref<1x32xf32, #tpu.memory_space<vmem>>, vector<1x32xf32>
      %93 = vector.broadcast %92 : vector<1x32xf32> to vector<32x32xf32>
      %94 = arith.addf %91, %93 : vector<32x32xf32>
      %cst_74 = arith.constant 0.000000e+00 : f32
      %95 = vector.broadcast %cst_74 : f32 to vector<32x32xf32>
      %96 = arith.maximumf %94, %95 : vector<32x32xf32>
      %97 = arith.truncf %96 : vector<32x32xf32> to vector<32x32xbf16>
      %c0_75 = arith.constant 0 : index
      %c0_76 = arith.constant 0 : index
      %98 = vector.load %arg6[%c0_75, %c0_76] : memref<32x32xbf16, #tpu.memory_space<vmem>>, vector<32x32xbf16>
      tpu.vector_store %arg6[%c0_75, %c0_76], %97 {strides = array<i32>} : memref<32x32xbf16, #tpu.memory_space<vmem>>, vector<32x32xbf16>,
    } else {
    }
    return
  }
  func.func @transform_0(%arg0: i32, %arg1: i32) -> (i32, i32, i32) {
    %c0_i32 = arith.constant 0 : i32
    %c0_i32_0 = arith.constant 0 : i32
    return %c0_i32, %arg0, %arg1 : i32, i32, i32
  }
  func.func @transform_1(%arg0: i32, %arg1: i32) -> (i32, i32) {
    %c0_i32 = arith.constant 0 : i32
    %c0_i32_0 = arith.constant 0 : i32
    return %arg1, %c0_i32 : i32, i32
  }
  func.func @transform_2(%arg0: i32, %arg1: i32) -> (i32, i32, i32) {
    %c0_i32 = arith.constant 0 : i32
    %c0_i32_0 = arith.constant 0 : i32
    %c0_i32_1 = arith.constant 0 : i32
    %c0_i32_2 = arith.constant 0 : i32
    return %c0_i32, %c0_i32_0, %c0_i32_1 : i32, i32, i32
  }
  func.func @transform_3(%arg0: i32, %arg1: i32) -> (i32, i32) {
    %c0_i32 = arith.constant 0 : i32
    %c0_i32_0 = arith.constant 0 : i32
    %c0_i32_1 = arith.constant 0 : i32
    return %c0_i32, %c0_i32_0 : i32, i32
  }
  func.func @transform_4(%arg0: i32, %arg1: i32) -> (i32, i32) {
    %c0_i32 = arith.constant 0 : i32
    %c0_i32_0 = arith.constant 0 : i32
    return %arg0, %c0_i32 : i32, i32
  }
}

module attributes {stable_mosaic.version = 11 : i64} {
  func.func @kernel(%arg0: i32, %arg1: i32, %arg2: memref<3x32x64xi8, #tpu.memory_space<vmem>>, %arg3: memref<64x32xbf16, #tpu.memory_space<vmem>>, %arg4: memref<3x32x16xbf16, #tpu.memory_space<vmem>>, %arg5: memref<1x16xf32, #tpu.memory_space<vmem>>, %arg6: memref<32x32xbf16, #tpu.memory_space<vmem>>, %arg7: memref<32x32xbf16, #tpu.memory_space<vmem>>, %arg8: memref<1x32xf32, #tpu.memory_space<vmem>>, %arg9: memref<32x16xf32, #tpu.memory_space<vmem>>, %arg10: memref<32x32xf32, #tpu.memory_space<vmem>>, %arg11: memref<3x32x32xf32, #tpu.memory_space<vmem>>, %arg12: memref<3x32x1xf32, #tpu.memory_space<vmem>>) attributes {dimension_semantics = [#tpu.dimension_semantics<parallel>, #tpu.dimension_semantics<arbitrary>], iteration_bounds = array<i64: 2, 1>, scalar_prefetch = 0 : i64, scratch_operands = 2 : i64, tpu.core_type = #tpu.core_type<tc>, window_params = [{transform_indices = @transform_0, window_bounds = array<i64: 3, 32, 64>}, {transform_indices = @transform_1, window_bounds = array<i64: 64, 32>}, {pipeline_mode = #tpu.pipeline_mode<synchronous>, transform_indices = @transform_2, window_bounds = array<i64: 3, 32, 16>}, {pipeline_mode = #tpu.pipeline_mode<synchronous>, transform_indices = @transform_3, window_bounds = array<i64: 1, 16>}, {transform_indices = @transform_4, window_bounds = array<i64: 32, 32>}, {pipeline_mode = #tpu.pipeline_mode<synchronous>, transform_indices = @transform_5, window_bounds = array<i64: 32, 32>}, {pipeline_mode = #tpu.pipeline_mode<synchronous>, transform_indices = @transform_6, window_bounds = array<i64: 1, 32>}, {transform_indices = @transform_7, window_bounds = array<i64: 32, 16>}, {transform_indices = @transform_8, window_bounds = array<i64: 32, 32>}]} {
    %c0_i32 = arith.constant 0 : i32
    %0 = arith.cmpi eq, %arg1, %c0_i32 : i32
    %1 = arith.extui %0 : i1 to i32
    %c0_i32_0 = arith.constant 0 : i32
    %2 = arith.cmpi ne, %1, %c0_i32_0 : i32
    scf.if %2 {
      %cst_52 = arith.constant 0.000000e+00 : f32
      %64 = vector.broadcast %cst_52 : f32 to vector<3x32x32xf32>
      %c0_53 = arith.constant 0 : index
      %c0_54 = arith.constant 0 : index
      %c0_55 = arith.constant 0 : index
      %65 = vector.load %arg11[%c0_53, %c0_54, %c0_55] : memref<3x32x32xf32, #tpu.memory_space<vmem>>, vector<3x32x32xf32>
      tpu.vector_store %arg11[%c0_53, %c0_54, %c0_55], %64 {strides = array<i32>} : memref<3x32x32xf32, #tpu.memory_space<vmem>>, vector<3x32x32xf32>,
      %cst_56 = arith.constant 0.000000e+00 : f32
      %66 = vector.broadcast %cst_56 : f32 to vector<3x32x1xf32>
      %c0_57 = arith.constant 0 : index
      %c0_58 = arith.constant 0 : index
      %c0_59 = arith.constant 0 : index
      %67 = vector.load %arg12[%c0_57, %c0_58, %c0_59] : memref<3x32x1xf32, #tpu.memory_space<vmem>>, vector<3x32x1xf32>
      tpu.vector_store %arg12[%c0_57, %c0_58, %c0_59], %66 {strides = array<i32>} : memref<3x32x1xf32, #tpu.memory_space<vmem>>, vector<3x32x1xf32>,
      %c0_60 = arith.constant 0 : index
      %c0_61 = arith.constant 0 : index
      %68 = vector.load %arg6[%c0_60, %c0_61] : memref<32x32xbf16, #tpu.memory_space<vmem>>, vector<32x32xbf16>
      %c0_62 = arith.constant 0 : index
      %c0_63 = arith.constant 0 : index
      %69 = vector.load %arg7[%c0_62, %c0_63] : memref<32x32xbf16, #tpu.memory_space<vmem>>, vector<32x32xbf16>
      %cst_64 = arith.constant dense<0.000000e+00> : vector<32x32xf32>
      %70 = tpu.matmul %68, %69, %cst_64 {dimension_numbers = #tpu.dot_dimension_numbers<[1], [0], [0], [1], [0, 0, 1, 1], [], []>} : vector<32x32xbf16>, vector<32x32xbf16>, vector<32x32xf32> -> vector<32x32xf32>
      %c0_65 = arith.constant 0 : index
      %c0_66 = arith.constant 0 : index
      %71 = vector.load %arg8[%c0_65, %c0_66] : memref<1x32xf32, #tpu.memory_space<vmem>>, vector<1x32xf32>
      %72 = vector.broadcast %71 : vector<1x32xf32> to vector<32x32xf32>
      %73 = arith.addf %70, %72 : vector<32x32xf32>
      %c0_67 = arith.constant 0 : index
      %c0_68 = arith.constant 0 : index
      %74 = vector.load %arg10[%c0_67, %c0_68] : memref<32x32xf32, #tpu.memory_space<vmem>>, vector<32x32xf32>
      tpu.vector_store %arg10[%c0_67, %c0_68], %73 {strides = array<i32>} : memref<32x32xf32, #tpu.memory_space<vmem>>, vector<32x32xf32>,
    } else {
    }
    %c0 = arith.constant 0 : index
    %c0_1 = arith.constant 0 : index
    %3 = vector.load %arg3[%c0, %c0_1] : memref<64x32xbf16, #tpu.memory_space<vmem>>, vector<64x32xbf16>
    %c0_2 = arith.constant 0 : index
    %c0_3 = arith.constant 0 : index
    %c0_4 = arith.constant 0 : index
    %4 = vector.load %arg2[%c0_2, %c0_3, %c0_4] : memref<3x32x64xi8, #tpu.memory_space<vmem>>, vector<1x32x64xi8>
    %5 = vector.shape_cast %4 : vector<1x32x64xi8> to vector<32x64xi8>
    %6 = arith.sitofp %5 : vector<32x64xi8> to vector<32x64xbf16>
    %c0_5 = arith.constant 0 : index
    %c0_6 = arith.constant 0 : index
    %c0_7 = arith.constant 0 : index
    %7 = vector.load %arg11[%c0_5, %c0_6, %c0_7] : memref<3x32x32xf32, #tpu.memory_space<vmem>>, vector<1x32x32xf32>
    %8 = vector.shape_cast %7 : vector<1x32x32xf32> to vector<32x32xf32>
    %cst = arith.constant dense<0.000000e+00> : vector<32x32xf32>
    %9 = tpu.matmul %6, %3, %cst {dimension_numbers = #tpu.dot_dimension_numbers<[1], [0], [0], [1], [0, 0, 1, 1], [], []>} : vector<32x64xbf16>, vector<64x32xbf16>, vector<32x32xf32> -> vector<32x32xf32>
    %10 = arith.addf %8, %9 : vector<32x32xf32>
    %c0_8 = arith.constant 0 : index
    %c0_9 = arith.constant 0 : index
    %c0_10 = arith.constant 0 : index
    %11 = vector.load %arg11[%c0_8, %c0_9, %c0_10] : memref<3x32x32xf32, #tpu.memory_space<vmem>>, vector<1x32x32xf32>
    %12 = vector.shape_cast %11 : vector<1x32x32xf32> to vector<32x32xf32>
    %13 = vector.shape_cast %10 : vector<32x32xf32> to vector<1x32x32xf32>
    tpu.vector_store %arg11[%c0_8, %c0_9, %c0_10], %13 {strides = array<i32>} : memref<3x32x32xf32, #tpu.memory_space<vmem>>, vector<1x32x32xf32>,
    %c0_11 = arith.constant 0 : index
    %c0_12 = arith.constant 0 : index
    %c0_13 = arith.constant 0 : index
    %14 = vector.load %arg12[%c0_11, %c0_12, %c0_13] : memref<3x32x1xf32, #tpu.memory_space<vmem>>, vector<1x32x1xf32>
    %15 = vector.shape_cast %14 : vector<1x32x1xf32> to vector<32x1xf32>
    %16 = arith.extf %6 : vector<32x64xbf16> to vector<32x64xf32>
    %cst_14 = arith.constant dense<0.000000e+00> : vector<32xf32>
    %17 = vector.multi_reduction <add>, %16, %cst_14 [1] : vector<32x64xf32> to vector<32xf32>
    %18 = vector.shape_cast %17 : vector<32xf32> to vector<32x1xf32>
    %19 = arith.addf %15, %18 : vector<32x1xf32>
    %c0_15 = arith.constant 0 : index
    %c0_16 = arith.constant 0 : index
    %c0_17 = arith.constant 0 : index
    %20 = vector.load %arg12[%c0_15, %c0_16, %c0_17] : memref<3x32x1xf32, #tpu.memory_space<vmem>>, vector<1x32x1xf32>
    %21 = vector.shape_cast %20 : vector<1x32x1xf32> to vector<32x1xf32>
    %22 = vector.shape_cast %19 : vector<32x1xf32> to vector<1x32x1xf32>
    tpu.vector_store %arg12[%c0_15, %c0_16, %c0_17], %22 {strides = array<i32>} : memref<3x32x1xf32, #tpu.memory_space<vmem>>, vector<1x32x1xf32>,
    %c1 = arith.constant 1 : index
    %c0_18 = arith.constant 0 : index
    %c0_19 = arith.constant 0 : index
    %23 = vector.load %arg2[%c1, %c0_18, %c0_19] : memref<3x32x64xi8, #tpu.memory_space<vmem>>, vector<1x32x64xi8>
    %24 = vector.shape_cast %23 : vector<1x32x64xi8> to vector<32x64xi8>
    %25 = arith.sitofp %24 : vector<32x64xi8> to vector<32x64xbf16>
    %c1_20 = arith.constant 1 : index
    %c0_21 = arith.constant 0 : index
    %c0_22 = arith.constant 0 : index
    %26 = vector.load %arg11[%c1_20, %c0_21, %c0_22] : memref<3x32x32xf32, #tpu.memory_space<vmem>>, vector<1x32x32xf32>
    %27 = vector.shape_cast %26 : vector<1x32x32xf32> to vector<32x32xf32>
    %cst_23 = arith.constant dense<0.000000e+00> : vector<32x32xf32>
    %28 = tpu.matmul %25, %3, %cst_23 {dimension_numbers = #tpu.dot_dimension_numbers<[1], [0], [0], [1], [0, 0, 1, 1], [], []>} : vector<32x64xbf16>, vector<64x32xbf16>, vector<32x32xf32> -> vector<32x32xf32>
    %29 = arith.addf %27, %28 : vector<32x32xf32>
    %c1_24 = arith.constant 1 : index
    %c0_25 = arith.constant 0 : index
    %c0_26 = arith.constant 0 : index
    %30 = vector.load %arg11[%c1_24, %c0_25, %c0_26] : memref<3x32x32xf32, #tpu.memory_space<vmem>>, vector<1x32x32xf32>
    %31 = vector.shape_cast %30 : vector<1x32x32xf32> to vector<32x32xf32>
    %32 = vector.shape_cast %29 : vector<32x32xf32> to vector<1x32x32xf32>
    tpu.vector_store %arg11[%c1_24, %c0_25, %c0_26], %32 {strides = array<i32>} : memref<3x32x32xf32, #tpu.memory_space<vmem>>, vector<1x32x32xf32>,
    %c1_27 = arith.constant 1 : index
    %c0_28 = arith.constant 0 : index
    %c0_29 = arith.constant 0 : index
    %33 = vector.load %arg12[%c1_27, %c0_28, %c0_29] : memref<3x32x1xf32, #tpu.memory_space<vmem>>, vector<1x32x1xf32>
    %34 = vector.shape_cast %33 : vector<1x32x1xf32> to vector<32x1xf32>
    %35 = arith.extf %25 : vector<32x64xbf16> to vector<32x64xf32>
    %cst_30 = arith.constant dense<0.000000e+00> : vector<32xf32>
    %36 = vector.multi_reduction <add>, %35, %cst_30 [1] : vector<32x64xf32> to vector<32xf32>
    %37 = vector.shape_cast %36 : vector<32xf32> to vector<32x1xf32>
    %38 = arith.addf %34, %37 : vector<32x1xf32>
    %c1_31 = arith.constant 1 : index
    %c0_32 = arith.constant 0 : index
    %c0_33 = arith.constant 0 : index
    %39 = vector.load %arg12[%c1_31, %c0_32, %c0_33] : memref<3x32x1xf32, #tpu.memory_space<vmem>>, vector<1x32x1xf32>
    %40 = vector.shape_cast %39 : vector<1x32x1xf32> to vector<32x1xf32>
    %41 = vector.shape_cast %38 : vector<32x1xf32> to vector<1x32x1xf32>
    tpu.vector_store %arg12[%c1_31, %c0_32, %c0_33], %41 {strides = array<i32>} : memref<3x32x1xf32, #tpu.memory_space<vmem>>, vector<1x32x1xf32>,
    %c2 = arith.constant 2 : index
    %c0_34 = arith.constant 0 : index
    %c0_35 = arith.constant 0 : index
    %42 = vector.load %arg2[%c2, %c0_34, %c0_35] : memref<3x32x64xi8, #tpu.memory_space<vmem>>, vector<1x32x64xi8>
    %43 = vector.shape_cast %42 : vector<1x32x64xi8> to vector<32x64xi8>
    %44 = arith.sitofp %43 : vector<32x64xi8> to vector<32x64xbf16>
    %c2_36 = arith.constant 2 : index
    %c0_37 = arith.constant 0 : index
    %c0_38 = arith.constant 0 : index
    %45 = vector.load %arg11[%c2_36, %c0_37, %c0_38] : memref<3x32x32xf32, #tpu.memory_space<vmem>>, vector<1x32x32xf32>
    %46 = vector.shape_cast %45 : vector<1x32x32xf32> to vector<32x32xf32>
    %cst_39 = arith.constant dense<0.000000e+00> : vector<32x32xf32>
    %47 = tpu.matmul %44, %3, %cst_39 {dimension_numbers = #tpu.dot_dimension_numbers<[1], [0], [0], [1], [0, 0, 1, 1], [], []>} : vector<32x64xbf16>, vector<64x32xbf16>, vector<32x32xf32> -> vector<32x32xf32>
    %48 = arith.addf %46, %47 : vector<32x32xf32>
    %c2_40 = arith.constant 2 : index
    %c0_41 = arith.constant 0 : index
    %c0_42 = arith.constant 0 : index
    %49 = vector.load %arg11[%c2_40, %c0_41, %c0_42] : memref<3x32x32xf32, #tpu.memory_space<vmem>>, vector<1x32x32xf32>
    %50 = vector.shape_cast %49 : vector<1x32x32xf32> to vector<32x32xf32>
    %51 = vector.shape_cast %48 : vector<32x32xf32> to vector<1x32x32xf32>
    tpu.vector_store %arg11[%c2_40, %c0_41, %c0_42], %51 {strides = array<i32>} : memref<3x32x32xf32, #tpu.memory_space<vmem>>, vector<1x32x32xf32>,
    %c2_43 = arith.constant 2 : index
    %c0_44 = arith.constant 0 : index
    %c0_45 = arith.constant 0 : index
    %52 = vector.load %arg12[%c2_43, %c0_44, %c0_45] : memref<3x32x1xf32, #tpu.memory_space<vmem>>, vector<1x32x1xf32>
    %53 = vector.shape_cast %52 : vector<1x32x1xf32> to vector<32x1xf32>
    %54 = arith.extf %44 : vector<32x64xbf16> to vector<32x64xf32>
    %cst_46 = arith.constant dense<0.000000e+00> : vector<32xf32>
    %55 = vector.multi_reduction <add>, %54, %cst_46 [1] : vector<32x64xf32> to vector<32xf32>
    %56 = vector.shape_cast %55 : vector<32xf32> to vector<32x1xf32>
    %57 = arith.addf %53, %56 : vector<32x1xf32>
    %c2_47 = arith.constant 2 : index
    %c0_48 = arith.constant 0 : index
    %c0_49 = arith.constant 0 : index
    %58 = vector.load %arg12[%c2_47, %c0_48, %c0_49] : memref<3x32x1xf32, #tpu.memory_space<vmem>>, vector<1x32x1xf32>
    %59 = vector.shape_cast %58 : vector<1x32x1xf32> to vector<32x1xf32>
    %60 = vector.shape_cast %57 : vector<32x1xf32> to vector<1x32x1xf32>
    tpu.vector_store %arg12[%c2_47, %c0_48, %c0_49], %60 {strides = array<i32>} : memref<3x32x1xf32, #tpu.memory_space<vmem>>, vector<1x32x1xf32>,
    %c0_i32_50 = arith.constant 0 : i32
    %61 = arith.cmpi eq, %arg1, %c0_i32_50 : i32
    %62 = arith.extui %61 : i1 to i32
    %c0_i32_51 = arith.constant 0 : i32
    %63 = arith.cmpi ne, %62, %c0_i32_51 : i32
    scf.if %63 {
      %c0_52 = arith.constant 0 : index
      %c0_53 = arith.constant 0 : index
      %c0_54 = arith.constant 0 : index
      %64 = vector.load %arg12[%c0_52, %c0_53, %c0_54] : memref<3x32x1xf32, #tpu.memory_space<vmem>>, vector<3x32x1xf32>
      %cst_55 = arith.constant 1.000000e+00 : f32
      %65 = vector.broadcast %cst_55 : f32 to vector<3x32x1xf32>
      %66 = arith.maximumf %64, %65 : vector<3x32x1xf32>
      %cst_56 = arith.constant 1.000000e+00 : f32
      %67 = vector.broadcast %cst_56 : f32 to vector<3x32x1xf32>
      %68 = arith.divf %67, %66 : vector<3x32x1xf32>
      %c0_57 = arith.constant 0 : index
      %c0_58 = arith.constant 0 : index
      %c0_59 = arith.constant 0 : index
      %69 = vector.load %arg11[%c0_57, %c0_58, %c0_59] : memref<3x32x32xf32, #tpu.memory_space<vmem>>, vector<3x32x32xf32>
      %70 = vector.broadcast %68 : vector<3x32x1xf32> to vector<3x32x32xf32>
      %71 = arith.mulf %69, %70 : vector<3x32x32xf32>
      %72 = vector.extract_strided_slice %71 {offsets = [0, 0, 0], sizes = [1, 32, 32], strides = [1, 1, 1]} : vector<3x32x32xf32> to vector<1x32x32xf32>
      %73 = vector.shape_cast %72 : vector<1x32x32xf32> to vector<32x32xf32>
      %74 = arith.truncf %73 : vector<32x32xf32> to vector<32x32xbf16>
      %c0_60 = arith.constant 0 : index
      %c0_61 = arith.constant 0 : index
      %c0_62 = arith.constant 0 : index
      %75 = vector.load %arg4[%c0_60, %c0_61, %c0_62] : memref<3x32x16xbf16, #tpu.memory_space<vmem>>, vector<1x32x16xbf16>
      %76 = vector.shape_cast %75 : vector<1x32x16xbf16> to vector<32x16xbf16>
      %cst_63 = arith.constant dense<0.000000e+00> : vector<32x16xf32>
      %77 = tpu.matmul %74, %76, %cst_63 {dimension_numbers = #tpu.dot_dimension_numbers<[1], [0], [0], [1], [0, 0, 1, 1], [], []>} : vector<32x32xbf16>, vector<32x16xbf16>, vector<32x16xf32> -> vector<32x16xf32>
      %78 = vector.extract_strided_slice %71 {offsets = [1, 0, 0], sizes = [1, 32, 32], strides = [1, 1, 1]} : vector<3x32x32xf32> to vector<1x32x32xf32>
      %79 = vector.shape_cast %78 : vector<1x32x32xf32> to vector<32x32xf32>
      %80 = arith.truncf %79 : vector<32x32xf32> to vector<32x32xbf16>
      %c1_64 = arith.constant 1 : index
      %c0_65 = arith.constant 0 : index
      %c0_66 = arith.constant 0 : index
      %81 = vector.load %arg4[%c1_64, %c0_65, %c0_66] : memref<3x32x16xbf16, #tpu.memory_space<vmem>>, vector<1x32x16xbf16>
      %82 = vector.shape_cast %81 : vector<1x32x16xbf16> to vector<32x16xbf16>
      %cst_67 = arith.constant dense<0.000000e+00> : vector<32x16xf32>
      %83 = tpu.matmul %80, %82, %cst_67 {dimension_numbers = #tpu.dot_dimension_numbers<[1], [0], [0], [1], [0, 0, 1, 1], [], []>} : vector<32x32xbf16>, vector<32x16xbf16>, vector<32x16xf32> -> vector<32x16xf32>
      %84 = arith.addf %77, %83 : vector<32x16xf32>
      %85 = vector.extract_strided_slice %71 {offsets = [2, 0, 0], sizes = [1, 32, 32], strides = [1, 1, 1]} : vector<3x32x32xf32> to vector<1x32x32xf32>
      %86 = vector.shape_cast %85 : vector<1x32x32xf32> to vector<32x32xf32>
      %87 = arith.truncf %86 : vector<32x32xf32> to vector<32x32xbf16>
      %c2_68 = arith.constant 2 : index
      %c0_69 = arith.constant 0 : index
      %c0_70 = arith.constant 0 : index
      %88 = vector.load %arg4[%c2_68, %c0_69, %c0_70] : memref<3x32x16xbf16, #tpu.memory_space<vmem>>, vector<1x32x16xbf16>
      %89 = vector.shape_cast %88 : vector<1x32x16xbf16> to vector<32x16xbf16>
      %cst_71 = arith.constant dense<0.000000e+00> : vector<32x16xf32>
      %90 = tpu.matmul %87, %89, %cst_71 {dimension_numbers = #tpu.dot_dimension_numbers<[1], [0], [0], [1], [0, 0, 1, 1], [], []>} : vector<32x32xbf16>, vector<32x16xbf16>, vector<32x16xf32> -> vector<32x16xf32>
      %91 = arith.addf %84, %90 : vector<32x16xf32>
      %c0_72 = arith.constant 0 : index
      %c0_73 = arith.constant 0 : index
      %92 = vector.load %arg5[%c0_72, %c0_73] : memref<1x16xf32, #tpu.memory_space<vmem>>, vector<1x16xf32>
      %93 = vector.broadcast %92 : vector<1x16xf32> to vector<32x16xf32>
      %94 = arith.addf %91, %93 : vector<32x16xf32>
      %c0_74 = arith.constant 0 : index
      %c0_75 = arith.constant 0 : index
      %95 = vector.load %arg9[%c0_74, %c0_75] : memref<32x16xf32, #tpu.memory_space<vmem>>, vector<32x16xf32>
      tpu.vector_store %arg9[%c0_74, %c0_75], %94 {strides = array<i32>} : memref<32x16xf32, #tpu.memory_space<vmem>>, vector<32x16xf32>,
    } else {
    }
    return
  }
  func.func @transform_0(%arg0: i32, %arg1: i32) -> (i32, i32, i32) {
    %c0_i32 = arith.constant 0 : i32
    %c0_i32_0 = arith.constant 0 : i32
    return %c0_i32, %arg0, %arg1 : i32, i32, i32
  }
  func.func @transform_1(%arg0: i32, %arg1: i32) -> (i32, i32) {
    %c0_i32 = arith.constant 0 : i32
    %c0_i32_0 = arith.constant 0 : i32
    return %arg1, %c0_i32 : i32, i32
  }
  func.func @transform_2(%arg0: i32, %arg1: i32) -> (i32, i32, i32) {
    %c0_i32 = arith.constant 0 : i32
    %c0_i32_0 = arith.constant 0 : i32
    %c0_i32_1 = arith.constant 0 : i32
    %c0_i32_2 = arith.constant 0 : i32
    return %c0_i32, %c0_i32_0, %c0_i32_1 : i32, i32, i32
  }
  func.func @transform_3(%arg0: i32, %arg1: i32) -> (i32, i32) {
    %c0_i32 = arith.constant 0 : i32
    %c0_i32_0 = arith.constant 0 : i32
    %c0_i32_1 = arith.constant 0 : i32
    return %c0_i32, %c0_i32_0 : i32, i32
  }
  func.func @transform_4(%arg0: i32, %arg1: i32) -> (i32, i32) {
    %c0_i32 = arith.constant 0 : i32
    %c0_i32_0 = arith.constant 0 : i32
    return %arg0, %c0_i32 : i32, i32
  }
  func.func @transform_5(%arg0: i32, %arg1: i32) -> (i32, i32) {
    %c0_i32 = arith.constant 0 : i32
    %c0_i32_0 = arith.constant 0 : i32
    %c0_i32_1 = arith.constant 0 : i32
    return %c0_i32, %c0_i32_0 : i32, i32
  }
  func.func @transform_6(%arg0: i32, %arg1: i32) -> (i32, i32) {
    %c0_i32 = arith.constant 0 : i32
    %c0_i32_0 = arith.constant 0 : i32
    %c0_i32_1 = arith.constant 0 : i32
    return %c0_i32, %c0_i32_0 : i32, i32
  }
  func.func @transform_7(%arg0: i32, %arg1: i32) -> (i32, i32) {
    %c0_i32 = arith.constant 0 : i32
    %c0_i32_0 = arith.constant 0 : i32
    return %arg0, %c0_i32 : i32, i32
  }
  func.func @transform_8(%arg0: i32, %arg1: i32) -> (i32, i32) {
    %c0_i32 = arith.constant 0 : i32
    %c0_i32_0 = arith.constant 0 : i32
    return %arg0, %c0_i32 : i32, i32
  }
}

</mosaic_0001>

<bundles_post_ra>
// kernel: rgcn_nc_forward.3
= control target key start
LH: loop header
LB: loop body
LE: loop exit
PB: predicated region body
PF: predicated region fallthrough
CT: control target
= control target key end

     0   :  { %s1438_s24 = smov 0   ;;  %s1440_s25 = smov 0   ;;  %s1674_s0 = inlined_call_operand.vmem [shape: s8[3,64,64], index: 0, kind: input, shape index: {}]   ;;  %s1675_s1 = inlined_call_operand.vmem [shape: bf16[64,32], index: 1, kind: input, shape index: {}, may-alias: {1,3}]   ;;  %s1676_s2 = inlined_call_operand.vmem [shape: f32[1,32], index: 2, kind: input, shape index: {}]   ;;  %s1677_s3 = inlined_call_operand.vmem [shape: bf16[64,32], index: 3, kind: input, shape index: {}, may-alias: {1,3}]   ;;  %s1678_s4 = inlined_call_operand.vmem [shape: bf16[32,32], index: 4, kind: input, shape index: {}]   ;;  %s1679_s5 = inlined_call_operand.vmem [shape: f32[1,32], index: 5, kind: input, shape index: {}]   ;;  %s1680_s6 = inlined_call_operand.vmem [shape: bf16[64,32], index: 6, kind: output, shape index: {0}]   ;;  %s1681_s7 = inlined_call_operand.vmem [shape: f32[64,32], index: 7, kind: output, shape index: {1}]  }
   0x1   :  { %s1442_s26 = smov 0   ;;  %s1444_s27 = smov 0  }
   0x2   :  { %s1446_s28 = smov 0  }
   0x3 LB: > { %s30_s29 = sadd.s32 1, %s1390_s27  ;;  %p46_p1 = scmp.ne.s32.totalorder %s1382_s25, %s1378_s24  ;;  %s1394_s28 = sphi %s1446_s28, %s18_s28   ;;  %s1390_s27 = sphi %s1444_s27, %s1686_s27   ;;  %s1386_s26 = sphi %s1442_s26, %s1685_s26   ;;  %s1382_s25 = sphi %s1440_s25, %s1684_s25   ;;  %s1378_s24 = sphi %s1438_s24, %s1683_s24  }
   0x4   : > { %p32_p0 = scmp.ge.s32.totalorder %s30_s29, 2  ;;  %p47_p2 = scmp.eq.s32.totalorder %s1394_s28, 0 }
   0x5   : > { %s39_s8 = sadd.s32 1, %s1382_s25  ;;  %p1173_p5 = scmp.ge.s32.totalorder %s1394_s28, 2 }
   0x6   : > { %s1688_s29 = smov (%p32_p0, %s30_s29), 0  ;;  %p48_p3 = por %p47_p2, %p46_p1 }
   0x7   : > { %s34_s30 = ssub.s32 %s1390_s27, %s1688_s29  ;;  %257 = sbr.rel (%p1173_p5) target bundleno = 21 (0x15), region = 32 }
   0x8   : > { %p37_p4 = scmp.eq.s32.totalorder %s34_s30, 0 }
   0xa   : > { %s1473_s9 = scalar_select %p37_p4, %s1382_s25, %s39_s8  }
   0xe   : > { %260 = sbr.rel (!%p48_p3) target bundleno = 21 (0x15), region = 36  ;;  %s262_s10 = sand.u32 (%p48_p3), 1, %s1382_s25  }
   0xf   : > { %s1174_s11 = sshll.u32 (%p48_p3), %s1390_s27, 3  ;;  %s1278_s12 = smul.u32 (%p48_p3), 24, %s262_s10 }
  0x10   : > { %s267_s15 = scalar_lea.vmem (%p48_p3), %s1674_s0, %s1174_s11 }
  0x11   : > { %v299_v0 = vld [vmem:[%s267_s15] sm:$0xff] (%p48_p3)  ;;  %v301_v1 = vld [vmem:[%s267_s15 + $0x10] sm:$0xff] (%p48_p3)  ;;  %s264_s16 = scalar_lea.vmem (%p48_p3), [#allocation4], %s1278_s12 }
  0x12   : > { %v303_v2 = vld [vmem:[%s267_s15 + $0x20] sm:$0xff] (%p48_p3)  ;;  %300 = vst [vmem:[%s264_s16] sm:$0xff] (%p48_p3), %v299_v0  ;;  %302 = vst [vmem:[%s264_s16 + $0x8] sm:$0xff] (%p48_p3), %v301_v1 }
  0x13   : > { %304 = vst [vmem:[%s264_s16 + $0x10] sm:$0xff] (%p48_p3), %v303_v2 }
  0x15 PF: > { %p1175_p6 = scmp.ge.s32.totalorder %s1394_s28, 1  ;;  %p318_p7 = scmp.lt.s32.totalorder %s1394_s28, 3 }
  0x17   : > { %p319_p8 = pnand %p1175_p6, %p318_p7 }
  0x18   : > { %s325_s17 = sand.u32 (!%p319_p8), 1, %s1378_s24   ;;  %v1324_v3 = vld [vmem:[%s1678_s4] sm:$0xff] (!%p319_p8)   ;;  %s1176_s23 = sshll.u32 (!%p319_p8), %s1386_s26, 2  ;;  %v1326_v5 = vld [vmem:[%s1678_s4 + $0x8] sm:$0xff] (!%p319_p8)   ;;  %vm400_vm0 = vcmask (!%p319_p8), 261120   ;;  %v1396_v11 = vmov (!%p319_p8), 0.0  }
  0x19   : > { %322 = sbr.rel (%p319_p8) target bundleno = 375 (0x177), region = 78  ;;  %v1490_v4 = vld [vmem:[%s1675_s1] sm:$0xff] (!%p319_p8)   ;;  %1234 = vmatprep.subr.bf16.mxu0 (!%p319_p8), %v1324_v3  ;;  %p1503_p9 = scmp.lt.s32.totalorder (!%p319_p8), %s1176_s23, 7  ;;  %v1513_v10 = vld [vmem:[%s1675_s1 + $0x8] sm:$0xff] (!%p319_p8)   ;;  %401 = vst.msk [vmem:[#allocation2] sm:$0xff] (!%p319_p8), %vm400_vm0, %v1396_v11  ;;  %402 = vst.msk [vmem:[#allocation2 + $0x8] sm:$0xff] (!%p319_p8), %vm400_vm0, %v1396_v11 }
  0x1a   : > { %s1279_s18 = smul.u32 (!%p319_p8), 24, %s325_s17  ;;  %1235 = vmatpush3.bf16.msra.mxu0 (!%p319_p8), %v1324_v3  ;;  %1242 = vmatprep.subr.bf16.mxu1 (!%p319_p8), %v1490_v4  ;;  %403 = vst.msk [vmem:[#allocation2 + $0x10] sm:$0xff] (!%p319_p8), %vm400_vm0, %v1396_v11  ;;  %404 = vst.msk [vmem:[#allocation2 + $0x18] sm:$0xff] (!%p319_p8), %vm400_vm0, %v1396_v11  ;;  %vm561_vm1 = vcmask (!%p319_p8), 523264   ;;  %v1541_v17 = vld [vmem:[%s1675_s1 + $0x10] sm:$0xff] (!%p319_p8)   ;;  %v1559_v23 = vld [vmem:[%s1675_s1 + $0x18] sm:$0xff] (!%p319_p8)  }
  0x1b   : > { %1243 = vmatpush3.bf16.msra.mxu1 (!%p319_p8), %v1490_v4  ;;  %1236 = vmatprep.subr.bf16.mxu0 (!%p319_p8), %v1326_v5  ;;  %405 = vst.msk [vmem:[#allocation2 + $0x20] sm:$0xff] (!%p319_p8), %vm400_vm0, %v1396_v11  ;;  %406 = vst.msk [vmem:[#allocation2 + $0x28] sm:$0xff] (!%p319_p8), %vm400_vm0, %v1396_v11  ;;  %vm413_vm2 = vcmask (!%p319_p8), 7168   ;;  %v1397_v45 = vmov (!%p319_p8), 0   ;;  %vm1031_vm3 = vcmask (!%p319_p8), 257024  }
  0x1c   : > { %s1496_s10 = scalar_lea.vmem (!%p319_p8), [#allocation4], %s1279_s18  ;;  %407 = vst.msk [vmem:[#allocation2 + $0x30] sm:$0xff] (!%p319_p8), %vm400_vm0, %v1396_v11  ;;  %408 = vst.msk [vmem:[#allocation2 + $0x38] sm:$0xff] (!%p319_p8), %vm400_vm0, %v1396_v11  ;;  %1244 = vmatprep.subr.bf16.mxu1 (!%p319_p8), %v1513_v10  ;;  %1322 = vset.pattern.permute.xlu0 (!%p319_p8), %v1397_v45 }
  0x1d   : > { %v530_v6 = vld [vmem:[%s1496_s10] sm:$0xff] (!%p319_p8)  ;;  %v1195_v7 = vld [vmem:[%s1496_s10 + $0x8] sm:$0xff] (!%p319_p8)  ;;  %409 = vst.msk [vmem:[#allocation2 + $0x40] sm:$0xff] (!%p319_p8), %vm400_vm0, %v1396_v11  ;;  %410 = vst.msk [vmem:[#allocation2 + $0x48] sm:$0xff] (!%p319_p8), %vm400_vm0, %v1396_v11  ;;  %1323 = vset.pattern.permute.xlu1 (!%p319_p8), %v1397_v45 }
  0x1e   : > { %v531_v8 = vunpack.c.l.s8.bf16 (!%p319_p8), %v530_v6  ;;  %v1507_v9 = vunpack.c.l.s8.bf16 (!%p319_p8), %v1195_v7  ;;  %411 = vst.msk [vmem:[#allocation2 + $0x50] sm:$0xff] (!%p319_p8), %vm400_vm0, %v1396_v11  ;;  %412 = vst.msk [vmem:[#allocation2 + $0x58] sm:$0xff] (!%p319_p8), %vm400_vm0, %v1396_v11  ;;  %v1527_v12 = vunpack.c.h.s8.bf16 (!%p319_p8), %v1195_v7  ;;  %1237 = vmatpush3.bf16.msra.mxu0 (!%p319_p8), %v1326_v5  ;;  %v532_v20 = vunpack.c.h.s8.bf16 (!%p319_p8), %v530_v6  ;;  %v1198_v22 = vld [vmem:[%s1496_s10 + $0x10] sm:$0xff] (!%p319_p8) }
  0x1f   : > { %1245 = vmatpush3.bf16.msra.mxu1 (!%p319_p8), %v1513_v10  ;;  %1254 = vmatprep.subr.bf16.mxu0 (!%p319_p8), %v1490_v4  ;;  %v758_v29 = vunpack.c.l.s8.bf16 (!%p319_p8), %v1198_v22  ;;  %415 = vst.msk [vmem:[#allocation3 + $0x8] sm:$0xff] (!%p319_p8), %vm413_vm2, %v1396_v11  ;;  %414 = vst.msk [vmem:[#allocation3] sm:$0xff] (!%p319_p8), %vm413_vm2, %v1396_v11  ;;  %v759_v34 = vunpack.c.h.s8.bf16 (!%p319_p8), %v1198_v22 }
  0x20   : > { %s1690_s23 = smov (!%p1503_p9, %s1176_s23), 7  ;;  %v631_v13 = vunpack.c.h.bf16 %v531_v8  ;;  %v630_v14 = vunpack.c.l.bf16 %v531_v8  ;;  %v733_v15 = vunpack.c.h.bf16 %v1507_v9  ;;  %v732_v16 = vunpack.c.l.bf16 %v1507_v9  ;;  %1250 = vmatprep.mubr.msk.bf16.mxu1 %vm561_vm1, %v531_v8  ;;  %1246 = vmatprep.subr.bf16.mxu1 %v1541_v17  ;;  %416 = vst.msk [vmem:[#allocation3 + $0x10] sm:$0xff] %vm413_vm2, %v1396_v11  ;;  %417 = vst.msk [vmem:[#allocation3 + $0x18] sm:$0xff] %vm413_vm2, %v1396_v11 }
  0x21   : > { %s1177_s26 = sshll.u32 %s1690_s23, 2  ;;  %v734_v25 = vunpack.c.l.bf16 %v1527_v12  ;;  %v632_v26 = vunpack.c.l.bf16 %v532_v20  ;;  %418 = vst.msk [vmem:[#allocation3 + $0x20] sm:$0xff] %vm413_vm2, %v1396_v11  ;;  %419 = vst.msk [vmem:[#allocation3 + $0x28] sm:$0xff] %vm413_vm2, %v1396_v11  ;;  %v633_v31 = vunpack.c.h.bf16 %v532_v20  ;;  %v833_v33 = vunpack.c.l.bf16 %v758_v29  ;;  %s1181_s20 = sshll.u32 %s1690_s23, 3 }
  0x22   : > { %v637_v18 = vsel %vm561_vm1, %v631_v13, 0.0  ;;  %v634_v19 = vsel %vm561_vm1, %v630_v14, 0.0  ;;  %s381_s17 = scalar_lea.vmem %s1677_s3, %s1177_s26  ;;  %v739_v21 = vsel %vm561_vm1, %v733_v15, 0.0  ;;  %v736_v24 = vsel %vm561_vm1, %v732_v16, 0.0  ;;  %420 = vst.msk [vmem:[#allocation3 + $0x30] sm:$0xff] %vm413_vm2, %v1396_v11  ;;  %421 = vst.msk [vmem:[#allocation3 + $0x38] sm:$0xff] %vm413_vm2, %v1396_v11  ;;  %s393_s10 = scalar_lea.vmem %s1681_s7, %s1181_s20 }
  0x23   : > { %638 = vadd.xlane.f32.xlu1 %v637_v18  ;;  %635 = vadd.xlane.f32.xlu0 %v634_v19  ;;  %v1328_v27 = vld [vmem:[%s381_s17] sm:$0xff]   ;;  %v1329_v28 = vld [vmem:[%s381_s17 + $0x8] sm:$0xff]   ;;  %422 = vst.msk [vmem:[#allocation3 + $0x40] sm:$0xff] %vm413_vm2, %v1396_v11  ;;  %423 = vst.msk [vmem:[#allocation3 + $0x48] sm:$0xff] %vm413_vm2, %v1396_v11  ;;  %v742_v30 = vsel %vm561_vm1, %v734_v25, 0.0  ;;  %v640_v32 = vsel %vm561_vm1, %v632_v26, 0.0  ;;  %v834_v36 = vunpack.c.h.bf16 %v758_v29  ;;  %v735_v38 = vunpack.c.h.bf16 %v1527_v12  ;;  %s387_s14 = scalar_lea.vmem %s1680_s6, %s1177_s26 }
  0x24   : > { %1238 = vmatprep.mubr.msk.bf16.mxu0 %vm400_vm0, %v1328_v27  ;;  %1247 = vmatpush3.bf16.msra.mxu1 %v1541_v17  ;;  %424 = vst.msk [vmem:[#allocation3 + $0x50] sm:$0xff] %vm413_vm2, %v1396_v11  ;;  %425 = vst.msk [vmem:[#allocation3 + $0x58] sm:$0xff] %vm413_vm2, %v1396_v11  ;;  %v643_v35 = vsel %vm561_vm1, %v633_v31, 0.0  ;;  %v837_v37 = vsel %vm561_vm1, %v833_v33, 0.0  ;;  %v836_v40 = vunpack.c.h.bf16 %v759_v34  ;;  %v835_v42 = vunpack.c.l.bf16 %v759_v34 }
  0x25   : > { %1239 = vmatmul.mubr.msk.bf16.vlgmr.msra.gmra.mrb[0].mxu0 %vm400_vm0, %v1329_v28  ;;  %1248 = vmatprep.subr.bf16.mxu1 %v1559_v23  ;;  %v840_v39 = vsel %vm561_vm1, %v834_v36, 0.0  ;;  %v745_v41 = vsel %vm561_vm1, %v735_v38, 0.0 }
  0x26   : > { %1255 = vmatpush3.bf16.msra.mxu0 %v1490_v4  ;;  %1262 = vmatprep.mubr.msk.bf16.mxu0 %vm561_vm1, %v1507_v9  ;;  %v846_v43 = vsel %vm561_vm1, %v836_v40, 0.0  ;;  %v843_v44 = vsel %vm561_vm1, %v835_v42, 0.0  ;;  %v627_v46 = vld [vmem:[#allocation3 + $0x8] sm:$0xff]  ;;  %v626_v47 = vld [vmem:[#allocation3] sm:$0xff] }
  0x27   : > { %740 = vadd.xlane.f32.xlu1 %v739_v21  ;;  %737 = vadd.xlane.f32.xlu0 %v736_v24  ;;  %v628_v59 = vld [vmem:[#allocation3 + $0x10] sm:$0xff]  ;;  %v629_v0 = vld [vmem:[#allocation3 + $0x18] sm:$0xff] }
  0x28   : > { %1256 = vmatprep.subr.bf16.mxu0 %v1513_v10  ;;  %1249 = vmatpush3.bf16.msra.mxu1 %v1559_v23  ;;  %v729_v52 = vld [vmem:[#allocation3 + $0x28] sm:$0xff]  ;;  %v728_v53 = vld [vmem:[#allocation3 + $0x20] sm:$0xff] }
  0x29   : > { %1266 = vmatprep.subr.bf16.mxu1 %v1490_v4  ;;  %v730_v58 = vld [vmem:[#allocation3 + $0x30] sm:$0xff]  ;;  %v731_v11 = vld [vmem:[#allocation3 + $0x38] sm:$0xff] }
  0x2a   : > { %1257 = vmatpush3.bf16.msra.mxu0 %v1513_v10  ;;  %v829_v2 = vld [vmem:[#allocation3 + $0x40] sm:$0xff]  ;;  %v830_v9 = vld [vmem:[#allocation3 + $0x48] sm:$0xff] }
  0x2b   : > { %743 = vadd.xlane.f32.xlu1 %v742_v30  ;;  %641 = vadd.xlane.f32.xlu0 %v640_v32  ;;  %v832_v19 = vld [vmem:[#allocation3 + $0x58] sm:$0xff] }
  0x2c   : > { %1251 = vmatmul.mubr.msk.bf16.vlgmr.msra.gmra.mrb[0].mxu1 %vm561_vm1, %v532_v20  ;;  %1258 = vmatprep.subr.bf16.mxu0 %v1541_v17  ;;  %v831_v20 = vld [vmem:[#allocation3 + $0x50] sm:$0xff] }
  0x2d   : > { %1267 = vmatpush3.bf16.msra.mxu1 %v1490_v4  ;;  %1274 = vmatprep.mubr.msk.bf16.mxu1 %vm561_vm1, %v758_v29 }
  0x2e   : > { %1268 = vmatprep.subr.bf16.mxu1 %v1513_v10  ;;  %1259 = vmatpush3.bf16.msra.mxu0 %v1541_v17 }
  0x2f   : > { %644 = vadd.xlane.f32.xlu1 %v643_v35  ;;  %838 = vadd.xlane.f32.xlu0 %v837_v37 }
  0x30   : > { %1260 = vmatprep.subr.bf16.mxu0 %v1559_v23 }
  0x31   : > { %1269 = vmatpush3.bf16.msra.mxu1 %v1513_v10 }
  0x32   : > { %1270 = vmatprep.subr.bf16.mxu1 %v1541_v17  ;;  %1261 = vmatpush3.bf16.msra.mxu0 %v1559_v23 }
  0x33   : > { %841 = vadd.xlane.f32.xlu1 %v840_v39  ;;  %746 = vadd.xlane.f32.xlu0 %v745_v41 }
  0x35   : > { %1271 = vmatpush3.bf16.msra.mxu1 %v1541_v17  ;;  %1263 = vmatmul.mubr.msk.bf16.vlgmr.msra.gmra.mrb[4].mxu0 %vm561_vm1, %v1527_v12 }
  0x36   : > { %1272 = vmatprep.subr.bf16.mxu1 %v1559_v23 }
  0x37   : > { %847 = vadd.xlane.f32.xlu1 %v846_v43  ;;  %844 = vadd.xlane.f32.xlu0 %v843_v44 }
  0x39   : > { %1273 = vmatpush3.bf16.msra.mxu1 %v1559_v23 }
  0x3c   : > { %1275 = vmatmul.mubr.msk.bf16.vlgmr.msra.gmra.mrb[4].mxu1 %vm561_vm1, %v759_v34 }
  0xb0   : > { %v639_v48 = vpop.xlane.xlu1 %638  ;;  %v636_v49 = vpop.xlane.xlu0 %635 }
  0xb1   : > { %v647_v50 = vadd.f32 %v639_v48, %v627_v46  ;;  %v646_v51 = vadd.f32 %v636_v49, %v626_v47 }
  0xb3   : > { %652 = vst.msk [vmem:[#allocation3 + $0x8] sm:$0xff] %vm413_vm2, %v647_v50  ;;  %651 = vst.msk [vmem:[#allocation3] sm:$0xff] %vm413_vm2, %v646_v51 }
  0xb4   : > { %v741_v54 = vpop.xlane.xlu1 %740  ;;  %v738_v55 = vpop.xlane.xlu0 %737 }
  0xb5   : > { %v749_v56 = vadd.f32 %v741_v54, %v729_v52  ;;  %v748_v57 = vadd.f32 %v738_v55, %v728_v53  ;;  %v1182_v54 = vld [vmem:[%s1679_s5] ss:$0 sm:$0xff] }
  0xb7   : > { %753 = vst.msk [vmem:[#allocation3 + $0x28] sm:$0xff] %vm413_vm2, %v749_v56  ;;  %752 = vst.msk [vmem:[#allocation3 + $0x20] sm:$0xff] %vm413_vm2, %v748_v57 }
  0xb8   : > { %v744_v60 = vpop.xlane.xlu1 %743  ;;  %v642_v61 = vpop.xlane.xlu0 %641 }
  0xb9   : > { %v750_v62 = vadd.f32 %v744_v60, %v730_v58  ;;  %v648_v63 = vadd.f32 %v642_v61, %v628_v59  ;;  %v535_v60 = vld [vmem:[#allocation2 + $0x10] sm:$0xff] }
  0xba   : > { %v860_v1 = vld [vmem:[#allocation3] sm:$0xff]  ;;  %v861_v6 = vld [vmem:[#allocation3 + $0x8] sm:$0xff] }
  0xbb   : > { %754 = vst.msk [vmem:[#allocation3 + $0x30] sm:$0xff] %vm413_vm2, %v750_v62  ;;  %653 = vst.msk [vmem:[#allocation3 + $0x10] sm:$0xff] %vm413_vm2, %v648_v63  ;;  %v872_v3 = vmax.f32 %v860_v1, 1.0  ;;  %v873_v13 = vmax.f32 %v861_v6, 1.0  ;;  %v533_v62 = vld [vmem:[#allocation2] sm:$0xff] }
  0xbc   : > { %v645_v4 = vpop.xlane.xlu1 %644  ;;  %v839_v5 = vpop.xlane.xlu0 %838 }
  0xbd   : > { %v649_v7 = vadd.f32 %v645_v4, %v629_v0  ;;  %1332 = vrcp.f32 %v872_v3  ;;  %v849_v8 = vadd.f32 %v839_v5, %v829_v2  ;;  %v536_v2 = vld [vmem:[#allocation2 + $0x18] sm:$0xff]  ;;  %v534_v5 = vld [vmem:[#allocation2 + $0x8] sm:$0xff] }
  0xbe   : > { %v864_v10 = vld [vmem:[#allocation3 + $0x20] sm:$0xff]  ;;  %v865_v16 = vld [vmem:[#allocation3 + $0x28] sm:$0xff] }
  0xbf   : > { %654 = vst.msk [vmem:[#allocation3 + $0x18] sm:$0xff] %vm413_vm2, %v649_v7  ;;  %853 = vst.msk [vmem:[#allocation3 + $0x40] sm:$0xff] %vm413_vm2, %v849_v8  ;;  %v876_v12 = vmax.f32 %v864_v10, 1.0  ;;  %v877_v21 = vmax.f32 %v865_v16, 1.0 }
  0xc0   : > { %v842_v14 = vpop.xlane.xlu1 %841  ;;  %v747_v15 = vpop.xlane.xlu0 %746 }
  0xc1   : > { %v850_v17 = vadd.f32 %v842_v14, %v830_v9  ;;  %1334 = vrcp.f32 %v876_v12  ;;  %v751_v18 = vadd.f32 %v747_v15, %v731_v11  ;;  %v662_v11 = vld [vmem:[#allocation2 + $0x30] sm:$0xff]  ;;  %v660_v12 = vld [vmem:[#allocation2 + $0x20] sm:$0xff]  ;;  %v663_v14 = vld [vmem:[#allocation2 + $0x38] sm:$0xff] }
  0xc2   : > { %1336 = vrcp.f32 %v873_v13  ;;  %v862_v24 = vld [vmem:[#allocation3 + $0x10] sm:$0xff] }
  0xc3   : > { %854 = vst.msk [vmem:[#allocation3 + $0x48] sm:$0xff] %vm413_vm2, %v850_v17  ;;  %755 = vst.msk [vmem:[#allocation3 + $0x38] sm:$0xff] %vm413_vm2, %v751_v18  ;;  %1338 = vrcp.f32 %v877_v21  ;;  %v874_v28 = vmax.f32 %v862_v24, 1.0  ;;  %v866_v29 = vld [vmem:[#allocation3 + $0x30] sm:$0xff]  ;;  %v661_v17 = vld [vmem:[#allocation2 + $0x28] sm:$0xff] }
  0xc4   : > { %v848_v22 = vpop.xlane.xlu1 %847  ;;  %v845_v23 = vpop.xlane.xlu0 %844  ;;  %v878_v33 = vmax.f32 %v866_v29, 1.0  ;;  %v761_v24 = vld [vmem:[#allocation2 + $0x40] sm:$0xff]  ;;  %v762_v29 = vld [vmem:[#allocation2 + $0x48] sm:$0xff] }
  0xc5   : > { %v852_v25 = vadd.f32 %v848_v22, %v832_v19  ;;  %v851_v26 = vadd.f32 %v845_v23, %v831_v20  ;;  %1340 = vrcp.f32 %v874_v28  ;;  %v763_v22 = vld [vmem:[#allocation2 + $0x50] sm:$0xff] }
  0xc6   : > { %v868_v34 = vld [vmem:[#allocation3 + $0x40] sm:$0xff]  ;;  %v863_v39 = vld [vmem:[#allocation3 + $0x18] sm:$0xff] }
  0xc7   : > { %v1333_v27 = vpop.eup %1332  ;;  %856 = vst.msk [vmem:[#allocation3 + $0x58] sm:$0xff] %vm413_vm2, %v852_v25  ;;  %855 = vst.msk [vmem:[#allocation3 + $0x50] sm:$0xff] %vm413_vm2, %v851_v26  ;;  %v880_v37 = vmax.f32 %v868_v34, 1.0  ;;  %v875_v41 = vmax.f32 %v863_v39, 1.0  ;;  %v764_v26 = vld [vmem:[#allocation2 + $0x58] sm:$0xff] }
  0xc8   : > { %922 = vperm.xlu0 %1322, %v1333_v27  }
  0xca   : > { %v869_v30 = vld [vmem:[#allocation3 + $0x48] sm:$0xff]  ;;  %v867_v42 = vld [vmem:[#allocation3 + $0x38] sm:$0xff] }
  0xcb   : > { %v1335_v31 = vpop.eup %1334  ;;  %v881_v32 = vmax.f32 %v869_v30, 1.0  ;;  %v879_v45 = vmax.f32 %v867_v42, 1.0 }
  0xcc   : > { %942 = vperm.xlu1 %1323, %v1335_v31   ;;  %v1337_v35 = vpop.eup %1336 }
  0xcd   : > { %1342 = vrcp.f32 %v881_v32  ;;  %v1339_v40 = vpop.eup %1338 }
  0xce   : > { %v871_v36 = vld [vmem:[#allocation3 + $0x58] sm:$0xff]  ;;  %1344 = vrcp.f32 %v878_v33  ;;  %v870_v46 = vld [vmem:[#allocation3 + $0x50] sm:$0xff] }
  0xcf   : > { %v883_v38 = vmax.f32 %v871_v36, 1.0  ;;  %v1341_v43 = vpop.eup %1340  ;;  %v882_v49 = vmax.f32 %v870_v46, 1.0 }
  0xd0   : > { %927 = vperm.xlu1 %1323, %v1337_v35  }
  0xd1   : > { %1346 = vrcp.f32 %v883_v38 }
  0xd2   : > { %1348 = vrcp.f32 %v880_v37 }
  0xd3   : > { %1350 = vrcp.f32 %v875_v41 }
  0xd4   : > { %947 = vperm.xlu1 %1323, %v1339_v40   ;;  %1352 = vrcp.f32 %v879_v45 }
  0xd5   : > { %1354 = vrcp.f32 %v882_v49 }
  0xd7   : > { %v1343_v44 = vpop.eup %1342 }
  0xd8   : > { %967 = vperm.xlu0 %1322, %v1343_v44   ;;  %932 = vperm.xlu1 %1323, %v1341_v43   ;;  %v1345_v47 = vpop.eup %1344 }
  0xdb   : > { %v1347_v48 = vpop.eup %1346 }
  0xdc   : > { %952 = vperm.xlu1 %1323, %v1345_v47   ;;  %977 = vperm.xlu0 %1322, %v1347_v48   ;;  %v1349_v50 = vpop.eup %1348 }
  0xdd   : > { %v1351_v51 = vpop.eup %1350 }
  0xde   : > { %v1353_v52 = vpop.eup %1352 }
  0xdf   : > { %v1355_v53 = vpop.eup %1354 }
  0xe0   : > { %962 = vperm.xlu1 %1323, %v1349_v50  }
  0xe4   : > { %937 = vperm.xlu1 %1323, %v1351_v51  }
  0xe8   : > { %957 = vperm.xlu1 %1323, %v1353_v52  }
  0xec   : > { %972 = vperm.xlu1 %1323, %v1355_v53  }
  0xf8   : > { %v1240_v55 = vpop.f32.mrb[0].mxu0 }
  0xf9   : > { %v503_v56 = vpop.f32.mrb[1].mxu0  ;;  %v512_v59 = vadd.f32 %v1240_v55, %v1182_v54  ;;  %v1201_v55 = vld [vmem:[%s1676_s2] ss:$0 sm:$0xff] }
  0xfa   : > { %v504_v57 = vadd.f32 %v1182_v54, %v503_v56  ;;  %v1241_v58 = vpop.f32.mrb[2].mxu0 }
  0xfb   : > { %v506_v61 = vpop.f32.mrb[3].mxu0  ;;  %v515_v63 = vadd.f32 %v1241_v58, %v1182_v54  ;;  %520 = vst.msk [vmem:[%s393_s10 + $0x10] sm:$0xff] %vm400_vm0, %v512_v59 }
  0xfc   : > { %518 = vst.msk [vmem:[%s393_s10] sm:$0xff] %vm400_vm0, %v504_v57  ;;  %v507_v0 = vadd.f32 %v1182_v54, %v506_v61 }
  0xfd   : > { %521 = vst.msk [vmem:[%s393_s10 + $0x18] sm:$0xff] %vm400_vm0, %v515_v63 }
  0xfe   : > { %519 = vst.msk [vmem:[%s393_s10 + $0x8] sm:$0xff] %vm400_vm0, %v507_v0 }
  0xff   : > { %v1252_v1 = vpop.f32.mrb[0].mxu1 }
 0x100   : > { %v619_v3 = vadd.f32 %v1252_v1, %v535_v60  ;;  %v602_v4 = vpop.f32.mrb[1].mxu1 }
 0x101   : > { %v617_v6 = vadd.f32 %v602_v4, %v533_v62  ;;  %v1253_v7 = vpop.f32.mrb[2].mxu1 }
 0x102   : > { %624 = vst.msk [vmem:[#allocation2 + $0x10] sm:$0xff] %vm400_vm0, %v619_v3  ;;  %v620_v8 = vadd.f32 %v1253_v7, %v536_v2  ;;  %v605_v9 = vpop.f32.mrb[3].mxu1 }
 0x103   : > { %622 = vst.msk [vmem:[#allocation2] sm:$0xff] %vm400_vm0, %v617_v6  ;;  %v618_v10 = vadd.f32 %v605_v9, %v534_v5 }
 0x104   : > { %625 = vst.msk [vmem:[#allocation2 + $0x18] sm:$0xff] %vm400_vm0, %v620_v8 }
 0x105   : > { %623 = vst.msk [vmem:[#allocation2 + $0x8] sm:$0xff] %vm400_vm0, %v618_v10 }
 0x108   : > { %v1264_v13 = vpop.f32.mrb[4].mxu0 }
 0x109   : > { %v721_v15 = vadd.f32 %v1264_v13, %v662_v11  ;;  %v704_v16 = vpop.f32.mrb[5].mxu0  ;;  %v910_v1 = vld [vmem:[#allocation2 + $0x10] sm:$0xff] }
 0x10a   : > { %v719_v18 = vadd.f32 %v704_v16, %v660_v12  ;;  %v1265_v19 = vpop.f32.mrb[6].mxu0  ;;  %v908_v48 = vld [vmem:[#allocation2] sm:$0xff] }
 0x10b   : > { %725 = vst.msk [vmem:[#allocation2 + $0x30] sm:$0xff] %vm400_vm0, %v721_v15  ;;  %v722_v20 = vadd.f32 %v1265_v19, %v663_v14  ;;  %v707_v21 = vpop.f32.mrb[7].mxu0  ;;  %v911_v3 = vld [vmem:[#allocation2 + $0x18] sm:$0xff] }
 0x10c   : > { %723 = vst.msk [vmem:[#allocation2 + $0x20] sm:$0xff] %vm400_vm0, %v719_v18  ;;  %v720_v23 = vadd.f32 %v707_v21, %v661_v17  ;;  %v909_v40 = vld [vmem:[#allocation2 + $0x8] sm:$0xff] }
 0x10d   : > { %726 = vst.msk [vmem:[#allocation2 + $0x38] sm:$0xff] %vm400_vm0, %v722_v20 }
 0x10e   : > { %724 = vst.msk [vmem:[#allocation2 + $0x28] sm:$0xff] %vm400_vm0, %v720_v23 }
 0x10f   : > { %v1276_v25 = vpop.f32.mrb[4].mxu1 }
 0x110   : > { %v822_v27 = vadd.f32 %v1276_v25, %v763_v22  ;;  %v805_v28 = vpop.f32.mrb[5].mxu1 }
 0x111   : > { %v820_v30 = vadd.f32 %v805_v28, %v761_v24  ;;  %v1277_v31 = vpop.f32.mrb[6].mxu1 }
 0x112   : > { %826 = vst.msk [vmem:[#allocation2 + $0x50] sm:$0xff] %vm400_vm0, %v822_v27  ;;  %v823_v32 = vadd.f32 %v1277_v31, %v764_v26  ;;  %v808_v33 = vpop.f32.mrb[7].mxu1  ;;  %v914_v0 = vld [vmem:[#allocation2 + $0x30] sm:$0xff] }
 0x113   : > { %824 = vst.msk [vmem:[#allocation2 + $0x40] sm:$0xff] %vm400_vm0, %v820_v30  ;;  %v821_v34 = vadd.f32 %v808_v33, %v762_v29  ;;  %v912_v45 = vld [vmem:[#allocation2 + $0x20] sm:$0xff] }
 0x114   : > { %827 = vst.msk [vmem:[#allocation2 + $0x58] sm:$0xff] %vm400_vm0, %v823_v32  ;;  %v915_v6 = vld [vmem:[#allocation2 + $0x38] sm:$0xff] }
 0x115   : > { %825 = vst.msk [vmem:[#allocation2 + $0x48] sm:$0xff] %vm400_vm0, %v821_v34  ;;  %v913_v39 = vld [vmem:[#allocation2 + $0x28] sm:$0xff] }
 0x119   : > { %v918_v17 = vld [vmem:[#allocation2 + $0x50] sm:$0xff] }
 0x11a   : > { %v916_v53 = vld [vmem:[#allocation2 + $0x40] sm:$0xff] }
 0x11b   : > { %v919_v5 = vld [vmem:[#allocation2 + $0x58] sm:$0xff] }
 0x11c   : > { %v917_v41 = vld [vmem:[#allocation2 + $0x48] sm:$0xff] }
 0x147   : > { %v923_v37 = vpop.permute.xlu0 %922 }
 0x148   : > { %v980_v54 = vmul.f32 %v923_v37, %v908_v48 }
 0x14b   : > { %v943_v35 = vpop.permute.xlu1 %942 }
 0x14c   : > { %v984_v51 = vmul.f32 %v943_v35, %v912_v45 }
 0x14e   : > { %v992_v57 = vadd.f32 %v984_v51, %v980_v54 }
 0x14f   : > { %v928_v36 = vpop.permute.xlu1 %927 }
 0x150   : > { %v981_v46 = vmul.f32 %v928_v36, %v909_v40 }
 0x153   : > { %v948_v38 = vpop.permute.xlu1 %947 }
 0x154   : > { %v985_v42 = vmul.f32 %v948_v38, %v913_v39 }
 0x156   : > { %v993_v49 = vadd.f32 %v985_v42, %v981_v46 }
 0x157   : > { %v933_v43 = vpop.permute.xlu1 %932  ;;  %v968_v44 = vpop.permute.xlu0 %967 }
 0x158   : > { %v989_v47 = vmul.f32 %v968_v44, %v917_v41  ;;  %v982_v13 = vmul.f32 %v933_v43, %v910_v1 }
 0x15a   : > { %v997_v52 = vadd.f32 %v993_v49, %v989_v47 }
 0x15b   : > { %v953_v50 = vpop.permute.xlu1 %952  ;;  %v978_v4 = vpop.permute.xlu0 %977 }
 0x15c   : > { %v1008_v59 = vadd.f32 %v1201_v55, %v997_v52  ;;  %v986_v8 = vmul.f32 %v953_v50, %v914_v0  ;;  %v991_v14 = vmul.f32 %v978_v4, %v919_v5 }
 0x15e   : > { %v1012_v63 = vmax.f32 %v1008_v59, 0.0  ;;  %v994_v18 = vadd.f32 %v986_v8, %v982_v13 }
 0x15f   : > { %v963_v56 = vpop.permute.xlu1 %962 }
 0x160   : > { %v988_v58 = vmul.f32 %v963_v56, %v916_v53  ;;  %v1209_v12 = vpack.c.bf16 %v1012_v63, %v1012_v63 }
 0x162   : > { %v996_v60 = vadd.f32 %v992_v57, %v988_v58  ;;  %1033 = vst.msk [vmem:[%s387_s14 + $0x4] sm:$0xf] %vm1031_vm3, %v1209_v12 }
 0x163   : > { %v938_v61 = vpop.permute.xlu1 %937 }
 0x164   : > { %v1007_v62 = vadd.f32 %v1201_v55, %v996_v60  ;;  %v983_v10 = vmul.f32 %v938_v61, %v911_v3 }
 0x166   : > { %v1011_v2 = vmax.f32 %v1007_v62, 0.0 }
 0x167   : > { %v958_v7 = vpop.permute.xlu1 %957 }
 0x168   : > { %v1208_v9 = vpack.c.bf16 %v1011_v2, %v1011_v2  ;;  %v987_v11 = vmul.f32 %v958_v7, %v915_v6 }
 0x16a   : > { %1032 = vst.msk [vmem:[%s387_s14] sm:$0xf] %vm1031_vm3, %v1208_v9  ;;  %v995_v15 = vadd.f32 %v987_v11, %v983_v10 }
 0x16b   : > { %v973_v16 = vpop.permute.xlu1 %972 }
 0x16c   : > { %v999_v19 = vadd.f32 %v995_v15, %v991_v14  ;;  %v990_v20 = vmul.f32 %v973_v16, %v918_v17 }
 0x16e   : > { %v1010_v21 = vadd.f32 %v1201_v55, %v999_v19  ;;  %v998_v22 = vadd.f32 %v994_v18, %v990_v20 }
 0x170   : > { %v1009_v23 = vadd.f32 %v1201_v55, %v998_v22  ;;  %v1014_v24 = vmax.f32 %v1010_v21, 0.0 }
 0x172   : > { %v1013_v25 = vmax.f32 %v1009_v23, 0.0  ;;  %v1211_v27 = vpack.c.bf16 %v1014_v24, %v1014_v24 }
 0x174   : > { %v1210_v26 = vpack.c.bf16 %v1013_v25, %v1013_v25  ;;  %1035 = vst.msk [vmem:[%s387_s14 + $0xc] sm:$0xf] %vm1031_vm3, %v1211_v27 }
 0x176   : > { %1034 = vst.msk [vmem:[%s387_s14 + $0x8] sm:$0xf] %vm1031_vm3, %v1210_v26 }
 0x177 PF: > { %s18_s28 = sadd.s32 1, %s1394_s28   ;;  %s1683_s24 = smov %s1382_s25 }
 0x178   : > { %p15_p10 = scmp.ge.s32.totalorder %s18_s28, 4   ;;  %s1684_s25 = smov %s1473_s9 }
 0x179   : > { %s1685_s26 = smov %s1390_s27  ;;  %s1686_s27 = smov %s1688_s29 }
 0x17a   :  { %17 = sbr.rel (!%p15_p10) target bundleno = 3 (0x3), region = 149 }

// kernel: rgcn_nc_forward.5
= control target key start
LH: loop header
LB: loop body
LE: loop exit
PB: predicated region body
PF: predicated region fallthrough
CT: control target
= control target key end

     0   :  { %s1729_s27 = smov 0   ;;  %s1731_s28 = smov 0   ;;  %s1963_s0 = inlined_call_operand.vmem [shape: s8[3,64,64], index: 0, kind: input, shape index: {}]   ;;  %s1964_s1 = inlined_call_operand.vmem [shape: bf16[64,32], index: 1, kind: input, shape index: {}, may-alias: {1,4}]   ;;  %s1965_s2 = inlined_call_operand.vmem [shape: bf16[3,32,16], index: 2, kind: input, shape index: {}]   ;;  %s1966_s3 = inlined_call_operand.vmem [shape: f32[1,16], index: 3, kind: input, shape index: {}]   ;;  %s1967_s4 = inlined_call_operand.vmem [shape: bf16[64,32], index: 4, kind: input, shape index: {}, may-alias: {1,4}]   ;;  %s1968_s5 = inlined_call_operand.vmem [shape: bf16[32,32], index: 5, kind: input, shape index: {}]   ;;  %s1969_s6 = inlined_call_operand.vmem [shape: f32[1,32], index: 6, kind: input, shape index: {}]   ;;  %s1970_s7 = inlined_call_operand.vmem [shape: f32[64,16], index: 7, kind: output, shape index: {0}]   ;;  %s1971_s8 = inlined_call_operand.vmem [shape: f32[64,32], index: 8, kind: output, shape index: {1}]  }
   0x1   :  { %s1733_s29 = smov 0   ;;  %s1735_s30 = smov 0  }
   0x2   :  { %s1737_s9 = smov 0  }
   0x3 LB: > { %s31_s10 = sadd.s32 1, %s1676_s30  ;;  %p47_p1 = scmp.ne.s32.totalorder %s1668_s28, %s1664_s27  ;;  %s1680_s9 = sphi %s1737_s9, %s19_s9   ;;  %s1676_s30 = sphi %s1735_s30, %s1975_s30   ;;  %s1672_s29 = sphi %s1733_s29, %s1974_s29   ;;  %s1668_s28 = sphi %s1731_s28, %s1973_s28   ;;  %s1664_s27 = sphi %s1729_s27, %s1972_s27  }
   0x4   : > { %p33_p0 = scmp.ge.s32.totalorder %s31_s10, 2  ;;  %p48_p2 = scmp.eq.s32.totalorder %s1680_s9, 0 }
   0x5   : > { %s40_s12 = sadd.s32 1, %s1668_s28  ;;  %p1397_p5 = scmp.ge.s32.totalorder %s1680_s9, 2 }
   0x6   : > { %s1977_s10 = smov (%p33_p0, %s31_s10), 0  ;;  %p49_p3 = por %p48_p2, %p47_p1 }
   0x7   : > { %s35_s11 = ssub.s32 %s1676_s30, %s1977_s10  ;;  %282 = sbr.rel (%p1397_p5) target bundleno = 21 (0x15), region = 36 }
   0x8   : > { %p38_p4 = scmp.eq.s32.totalorder %s35_s11, 0 }
   0xa   : > { %s1764_s13 = scalar_select %p38_p4, %s1668_s28, %s40_s12  }
   0xe   : > { %285 = sbr.rel (!%p49_p3) target bundleno = 21 (0x15), region = 40  ;;  %s287_s14 = sand.u32 (%p49_p3), 1, %s1668_s28  }
   0xf   : > { %s1398_s15 = sshll.u32 (%p49_p3), %s1676_s30, 3  ;;  %s1558_s16 = smul.u32 (%p49_p3), 24, %s287_s14 }
  0x10   : > { %s292_s19 = scalar_lea.vmem (%p49_p3), %s1963_s0, %s1398_s15 }
  0x11   : > { %v324_v0 = vld [vmem:[%s292_s19] sm:$0xff] (%p49_p3)  ;;  %v326_v1 = vld [vmem:[%s292_s19 + $0x10] sm:$0xff] (%p49_p3)  ;;  %s289_s20 = scalar_lea.vmem (%p49_p3), [#allocation4], %s1558_s16 }
  0x12   : > { %v328_v2 = vld [vmem:[%s292_s19 + $0x20] sm:$0xff] (%p49_p3)  ;;  %325 = vst [vmem:[%s289_s20] sm:$0xff] (%p49_p3), %v324_v0  ;;  %327 = vst [vmem:[%s289_s20 + $0x8] sm:$0xff] (%p49_p3), %v326_v1 }
  0x13   : > { %329 = vst [vmem:[%s289_s20 + $0x10] sm:$0xff] (%p49_p3), %v328_v2 }
  0x15 PF: > { %p1399_p6 = scmp.ge.s32.totalorder %s1680_s9, 1  ;;  %p343_p7 = scmp.lt.s32.totalorder %s1680_s9, 3 }
  0x17   : > { %p344_p8 = pnand %p1399_p6, %p343_p7 }
  0x18   : > { %s350_s21 = sand.u32 (!%p344_p8), 1, %s1664_s27   ;;  %v1604_v3 = vld [vmem:[%s1968_s5] sm:$0xff] (!%p344_p8)   ;;  %v1605_v4 = vld [vmem:[%s1968_s5 + $0x8] sm:$0xff] (!%p344_p8)   ;;  %s1400_s11 = sshll.u32 (!%p344_p8), %s1672_s29, 2  ;;  %vm427_vm0 = vcmask (!%p344_p8), 261120   ;;  %vm440_vm1 = vcmask (!%p344_p8), 7168  }
  0x19   : > { %347 = sbr.rel (%p344_p8) target bundleno = 590 (0x24e), region = 82  ;;  %v1785_v5 = vld [vmem:[%s1964_s1] sm:$0xff] (!%p344_p8)   ;;  %1482 = vmatprep.subr.bf16.mxu1 (!%p344_p8), %v1604_v3  ;;  %p405_p9 = scmp.lt.s32.totalorder (!%p344_p8), %s1400_s11, 7  ;;  %v1802_v11 = vld [vmem:[%s1964_s1 + $0x8] sm:$0xff] (!%p344_p8)   ;;  %v1682_v12 = vmov (!%p344_p8), 0.0   ;;  %vm588_vm2 = vcmask (!%p344_p8), 523264  }
  0x1a   : > { %s1559_s22 = smul.u32 (!%p344_p8), 24, %s350_s21  ;;  %1483 = vmatpush3.bf16.msra.mxu1 (!%p344_p8), %v1604_v3  ;;  %1502 = vmatprep.subr.bf16.mxu0 (!%p344_p8), %v1785_v5  ;;  %447 = vst.msk [vmem:[#allocation3 + $0x30] sm:$0xff] (!%p344_p8), %vm440_vm1, %v1682_v12  ;;  %441 = vst.msk [vmem:[#allocation3] sm:$0xff] (!%p344_p8), %vm440_vm1, %v1682_v12  ;;  %v1610_v21 = vld [vmem:[%s1964_s1 + $0x10] sm:$0xff] (!%p344_p8)   ;;  %v1611_v30 = vld [vmem:[%s1964_s1 + $0x18] sm:$0xff] (!%p344_p8)   ;;  %v1683_v45 = vmov (!%p344_p8), 0  }
  0x1b   : > { %1484 = vmatprep.subr.bf16.mxu1 (!%p344_p8), %v1605_v4  ;;  %1503 = vmatpush3.bf16.msra.mxu0 (!%p344_p8), %v1785_v5  ;;  %428 = vst.msk [vmem:[#allocation2] sm:$0xff] (!%p344_p8), %vm427_vm0, %v1682_v12  ;;  %429 = vst.msk [vmem:[#allocation2 + $0x8] sm:$0xff] (!%p344_p8), %vm427_vm0, %v1682_v12  ;;  %vm1255_vm3 = vcmask (!%p344_p8), 130048  }
  0x1c   : > { %s1787_s15 = scalar_lea.vmem (!%p344_p8), [#allocation4], %s1559_s22  ;;  %430 = vst.msk [vmem:[#allocation2 + $0x10] sm:$0xff] (!%p344_p8), %vm427_vm0, %v1682_v12  ;;  %431 = vst.msk [vmem:[#allocation2 + $0x18] sm:$0xff] (!%p344_p8), %vm427_vm0, %v1682_v12  ;;  %1504 = vmatprep.subr.bf16.mxu0 (!%p344_p8), %v1802_v11  ;;  %1602 = vset.pattern.permute.xlu0 (!%p344_p8), %v1683_v45 }
  0x1d   : > { %v1419_v6 = vld [vmem:[%s1787_s15 + $0x8] sm:$0xff] (!%p344_p8)  ;;  %v557_v7 = vld [vmem:[%s1787_s15] sm:$0xff] (!%p344_p8)  ;;  %432 = vst.msk [vmem:[#allocation2 + $0x20] sm:$0xff] (!%p344_p8), %vm427_vm0, %v1682_v12  ;;  %433 = vst.msk [vmem:[#allocation2 + $0x28] sm:$0xff] (!%p344_p8), %vm427_vm0, %v1682_v12  ;;  %1603 = vset.pattern.permute.xlu1 (!%p344_p8), %v1683_v45 }
  0x1e   : > { %v1792_v8 = vunpack.c.h.s8.bf16 (!%p344_p8), %v1419_v6  ;;  %v684_v9 = vunpack.c.l.s8.bf16 (!%p344_p8), %v1419_v6  ;;  %v1794_v10 = vunpack.c.l.s8.bf16 (!%p344_p8), %v557_v7  ;;  %434 = vst.msk [vmem:[#allocation2 + $0x30] sm:$0xff] (!%p344_p8), %vm427_vm0, %v1682_v12  ;;  %435 = vst.msk [vmem:[#allocation2 + $0x38] sm:$0xff] (!%p344_p8), %vm427_vm0, %v1682_v12  ;;  %1485 = vmatpush3.bf16.msra.mxu1 (!%p344_p8), %v1605_v4  ;;  %v559_v24 = vunpack.c.h.s8.bf16 (!%p344_p8), %v557_v7  ;;  %v1422_v26 = vld [vmem:[%s1787_s15 + $0x10] sm:$0xff] (!%p344_p8) }
  0x1f   : > { %436 = vst.msk [vmem:[#allocation2 + $0x40] sm:$0xff] (!%p344_p8), %vm427_vm0, %v1682_v12  ;;  %437 = vst.msk [vmem:[#allocation2 + $0x48] sm:$0xff] (!%p344_p8), %vm427_vm0, %v1682_v12  ;;  %1490 = vmatprep.subr.bf16.mxu1 (!%p344_p8), %v1785_v5  ;;  %1505 = vmatpush3.bf16.msra.mxu0 (!%p344_p8), %v1802_v11  ;;  %v785_v32 = vunpack.c.l.s8.bf16 (!%p344_p8), %v1422_v26  ;;  %v786_v34 = vunpack.c.h.s8.bf16 (!%p344_p8), %v1422_v26 }
  0x20   : > { %s1979_s11 = smov (!%p405_p9, %s1400_s11), 7  ;;  %438 = vst.msk [vmem:[#allocation2 + $0x50] sm:$0xff] %vm427_vm0, %v1682_v12  ;;  %439 = vst.msk [vmem:[#allocation2 + $0x58] sm:$0xff] %vm427_vm0, %v1682_v12  ;;  %v761_v13 = vunpack.c.l.bf16 %v1792_v8  ;;  %v759_v14 = vunpack.c.l.bf16 %v684_v9  ;;  %v762_v15 = vunpack.c.h.bf16 %v1792_v8  ;;  %v760_v16 = vunpack.c.h.bf16 %v684_v9  ;;  %1510 = vmatprep.mubr.msk.bf16.mxu0 %vm588_vm2, %v684_v9  ;;  %1506 = vmatprep.subr.bf16.mxu0 %v1610_v21 }
  0x21   : > { %442 = vst.msk [vmem:[#allocation3 + $0x8] sm:$0xff] %vm440_vm1, %v1682_v12  ;;  %443 = vst.msk [vmem:[#allocation3 + $0x10] sm:$0xff] %vm440_vm1, %v1682_v12  ;;  %s1401_s16 = sshll.u32 %s1979_s11, 2  ;;  %v658_v19 = vunpack.c.h.bf16 %v1794_v10  ;;  %v657_v20 = vunpack.c.l.bf16 %v1794_v10  ;;  %v660_v31 = vunpack.c.h.bf16 %v559_v24  ;;  %v659_v33 = vunpack.c.l.bf16 %v559_v24  ;;  %v757_v46 = vld [vmem:[#allocation3 + $0x30] sm:$0xff]  ;;  %v653_v59 = vld [vmem:[#allocation3] sm:$0xff]  ;;  %s1403_s27 = sshll.u32 %s1979_s11, 3 }
  0x22   : > { %444 = vst.msk [vmem:[#allocation3 + $0x18] sm:$0xff] %vm440_vm1, %v1682_v12  ;;  %445 = vst.msk [vmem:[#allocation3 + $0x20] sm:$0xff] %vm440_vm1, %v1682_v12  ;;  %s408_s19 = scalar_lea.vmem %s1967_s4, %s1401_s16  ;;  %v769_v17 = vsel %vm588_vm2, %v761_v13, 0.0  ;;  %v763_v18 = vsel %vm588_vm2, %v759_v14, 0.0  ;;  %v772_v22 = vsel %vm588_vm2, %v762_v15, 0.0  ;;  %v766_v23 = vsel %vm588_vm2, %v760_v16, 0.0  ;;  %s414_s29 = scalar_lea.vmem %s1970_s7, %s1403_s27 }
  0x23   : > { %446 = vst.msk [vmem:[#allocation3 + $0x28] sm:$0xff] %vm440_vm1, %v1682_v12  ;;  %448 = vst.msk [vmem:[#allocation3 + $0x38] sm:$0xff] %vm440_vm1, %v1682_v12  ;;  %770 = vadd.xlane.f32.xlu1 %v769_v17  ;;  %764 = vadd.xlane.f32.xlu0 %v763_v18  ;;  %v1606_v25 = vld [vmem:[%s408_s19] sm:$0xff]   ;;  %v1608_v27 = vld [vmem:[%s408_s19 + $0x8] sm:$0xff]   ;;  %v664_v28 = vsel %vm588_vm2, %v658_v19, 0.0  ;;  %v661_v29 = vsel %vm588_vm2, %v657_v20, 0.0  ;;  %v861_v36 = vunpack.c.h.bf16 %v785_v32  ;;  %v860_v38 = vunpack.c.l.bf16 %v785_v32  ;;  %s420_s19 = scalar_lea.vmem %s1971_s8, %s1403_s27 }
  0x24   : > { %449 = vst.msk [vmem:[#allocation3 + $0x40] sm:$0xff] %vm440_vm1, %v1682_v12  ;;  %450 = vst.msk [vmem:[#allocation3 + $0x48] sm:$0xff] %vm440_vm1, %v1682_v12  ;;  %1486 = vmatprep.mubr.msk.bf16.mxu1 %vm427_vm0, %v1606_v25  ;;  %1507 = vmatpush3.bf16.msra.mxu0 %v1610_v21  ;;  %v670_v35 = vsel %vm588_vm2, %v660_v31, 0.0  ;;  %v667_v37 = vsel %vm588_vm2, %v659_v33, 0.0  ;;  %v863_v40 = vunpack.c.h.bf16 %v786_v34  ;;  %v862_v42 = vunpack.c.l.bf16 %v786_v34 }
  0x25   : > { %451 = vst.msk [vmem:[#allocation3 + $0x50] sm:$0xff] %vm440_vm1, %v1682_v12  ;;  %452 = vst.msk [vmem:[#allocation3 + $0x58] sm:$0xff] %vm440_vm1, %v1682_v12  ;;  %1487 = vmatmul.mubr.msk.bf16.vlgmr.msra.gmra.mrb[0].mxu1 %vm427_vm0, %v1608_v27  ;;  %1508 = vmatprep.subr.bf16.mxu0 %v1611_v30  ;;  %v867_v39 = vsel %vm588_vm2, %v861_v36, 0.0  ;;  %v864_v41 = vsel %vm588_vm2, %v860_v38, 0.0 }
  0x26   : > { %1491 = vmatpush3.bf16.msra.mxu1 %v1785_v5  ;;  %1498 = vmatprep.mubr.msk.bf16.mxu1 %vm588_vm2, %v1794_v10  ;;  %v873_v43 = vsel %vm588_vm2, %v863_v40, 0.0  ;;  %v870_v44 = vsel %vm588_vm2, %v862_v42, 0.0  ;;  %v1613_v42 = vld [vmem:[%s1965_s2 + $0x18] sm:$0xff]  }
  0x27   : > { %773 = vadd.xlane.f32.xlu1 %v772_v22  ;;  %767 = vadd.xlane.f32.xlu0 %v766_v23 }
  0x28   : > { %1492 = vmatprep.subr.bf16.mxu1 %v1802_v11  ;;  %1509 = vmatpush3.bf16.msra.mxu0 %v1611_v30  ;;  %v654_v58 = vld [vmem:[#allocation3 + $0x8] sm:$0xff]  ;;  %v655_v2 = vld [vmem:[#allocation3 + $0x10] sm:$0xff] }
  0x29   : > { %v755_v47 = vld [vmem:[#allocation3 + $0x20] sm:$0xff]  ;;  %v656_v0 = vld [vmem:[#allocation3 + $0x18] sm:$0xff] }
  0x2a   : > { %1493 = vmatpush3.bf16.msra.mxu1 %v1802_v11  ;;  %v758_v52 = vld [vmem:[#allocation3 + $0x38] sm:$0xff]  ;;  %v756_v53 = vld [vmem:[#allocation3 + $0x28] sm:$0xff] }
  0x2b   : > { %665 = vadd.xlane.f32.xlu1 %v664_v28  ;;  %662 = vadd.xlane.f32.xlu0 %v661_v29  ;;  %v857_v9 = vld [vmem:[#allocation3 + $0x48] sm:$0xff] }
  0x2c   : > { %1511 = vmatmul.mubr.msk.bf16.vlgmr.msra.gmra.mrb[0].mxu0 %vm588_vm2, %v1792_v8  ;;  %1494 = vmatprep.subr.bf16.mxu1 %v1610_v21  ;;  %v859_v19 = vld [vmem:[#allocation3 + $0x58] sm:$0xff]  ;;  %v858_v20 = vld [vmem:[#allocation3 + $0x50] sm:$0xff] }
  0x2e   : > { %1495 = vmatpush3.bf16.msra.mxu1 %v1610_v21 }
  0x2f   : > { %671 = vadd.xlane.f32.xlu1 %v670_v35  ;;  %668 = vadd.xlane.f32.xlu0 %v667_v37 }
  0x30   : > { %1496 = vmatprep.subr.bf16.mxu1 %v1611_v30 }
  0x32   : > { %1497 = vmatpush3.bf16.msra.mxu1 %v1611_v30 }
  0x33   : > { %868 = vadd.xlane.f32.xlu1 %v867_v39  ;;  %865 = vadd.xlane.f32.xlu0 %v864_v41  ;;  %v1612_v39 = vld [vmem:[%s1965_s2 + $0x10] sm:$0xff]  }
  0x34   : > { %1514 = vmatprep.subr.bf16.mxu1 %v1785_v5  ;;  %1526 = vmatprep.subr.bf16.mxu0 %v1612_v39 }
  0x35   : > { %1499 = vmatmul.mubr.msk.bf16.vlgmr.msra.gmra.mrb[4].mxu1 %vm588_vm2, %v559_v24  ;;  %1527 = vmatpush3.bf16.msra.mxu0 %v1612_v39 }
  0x36   : > { %1515 = vmatpush3.bf16.msra.mxu1 %v1785_v5  ;;  %1522 = vmatprep.mubr.msk.bf16.mxu1 %vm588_vm2, %v785_v32 }
  0x37   : > { %874 = vadd.xlane.f32.xlu1 %v873_v43  ;;  %871 = vadd.xlane.f32.xlu0 %v870_v44 }
  0x38   : > { %1516 = vmatprep.subr.bf16.mxu1 %v1802_v11  ;;  %1528 = vmatprep.subr.bf16.mxu0 %v1613_v42 }
  0x39   : > { %1529 = vmatpush3.bf16.msra.mxu0 %v1613_v42 }
  0x3a   : > { %1517 = vmatpush3.bf16.msra.mxu1 %v1802_v11  ;;  %v856_v11 = vld [vmem:[#allocation3 + $0x40] sm:$0xff] }
  0x3b   : > { %1518 = vmatprep.subr.bf16.mxu1 %v1610_v21 }
  0x3e   : > { %1519 = vmatpush3.bf16.msra.mxu1 %v1610_v21 }
  0x3f   : > { %1520 = vmatprep.subr.bf16.mxu1 %v1611_v30 }
  0x42   : > { %1521 = vmatpush3.bf16.msra.mxu1 %v1611_v30 }
  0x45   : > { %1523 = vmatmul.mubr.msk.bf16.vlgmr.msra.gmra.mrb[8].mxu1 %vm588_vm2, %v786_v34 }
  0xb0   : > { %v771_v48 = vpop.xlane.xlu1 %770  ;;  %v765_v49 = vpop.xlane.xlu0 %764 }
  0xb1   : > { %v777_v50 = vadd.f32 %v771_v48, %v757_v46  ;;  %v775_v51 = vadd.f32 %v765_v49, %v755_v47  ;;  %v1896_v49 = vld [vmem:[%s1965_s2] sm:$0xff]  }
  0xb2   : > { %1534 = vmatprep.subr.bf16.mxu0 %v1896_v49 }
  0xb3   : > { %781 = vst.msk [vmem:[#allocation3 + $0x30] sm:$0xff] %vm440_vm1, %v777_v50  ;;  %779 = vst.msk [vmem:[#allocation3 + $0x20] sm:$0xff] %vm440_vm1, %v775_v51 }
  0xb4   : > { %v774_v54 = vpop.xlane.xlu1 %773  ;;  %v768_v55 = vpop.xlane.xlu0 %767 }
  0xb5   : > { %v778_v56 = vadd.f32 %v774_v54, %v758_v52  ;;  %v776_v57 = vadd.f32 %v768_v55, %v756_v53 }
  0xb7   : > { %782 = vst.msk [vmem:[#allocation3 + $0x38] sm:$0xff] %vm440_vm1, %v778_v56  ;;  %780 = vst.msk [vmem:[#allocation3 + $0x28] sm:$0xff] %vm440_vm1, %v776_v57  ;;  %v1406_v57 = vld [vmem:[%s1969_s6] ss:$0 sm:$0xff] }
  0xb8   : > { %v666_v60 = vpop.xlane.xlu1 %665  ;;  %v663_v61 = vpop.xlane.xlu0 %662 }
  0xb9   : > { %v674_v62 = vadd.f32 %v666_v60, %v654_v58  ;;  %v673_v63 = vadd.f32 %v663_v61, %v653_v59 }
  0xba   : > { %v891_v1 = vld [vmem:[#allocation3 + $0x20] sm:$0xff]  ;;  %v893_v6 = vld [vmem:[#allocation3 + $0x30] sm:$0xff] }
  0xbb   : > { %679 = vst.msk [vmem:[#allocation3 + $0x8] sm:$0xff] %vm440_vm1, %v674_v62  ;;  %678 = vst.msk [vmem:[#allocation3] sm:$0xff] %vm440_vm1, %v673_v63  ;;  %v903_v3 = vmax.f32 %v891_v1, 1.0  ;;  %v905_v13 = vmax.f32 %v893_v6, 1.0  ;;  %v689_v62 = vld [vmem:[#allocation2 + $0x30] sm:$0xff]  ;;  %v687_v1 = vld [vmem:[#allocation2 + $0x20] sm:$0xff] }
  0xbc   : > { %v672_v4 = vpop.xlane.xlu1 %671  ;;  %v669_v5 = vpop.xlane.xlu0 %668 }
  0xbd   : > { %v676_v7 = vadd.f32 %v672_v4, %v656_v0  ;;  %1618 = vrcp.f32 %v903_v3  ;;  %v675_v8 = vadd.f32 %v669_v5, %v655_v2  ;;  %v690_v5 = vld [vmem:[#allocation2 + $0x38] sm:$0xff] }
  0xbe   : > { %v892_v10 = vld [vmem:[#allocation3 + $0x28] sm:$0xff]  ;;  %v894_v16 = vld [vmem:[#allocation3 + $0x38] sm:$0xff] }
  0xbf   : > { %681 = vst.msk [vmem:[#allocation3 + $0x18] sm:$0xff] %vm440_vm1, %v676_v7  ;;  %680 = vst.msk [vmem:[#allocation3 + $0x10] sm:$0xff] %vm440_vm1, %v675_v8  ;;  %v904_v12 = vmax.f32 %v892_v10, 1.0  ;;  %v906_v21 = vmax.f32 %v894_v16, 1.0  ;;  %v688_v8 = vld [vmem:[#allocation2 + $0x28] sm:$0xff] }
  0xc0   : > { %v869_v14 = vpop.xlane.xlu1 %868  ;;  %v866_v15 = vpop.xlane.xlu0 %865 }
  0xc1   : > { %v877_v17 = vadd.f32 %v869_v14, %v857_v9  ;;  %1620 = vrcp.f32 %v904_v12  ;;  %v876_v18 = vadd.f32 %v866_v15, %v856_v11  ;;  %v562_v14 = vld [vmem:[#allocation2 + $0x10] sm:$0xff]  ;;  %v560_v15 = vld [vmem:[#allocation2] sm:$0xff] }
  0xc2   : > { %1622 = vrcp.f32 %v905_v13  ;;  %v887_v24 = vld [vmem:[#allocation3] sm:$0xff]  ;;  %v888_v29 = vld [vmem:[#allocation3 + $0x8] sm:$0xff] }
  0xc3   : > { %881 = vst.msk [vmem:[#allocation3 + $0x48] sm:$0xff] %vm440_vm1, %v877_v17  ;;  %880 = vst.msk [vmem:[#allocation3 + $0x40] sm:$0xff] %vm440_vm1, %v876_v18  ;;  %1624 = vrcp.f32 %v906_v21  ;;  %v899_v28 = vmax.f32 %v887_v24, 1.0  ;;  %v900_v33 = vmax.f32 %v888_v29, 1.0  ;;  %v563_v17 = vld [vmem:[#allocation2 + $0x18] sm:$0xff] }
  0xc4   : > { %v875_v22 = vpop.xlane.xlu1 %874  ;;  %v872_v23 = vpop.xlane.xlu0 %871  ;;  %v791_v29 = vld [vmem:[#allocation2 + $0x58] sm:$0xff] }
  0xc5   : > { %v879_v25 = vadd.f32 %v875_v22, %v859_v19  ;;  %v878_v26 = vadd.f32 %v872_v23, %v858_v20  ;;  %1626 = vrcp.f32 %v899_v28  ;;  %v561_v20 = vld [vmem:[#allocation2 + $0x8] sm:$0xff] }
  0xc6   : > { %v889_v34 = vld [vmem:[#allocation3 + $0x10] sm:$0xff]  ;;  %v890_v40 = vld [vmem:[#allocation3 + $0x18] sm:$0xff] }
  0xc7   : > { %v1619_v27 = vpop.eup %1618  ;;  %883 = vst.msk [vmem:[#allocation3 + $0x58] sm:$0xff] %vm440_vm1, %v879_v25  ;;  %882 = vst.msk [vmem:[#allocation3 + $0x50] sm:$0xff] %vm440_vm1, %v878_v26  ;;  %v901_v38 = vmax.f32 %v889_v34, 1.0  ;;  %v902_v43 = vmax.f32 %v890_v40, 1.0  ;;  %v790_v26 = vld [vmem:[#allocation2 + $0x50] sm:$0xff] }
  0xc8   : > { %969 = vperm.xlu0 %1602, %v1619_v27   ;;  %v788_v27 = vld [vmem:[#allocation2 + $0x40] sm:$0xff] }
  0xca   : > { %v896_v30 = vld [vmem:[#allocation3 + $0x48] sm:$0xff]  ;;  %v895_v44 = vld [vmem:[#allocation3 + $0x40] sm:$0xff] }
  0xcb   : > { %v1621_v31 = vpop.eup %1620  ;;  %v908_v32 = vmax.f32 %v896_v30, 1.0  ;;  %v907_v47 = vmax.f32 %v895_v44, 1.0 }
  0xcc   : > { %974 = vperm.xlu1 %1603, %v1621_v31   ;;  %v1623_v35 = vpop.eup %1622 }
  0xcd   : > { %1628 = vrcp.f32 %v908_v32  ;;  %v1625_v41 = vpop.eup %1624  ;;  %v789_v32 = vld [vmem:[#allocation2 + $0x48] sm:$0xff] }
  0xce   : > { %v898_v36 = vld [vmem:[#allocation3 + $0x58] sm:$0xff]  ;;  %1630 = vrcp.f32 %v900_v33  ;;  %v897_v48 = vld [vmem:[#allocation3 + $0x50] sm:$0xff] }
  0xcf   : > { %v910_v37 = vmax.f32 %v898_v36, 1.0  ;;  %v1627_v45 = vpop.eup %1626  ;;  %v909_v52 = vmax.f32 %v897_v48, 1.0 }
  0xd0   : > { %979 = vperm.xlu1 %1603, %v1623_v35  }
  0xd1   : > { %1632 = vrcp.f32 %v910_v37 }
  0xd2   : > { %1634 = vrcp.f32 %v901_v38 }
  0xd3   : > { %1636 = vrcp.f32 %v902_v43 }
  0xd4   : > { %984 = vperm.xlu1 %1603, %v1625_v41   ;;  %1638 = vrcp.f32 %v907_v47 }
  0xd5   : > { %1640 = vrcp.f32 %v909_v52 }
  0xd7   : > { %v1629_v46 = vpop.eup %1628 }
  0xd8   : > { %994 = vperm.xlu0 %1602, %v1629_v46   ;;  %949 = vperm.xlu1 %1603, %v1627_v45   ;;  %v1631_v50 = vpop.eup %1630 }
  0xdb   : > { %v1633_v51 = vpop.eup %1632 }
  0xdc   : > { %1004 = vperm.xlu0 %1602, %v1633_v51   ;;  %954 = vperm.xlu1 %1603, %v1631_v50   ;;  %v1635_v53 = vpop.eup %1634 }
  0xdd   : > { %v1637_v54 = vpop.eup %1636 }
  0xde   : > { %v1639_v55 = vpop.eup %1638 }
  0xdf   : > { %v1641_v56 = vpop.eup %1640 }
  0xe0   : > { %959 = vperm.xlu1 %1603, %v1635_v53   ;;  %v1615_v53 = vld [vmem:[%s1965_s2 + $0x8] sm:$0xff]  }
  0xe4   : > { %964 = vperm.xlu1 %1603, %v1637_v54  }
  0xe8   : > { %989 = vperm.xlu1 %1603, %v1639_v55  }
  0xec   : > { %999 = vperm.xlu1 %1603, %v1641_v56  }
  0xf8   : > { %v1488_v58 = vpop.f32.mrb[0].mxu1 }
  0xf9   : > { %v530_v59 = vpop.f32.mrb[1].mxu1  ;;  %v539_v63 = vadd.f32 %v1488_v58, %v1406_v57 }
  0xfa   : > { %v531_v60 = vadd.f32 %v1406_v57, %v530_v59  ;;  %v1489_v61 = vpop.f32.mrb[2].mxu1 }
  0xfb   : > { %v533_v0 = vpop.f32.mrb[3].mxu1  ;;  %v542_v2 = vadd.f32 %v1489_v61, %v1406_v57  ;;  %547 = vst.msk [vmem:[%s420_s19 + $0x10] sm:$0xff] %vm427_vm0, %v539_v63 }
  0xfc   : > { %545 = vst.msk [vmem:[%s420_s19] sm:$0xff] %vm427_vm0, %v531_v60  ;;  %v534_v3 = vadd.f32 %v1406_v57, %v533_v0  ;;  %v1616_v57 = vld [vmem:[%s1965_s2 + $0x20] sm:$0xff]  }
  0xfd   : > { %548 = vst.msk [vmem:[%s420_s19 + $0x18] sm:$0xff] %vm427_vm0, %v542_v2 }
  0xfe   : > { %546 = vst.msk [vmem:[%s420_s19 + $0x8] sm:$0xff] %vm427_vm0, %v534_v3 }
  0xff   : > { %v1512_v4 = vpop.f32.mrb[0].mxu0 }
 0x100   : > { %v748_v6 = vadd.f32 %v1512_v4, %v689_v62  ;;  %v731_v7 = vpop.f32.mrb[1].mxu0 }
 0x101   : > { %v746_v9 = vadd.f32 %v731_v7, %v687_v1  ;;  %v1513_v10 = vpop.f32.mrb[2].mxu0  ;;  %v1617_v7 = vld [vmem:[%s1965_s2 + $0x28] sm:$0xff]  }
 0x102   : > { %752 = vst.msk [vmem:[#allocation2 + $0x30] sm:$0xff] %vm427_vm0, %v748_v6  ;;  %v749_v11 = vadd.f32 %v1513_v10, %v690_v5  ;;  %v734_v12 = vpop.f32.mrb[3].mxu0 }
 0x103   : > { %750 = vst.msk [vmem:[#allocation2 + $0x20] sm:$0xff] %vm427_vm0, %v746_v9  ;;  %v747_v13 = vadd.f32 %v734_v12, %v688_v8 }
 0x104   : > { %753 = vst.msk [vmem:[#allocation2 + $0x38] sm:$0xff] %vm427_vm0, %v749_v11 }
 0x105   : > { %751 = vst.msk [vmem:[#allocation2 + $0x28] sm:$0xff] %vm427_vm0, %v747_v13 }
 0x108   : > { %v1500_v16 = vpop.f32.mrb[4].mxu1 }
 0x109   : > { %v646_v18 = vadd.f32 %v1500_v16, %v562_v14  ;;  %v629_v19 = vpop.f32.mrb[5].mxu1  ;;  %v941_v46 = vld [vmem:[#allocation2 + $0x30] sm:$0xff] }
 0x10a   : > { %v644_v21 = vadd.f32 %v629_v19, %v560_v15  ;;  %v1501_v22 = vpop.f32.mrb[6].mxu1  ;;  %v939_v38 = vld [vmem:[#allocation2 + $0x20] sm:$0xff] }
 0x10b   : > { %651 = vst.msk [vmem:[#allocation2 + $0x10] sm:$0xff] %vm427_vm0, %v646_v18  ;;  %v647_v23 = vadd.f32 %v1501_v22, %v563_v17  ;;  %v632_v24 = vpop.f32.mrb[7].mxu1  ;;  %v942_v47 = vld [vmem:[#allocation2 + $0x38] sm:$0xff]  ;;  %v1445_v19 = vld [vmem:[%s1966_s3] ss:$0 sm:$0xff] }
 0x10c   : > { %649 = vst.msk [vmem:[#allocation2] sm:$0xff] %vm427_vm0, %v644_v21  ;;  %v645_v25 = vadd.f32 %v632_v24, %v561_v20  ;;  %v940_v40 = vld [vmem:[#allocation2 + $0x28] sm:$0xff] }
 0x10d   : > { %652 = vst.msk [vmem:[#allocation2 + $0x18] sm:$0xff] %vm427_vm0, %v647_v23 }
 0x10e   : > { %650 = vst.msk [vmem:[#allocation2 + $0x8] sm:$0xff] %vm427_vm0, %v645_v25 }
 0x112   : > { %v937_v63 = vld [vmem:[#allocation2 + $0x10] sm:$0xff] }
 0x113   : > { %v935_v55 = vld [vmem:[#allocation2] sm:$0xff] }
 0x114   : > { %v938_v1 = vld [vmem:[#allocation2 + $0x18] sm:$0xff] }
 0x115   : > { %v936_v56 = vld [vmem:[#allocation2 + $0x8] sm:$0xff] }
 0x118   : > { %v1524_v28 = vpop.f32.mrb[8].mxu1 }
 0x119   : > { %v849_v30 = vadd.f32 %v1524_v28, %v790_v26  ;;  %v832_v31 = vpop.f32.mrb[9].mxu1 }
 0x11a   : > { %v847_v33 = vadd.f32 %v832_v31, %v788_v27  ;;  %v1525_v34 = vpop.f32.mrb[10].mxu1 }
 0x11b   : > { %853 = vst.msk [vmem:[#allocation2 + $0x50] sm:$0xff] %vm427_vm0, %v849_v30  ;;  %v850_v35 = vadd.f32 %v1525_v34, %v791_v29  ;;  %v835_v36 = vpop.f32.mrb[11].mxu1 }
 0x11c   : > { %851 = vst.msk [vmem:[#allocation2 + $0x40] sm:$0xff] %vm427_vm0, %v847_v33  ;;  %v848_v37 = vadd.f32 %v835_v36, %v789_v32 }
 0x11d   : > { %854 = vst.msk [vmem:[#allocation2 + $0x58] sm:$0xff] %vm427_vm0, %v850_v35 }
 0x11e   : > { %852 = vst.msk [vmem:[#allocation2 + $0x48] sm:$0xff] %vm427_vm0, %v848_v37 }
 0x122   : > { %v945_v13 = vld [vmem:[#allocation2 + $0x50] sm:$0xff] }
 0x123   : > { %v943_v5 = vld [vmem:[#allocation2 + $0x40] sm:$0xff] }
 0x124   : > { %v946_v15 = vld [vmem:[#allocation2 + $0x58] sm:$0xff] }
 0x125   : > { %v944_v4 = vld [vmem:[#allocation2 + $0x48] sm:$0xff] }
 0x147   : > { %v970_v39 = vpop.permute.xlu0 %969 }
 0x148   : > { %v1011_v42 = vmul.f32 %v970_v39, %v939_v38 }
 0x14b   : > { %v975_v41 = vpop.permute.xlu1 %974 }
 0x14c   : > { %v1012_v43 = vmul.f32 %v975_v41, %v940_v40 }
 0x14e   : > { %v1025_v44 = vpack.c.bf16 %v1012_v43, %v1011_v42 }
 0x14f   : > { %v980_v45 = vpop.permute.xlu1 %979 }
 0x150   : > { %1530 = vmatprep.mubr.msk.bf16.mxu0 %vm427_vm0, %v1025_v44  ;;  %v1013_v50 = vmul.f32 %v980_v45, %v941_v46 }
 0x153   : > { %v985_v48 = vpop.permute.xlu1 %984 }
 0x154   : > { %v1014_v51 = vmul.f32 %v985_v48, %v942_v47 }
 0x156   : > { %v1026_v52 = vpack.c.bf16 %v1014_v51, %v1013_v50 }
 0x157   : > { %v950_v54 = vpop.permute.xlu1 %949 }
 0x158   : > { %1531 = vmatmul.mubr.msk.bf16.vlgmr.msra.gmra.mrb[4].mxu0 %vm427_vm0, %v1026_v52  ;;  %v1007_v59 = vmul.f32 %v950_v54, %v935_v55 }
 0x159   : > { %1535 = vmatpush3.bf16.msra.mxu0 %v1896_v49  ;;  %v995_v49 = vpop.permute.xlu0 %994 }
 0x15a   : > { %1536 = vmatprep.subr.bf16.mxu0 %v1615_v53  ;;  %v1016_v9 = vmul.f32 %v995_v49, %v944_v4 }
 0x15b   : > { %v955_v58 = vpop.permute.xlu1 %954 }
 0x15c   : > { %v1008_v60 = vmul.f32 %v955_v58, %v936_v56 }
 0x15d   : > { %1537 = vmatpush3.bf16.msra.mxu0 %v1615_v53  ;;  %v1005_v14 = vpop.permute.xlu0 %1004 }
 0x15e   : > { %v1019_v61 = vpack.c.bf16 %v1008_v60, %v1007_v59  ;;  %1542 = vmatprep.subr.bf16.mxu0 %v1616_v57  ;;  %v1018_v17 = vmul.f32 %v1005_v14, %v946_v15 }
 0x15f   : > { %v960_v62 = vpop.permute.xlu1 %959 }
 0x160   : > { %1538 = vmatprep.mubr.msk.bf16.mxu0 %vm427_vm0, %v1019_v61  ;;  %v1009_v2 = vmul.f32 %v960_v62, %v937_v63 }
 0x163   : > { %v965_v0 = vpop.permute.xlu1 %964 }
 0x164   : > { %v1010_v3 = vmul.f32 %v965_v0, %v938_v1 }
 0x166   : > { %v1020_v6 = vpack.c.bf16 %v1010_v3, %v1009_v2 }
 0x167   : > { %v990_v8 = vpop.permute.xlu1 %989 }
 0x168   : > { %v1015_v10 = vmul.f32 %v990_v8, %v943_v5  ;;  %1539 = vmatmul.mubr.msk.bf16.vlgmr.msra.gmra.mrb[4].mxu0 %vm427_vm0, %v1020_v6 }
 0x169   : > { %1543 = vmatpush3.bf16.msra.mxu0 %v1616_v57 }
 0x16a   : > { %v1166_v11 = vpack.c.bf16 %v1016_v9, %v1015_v10  ;;  %1544 = vmatprep.subr.bf16.mxu0 %v1617_v7 }
 0x16b   : > { %v1000_v12 = vpop.permute.xlu1 %999 }
 0x16c   : > { %1546 = vmatprep.mubr.msk.bf16.mxu0 %vm427_vm0, %v1166_v11  ;;  %v1017_v16 = vmul.f32 %v1000_v12, %v945_v13 }
 0x16d   : > { %1545 = vmatpush3.bf16.msra.mxu0 %v1617_v7 }
 0x16e   : > { %v1167_v18 = vpack.c.bf16 %v1018_v17, %v1017_v16 }
 0x174   : > { %1547 = vmatmul.mubr.msk.bf16.vlgmr.msra.gmra.mrb[4].mxu0 %vm427_vm0, %v1167_v18 }
 0x247   : > { %v1548_v20 = vpop.f32.mrb[4].mxu0 }
 0x248   : > { %v1225_v21 = vpop.f32.mrb[5].mxu0  ;;  %v1253_v26 = vadd.f32 %v1548_v20, %v1445_v19 }
 0x249   : > { %v1251_v22 = vadd.f32 %v1445_v19, %v1225_v21  ;;  %v1549_v23 = vpop.f32.mrb[6].mxu0 }
 0x24a   : > { %v1228_v24 = vpop.f32.mrb[7].mxu0  ;;  %v1254_v27 = vadd.f32 %v1549_v23, %v1445_v19  ;;  %1258 = vst.msk [vmem:[%s414_s29 + $0x10] sm:$0xff] %vm1255_vm3, %v1253_v26 }
 0x24b   : > { %1256 = vst.msk [vmem:[%s414_s29] sm:$0xff] %vm1255_vm3, %v1251_v22  ;;  %v1252_v25 = vadd.f32 %v1445_v19, %v1228_v24 }
 0x24c   : > { %1259 = vst.msk [vmem:[%s414_s29 + $0x18] sm:$0xff] %vm1255_vm3, %v1254_v27 }
 0x24d   : > { %1257 = vst.msk [vmem:[%s414_s29 + $0x8] sm:$0xff] %vm1255_vm3, %v1252_v25 }
 0x24e PF: > { %s19_s9 = sadd.s32 1, %s1680_s9   ;;  %s1972_s27 = smov %s1668_s28 }
 0x24f   : > { %p16_p10 = scmp.ge.s32.totalorder %s19_s9, 4   ;;  %s1973_s28 = smov %s1764_s13 }
 0x250   : > { %s1974_s29 = smov %s1676_s30  ;;  %s1975_s30 = smov %s1977_s10 }
 0x251   :  { %18 = sbr.rel (!%p16_p10) target bundleno = 3 (0x3), region = 155 }

// kernel: rgcn_nc_forward.4
= control target key start
LH: loop header
LB: loop body
LE: loop exit
PB: predicated region body
PF: predicated region fallthrough
CT: control target
= control target key end

     0   :  { %s1424_s15 = smov 0   ;;  %s1426_s16 = smov 0   ;;  %s1651_s0 = inlined_call_operand.vmem [shape: s8[3,64,64], index: 0, kind: input, shape index: {}]   ;;  %s1652_s1 = inlined_call_operand.vmem [shape: bf16[64,32], index: 1, kind: input, shape index: {}]   ;;  %s1653_s2 = inlined_call_operand.vmem [shape: bf16[3,32,32], index: 2, kind: input, shape index: {}]   ;;  %s1654_s3 = inlined_call_operand.vmem [shape: f32[1,32], index: 3, kind: input, shape index: {}]   ;;  %s1655_s4 = inlined_call_operand.vmem [shape: bf16[64,32], index: 4, kind: output, shape index: {}]  }
   0x1   :  { %s1428_s17 = smov 0   ;;  %s1430_s18 = smov 0  }
   0x2   :  { %s1432_s19 = smov 0  }
   0x3 LB: > { %s26_s20 = sadd.s32 1, %s1391_s18  ;;  %p42_p1 = scmp.ne.s32.totalorder %s1383_s16, %s1379_s15  ;;  %s1395_s19 = sphi %s1432_s19, %s14_s19   ;;  %s1391_s18 = sphi %s1430_s18, %s1659_s18   ;;  %s1387_s17 = sphi %s1428_s17, %s1658_s17   ;;  %s1383_s16 = sphi %s1426_s16, %s1657_s16   ;;  %s1379_s15 = sphi %s1424_s15, %s1656_s15  }
   0x4   : > { %p28_p0 = scmp.ge.s32.totalorder %s26_s20, 2  ;;  %p43_p2 = scmp.eq.s32.totalorder %s1395_s19, 0 }
   0x5   : > { %s35_s22 = sadd.s32 1, %s1383_s16  ;;  %p1131_p5 = scmp.ge.s32.totalorder %s1395_s19, 2 }
   0x6   : > { %s1661_s20 = smov (%p28_p0, %s26_s20), 0  ;;  %p44_p3 = por %p43_p2, %p42_p1 }
   0x7   : > { %s30_s21 = ssub.s32 %s1391_s18, %s1661_s20  ;;  %177 = sbr.rel (%p1131_p5) target bundleno = 21 (0x15), region = 28 }
   0x8   : > { %p33_p4 = scmp.eq.s32.totalorder %s30_s21, 0 }
   0xa   : > { %s1459_s23 = scalar_select %p33_p4, %s1383_s16, %s35_s22  }
   0xe   : > { %180 = sbr.rel (!%p44_p3) target bundleno = 21 (0x15), region = 32  ;;  %s182_s24 = sand.u32 (%p44_p3), 1, %s1383_s16  }
   0xf   : > { %s1132_s25 = sshll.u32 (%p44_p3), %s1391_s18, 3  ;;  %s1277_s26 = smul.u32 (%p44_p3), 24, %s182_s24 }
  0x10   : > { %s187_s29 = scalar_lea.vmem (%p44_p3), %s1651_s0, %s1132_s25 }
  0x11   : > { %v219_v0 = vld [vmem:[%s187_s29] sm:$0xff] (%p44_p3)  ;;  %v221_v1 = vld [vmem:[%s187_s29 + $0x10] sm:$0xff] (%p44_p3)  ;;  %s184_s30 = scalar_lea.vmem (%p44_p3), [#allocation4], %s1277_s26 }
  0x12   : > { %v223_v2 = vld [vmem:[%s187_s29 + $0x20] sm:$0xff] (%p44_p3)  ;;  %220 = vst [vmem:[%s184_s30] sm:$0xff] (%p44_p3), %v219_v0  ;;  %222 = vst [vmem:[%s184_s30 + $0x8] sm:$0xff] (%p44_p3), %v221_v1 }
  0x13   : > { %224 = vst [vmem:[%s184_s30 + $0x10] sm:$0xff] (%p44_p3), %v223_v2 }
  0x15 PF: > { %p1133_p6 = scmp.ge.s32.totalorder %s1395_s19, 1  ;;  %p229_p7 = scmp.lt.s32.totalorder %s1395_s19, 3 }
  0x17   : > { %p230_p8 = pnand %p1133_p6, %p229_p7 }
  0x18   : > { %s236_s5 = sand.u32 (!%p230_p8), 1, %s1379_s15   ;;  %v1473_v3 = vld [vmem:[%s1652_s1] sm:$0xff] (!%p230_p8)   ;;  %v1478_v4 = vld [vmem:[%s1652_s1 + $0x8] sm:$0xff] (!%p230_p8)   ;;  %vm296_vm0 = vcmask (!%p230_p8), 7168   ;;  %vm348_vm1 = vcmask (!%p230_p8), 523264   ;;  %v1493_v10 = vld [vmem:[%s1652_s1 + $0x10] sm:$0xff] (!%p230_p8)  }
  0x19   : > { %233 = sbr.rel (%p230_p8) target bundleno = 594 (0x252), region = 70  ;;  %1209 = vmatprep.subr.bf16.mxu0 (!%p230_p8), %v1473_v3  ;;  %1221 = vmatprep.subr.bf16.mxu1 (!%p230_p8), %v1473_v3  ;;  %v1397_v11 = vmov (!%p230_p8), 0.0   ;;  %v1326_v18 = vld [vmem:[%s1652_s1 + $0x18] sm:$0xff] (!%p230_p8)   ;;  %v1398_v41 = vmov (!%p230_p8), 0   ;;  %vm283_vm2 = vcmask (!%p230_p8), 261120   ;;  %s1134_s8 = sshll.u32 (!%p230_p8), %s1387_s17, 2 }
  0x1a   : > { %s1278_s6 = smul.u32 (!%p230_p8), 24, %s236_s5  ;;  %1210 = vmatpush3.bf16.msra.mxu0 (!%p230_p8), %v1473_v3  ;;  %1222 = vmatpush3.bf16.msra.mxu1 (!%p230_p8), %v1473_v3  ;;  %303 = vst.msk [vmem:[#allocation3 + $0x30] sm:$0xff] (!%p230_p8), %vm296_vm0, %v1397_v11  ;;  %297 = vst.msk [vmem:[#allocation3] sm:$0xff] (!%p230_p8), %vm296_vm0, %v1397_v11  ;;  %p273_p9 = scmp.lt.s32.totalorder (!%p230_p8), %s1134_s8, 7  ;;  %vm1035_vm3 = vcmask (!%p230_p8), 257024  }
  0x1b   : > { %1211 = vmatprep.subr.bf16.mxu0 (!%p230_p8), %v1478_v4  ;;  %1223 = vmatprep.subr.bf16.mxu1 (!%p230_p8), %v1478_v4  ;;  %298 = vst.msk [vmem:[#allocation3 + $0x8] sm:$0xff] (!%p230_p8), %vm296_vm0, %v1397_v11  ;;  %299 = vst.msk [vmem:[#allocation3 + $0x10] sm:$0xff] (!%p230_p8), %vm296_vm0, %v1397_v11 }
  0x1c   : > { %s1482_s11 = scalar_lea.vmem (!%p230_p8), [#allocation4], %s1278_s6  ;;  %300 = vst.msk [vmem:[#allocation3 + $0x18] sm:$0xff] (!%p230_p8), %vm296_vm0, %v1397_v11  ;;  %301 = vst.msk [vmem:[#allocation3 + $0x20] sm:$0xff] (!%p230_p8), %vm296_vm0, %v1397_v11  ;;  %1321 = vset.pattern.permute.xlu0 (!%p230_p8), %v1398_v41  ;;  %1322 = vset.pattern.permute.xlu1 (!%p230_p8), %v1398_v41 }
  0x1d   : > { %v1142_v5 = vld [vmem:[%s1482_s11 + $0x8] sm:$0xff] (!%p230_p8)  ;;  %v317_v6 = vld [vmem:[%s1482_s11] sm:$0xff] (!%p230_p8)  ;;  %302 = vst.msk [vmem:[#allocation3 + $0x28] sm:$0xff] (!%p230_p8), %vm296_vm0, %v1397_v11  ;;  %304 = vst.msk [vmem:[#allocation3 + $0x38] sm:$0xff] (!%p230_p8), %vm296_vm0, %v1397_v11 }
  0x1e   : > { %v445_v7 = vunpack.c.h.s8.bf16 (!%p230_p8), %v1142_v5  ;;  %v444_v8 = vunpack.c.l.s8.bf16 (!%p230_p8), %v1142_v5  ;;  %v318_v9 = vunpack.c.l.s8.bf16 (!%p230_p8), %v317_v6  ;;  %305 = vst.msk [vmem:[#allocation3 + $0x40] sm:$0xff] (!%p230_p8), %vm296_vm0, %v1397_v11  ;;  %306 = vst.msk [vmem:[#allocation3 + $0x48] sm:$0xff] (!%p230_p8), %vm296_vm0, %v1397_v11  ;;  %1212 = vmatpush3.bf16.msra.mxu0 (!%p230_p8), %v1478_v4  ;;  %1224 = vmatpush3.bf16.msra.mxu1 (!%p230_p8), %v1478_v4  ;;  %v319_v19 = vunpack.c.h.s8.bf16 (!%p230_p8), %v317_v6  ;;  %v1145_v23 = vld [vmem:[%s1482_s11 + $0x10] sm:$0xff] (!%p230_p8) }
  0x1f   : > { %307 = vst.msk [vmem:[#allocation3 + $0x50] sm:$0xff] (!%p230_p8), %vm296_vm0, %v1397_v11  ;;  %308 = vst.msk [vmem:[#allocation3 + $0x58] sm:$0xff] (!%p230_p8), %vm296_vm0, %v1397_v11  ;;  %1213 = vmatprep.subr.bf16.mxu0 (!%p230_p8), %v1493_v10  ;;  %1225 = vmatprep.subr.bf16.mxu1 (!%p230_p8), %v1493_v10  ;;  %v545_v25 = vunpack.c.l.s8.bf16 (!%p230_p8), %v1145_v23  ;;  %v546_v30 = vunpack.c.h.s8.bf16 (!%p230_p8), %v1145_v23 }
  0x20   : > { %v521_v12 = vunpack.c.l.bf16 %v445_v7  ;;  %v519_v13 = vunpack.c.l.bf16 %v444_v8  ;;  %v522_v14 = vunpack.c.h.bf16 %v445_v7  ;;  %v520_v15 = vunpack.c.h.bf16 %v444_v8  ;;  %1217 = vmatprep.mubr.msk.bf16.mxu0 %vm348_vm1, %v318_v9  ;;  %1229 = vmatprep.mubr.msk.bf16.mxu1 %vm348_vm1, %v444_v8  ;;  %290 = vst.msk [vmem:[#allocation2 + $0x30] sm:$0xff] %vm283_vm2, %v1397_v11  ;;  %284 = vst.msk [vmem:[#allocation2] sm:$0xff] %vm283_vm2, %v1397_v11  ;;  %s1663_s8 = smov (!%p273_p9, %s1134_s8), 7 }
  0x21   : > { %v418_v22 = vunpack.c.h.bf16 %v318_v9  ;;  %v417_v24 = vunpack.c.l.bf16 %v318_v9  ;;  %v420_v27 = vunpack.c.h.bf16 %v319_v19  ;;  %v419_v29 = vunpack.c.l.bf16 %v319_v19  ;;  %285 = vst.msk [vmem:[#allocation2 + $0x8] sm:$0xff] %vm283_vm2, %v1397_v11  ;;  %286 = vst.msk [vmem:[#allocation2 + $0x10] sm:$0xff] %vm283_vm2, %v1397_v11  ;;  %v517_v42 = vld [vmem:[#allocation3 + $0x30] sm:$0xff]  ;;  %v413_v55 = vld [vmem:[#allocation3] sm:$0xff]  ;;  %s1135_s11 = sshll.u32 %s1663_s8, 2 }
  0x22   : > { %v529_v16 = vsel %vm348_vm1, %v521_v12, 0.0  ;;  %v523_v17 = vsel %vm348_vm1, %v519_v13, 0.0  ;;  %v532_v20 = vsel %vm348_vm1, %v522_v14, 0.0  ;;  %v526_v21 = vsel %vm348_vm1, %v520_v15, 0.0  ;;  %1214 = vmatpush3.bf16.msra.mxu0 %v1493_v10  ;;  %1226 = vmatpush3.bf16.msra.mxu1 %v1493_v10  ;;  %287 = vst.msk [vmem:[#allocation2 + $0x18] sm:$0xff] %vm283_vm2, %v1397_v11  ;;  %288 = vst.msk [vmem:[#allocation2 + $0x20] sm:$0xff] %vm283_vm2, %v1397_v11  ;;  %s276_s17 = scalar_lea.vmem %s1655_s4, %s1135_s11 }
  0x23   : > { %530 = vadd.xlane.f32.xlu1 %v529_v16  ;;  %524 = vadd.xlane.f32.xlu0 %v523_v17  ;;  %v424_v26 = vsel %vm348_vm1, %v418_v22, 0.0  ;;  %v421_v28 = vsel %vm348_vm1, %v417_v24, 0.0  ;;  %v430_v31 = vsel %vm348_vm1, %v420_v27, 0.0  ;;  %v621_v32 = vunpack.c.h.bf16 %v545_v25  ;;  %289 = vst.msk [vmem:[#allocation2 + $0x28] sm:$0xff] %vm283_vm2, %v1397_v11  ;;  %291 = vst.msk [vmem:[#allocation2 + $0x38] sm:$0xff] %vm283_vm2, %v1397_v11  ;;  %v515_v43 = vld [vmem:[#allocation3 + $0x20] sm:$0xff] }
  0x24   : > { %1215 = vmatprep.subr.bf16.mxu0 %v1326_v18  ;;  %1227 = vmatprep.subr.bf16.mxu1 %v1326_v18  ;;  %v427_v33 = vsel %vm348_vm1, %v419_v29, 0.0  ;;  %v620_v34 = vunpack.c.l.bf16 %v545_v25  ;;  %v623_v36 = vunpack.c.h.bf16 %v546_v30  ;;  %v622_v38 = vunpack.c.l.bf16 %v546_v30  ;;  %292 = vst.msk [vmem:[#allocation2 + $0x40] sm:$0xff] %vm283_vm2, %v1397_v11  ;;  %293 = vst.msk [vmem:[#allocation2 + $0x48] sm:$0xff] %vm283_vm2, %v1397_v11  ;;  %v518_v48 = vld [vmem:[#allocation3 + $0x38] sm:$0xff]  ;;  %v516_v49 = vld [vmem:[#allocation3 + $0x28] sm:$0xff] }
  0x25   : > { %v627_v35 = vsel %vm348_vm1, %v621_v32, 0.0  ;;  %294 = vst.msk [vmem:[#allocation2 + $0x50] sm:$0xff] %vm283_vm2, %v1397_v11  ;;  %295 = vst.msk [vmem:[#allocation2 + $0x58] sm:$0xff] %vm283_vm2, %v1397_v11  ;;  %v414_v54 = vld [vmem:[#allocation3 + $0x8] sm:$0xff]  ;;  %v416_v60 = vld [vmem:[#allocation3 + $0x18] sm:$0xff] }
  0x26   : > { %1216 = vmatpush3.bf16.msra.mxu0 %v1326_v18  ;;  %1228 = vmatpush3.bf16.msra.mxu1 %v1326_v18  ;;  %v624_v37 = vsel %vm348_vm1, %v620_v34, 0.0  ;;  %v633_v39 = vsel %vm348_vm1, %v623_v36, 0.0  ;;  %v630_v40 = vsel %vm348_vm1, %v622_v38, 0.0  ;;  %v415_v62 = vld [vmem:[#allocation3 + $0x10] sm:$0xff]  ;;  %v617_v5 = vld [vmem:[#allocation3 + $0x48] sm:$0xff]  ;;  %v619_v15 = vld [vmem:[#allocation3 + $0x58] sm:$0xff] }
  0x27   : > { %533 = vadd.xlane.f32.xlu1 %v532_v20  ;;  %527 = vadd.xlane.f32.xlu0 %v526_v21  ;;  %v618_v16 = vld [vmem:[#allocation3 + $0x50] sm:$0xff]  ;;  %v1328_v38 = vld [vmem:[%s1653_s2 + $0x18] sm:$0xff]  }
  0x28   : > { %1233 = vmatprep.subr.bf16.mxu0 %v1473_v3 }
  0x29   : > { %1218 = vmatmul.mubr.msk.bf16.vlgmr.msra.gmra.mrb[0].mxu0 %vm348_vm1, %v319_v19  ;;  %1230 = vmatmul.mubr.msk.bf16.vlgmr.msra.gmra.mrb[0].mxu1 %vm348_vm1, %v445_v7  ;;  %v616_v7 = vld [vmem:[#allocation3 + $0x40] sm:$0xff] }
  0x2a   : > { %1234 = vmatpush3.bf16.msra.mxu0 %v1473_v3  ;;  %1241 = vmatprep.mubr.msk.bf16.mxu0 %vm348_vm1, %v545_v25 }
  0x2b   : > { %425 = vadd.xlane.f32.xlu1 %v424_v26  ;;  %422 = vadd.xlane.f32.xlu0 %v421_v28 }
  0x2c   : > { %1235 = vmatprep.subr.bf16.mxu0 %v1478_v4 }
  0x2e   : > { %1236 = vmatpush3.bf16.msra.mxu0 %v1478_v4 }
  0x2f   : > { %431 = vadd.xlane.f32.xlu1 %v430_v31  ;;  %428 = vadd.xlane.f32.xlu0 %v427_v33 }
  0x30   : > { %1237 = vmatprep.subr.bf16.mxu0 %v1493_v10 }
  0x32   : > { %1238 = vmatpush3.bf16.msra.mxu0 %v1493_v10 }
  0x33   : > { %628 = vadd.xlane.f32.xlu1 %v627_v35  ;;  %625 = vadd.xlane.f32.xlu0 %v624_v37  ;;  %v1327_v35 = vld [vmem:[%s1653_s2 + $0x10] sm:$0xff]  }
  0x34   : > { %1239 = vmatprep.subr.bf16.mxu0 %v1326_v18  ;;  %1245 = vmatprep.subr.bf16.mxu1 %v1327_v35 }
  0x35   : > { %1246 = vmatpush3.bf16.msra.mxu1 %v1327_v35 }
  0x36   : > { %1240 = vmatpush3.bf16.msra.mxu0 %v1326_v18  ;;  %1247 = vmatprep.subr.bf16.mxu1 %v1328_v38 }
  0x37   : > { %634 = vadd.xlane.f32.xlu1 %v633_v39  ;;  %631 = vadd.xlane.f32.xlu0 %v630_v40 }
  0x39   : > { %1242 = vmatmul.mubr.msk.bf16.vlgmr.msra.gmra.mrb[4].mxu0 %vm348_vm1, %v546_v30  ;;  %1248 = vmatpush3.bf16.msra.mxu1 %v1328_v38 }
  0xb0   : > { %v531_v44 = vpop.xlane.xlu1 %530  ;;  %v525_v45 = vpop.xlane.xlu0 %524 }
  0xb1   : > { %v537_v46 = vadd.f32 %v531_v44, %v517_v42  ;;  %v535_v47 = vadd.f32 %v525_v45, %v515_v43  ;;  %v1598_v45 = vld [vmem:[%s1653_s2] sm:$0xff]  }
  0xb2   : > { %1253 = vmatprep.subr.bf16.mxu1 %v1598_v45 }
  0xb3   : > { %541 = vst.msk [vmem:[#allocation3 + $0x30] sm:$0xff] %vm296_vm0, %v537_v46  ;;  %539 = vst.msk [vmem:[#allocation3 + $0x20] sm:$0xff] %vm296_vm0, %v535_v47 }
  0xb4   : > { %v534_v50 = vpop.xlane.xlu1 %533  ;;  %v528_v51 = vpop.xlane.xlu0 %527 }
  0xb5   : > { %v538_v52 = vadd.f32 %v534_v50, %v518_v48  ;;  %v536_v53 = vadd.f32 %v528_v51, %v516_v49 }
  0xb7   : > { %542 = vst.msk [vmem:[#allocation3 + $0x38] sm:$0xff] %vm296_vm0, %v538_v52  ;;  %540 = vst.msk [vmem:[#allocation3 + $0x28] sm:$0xff] %vm296_vm0, %v536_v53  ;;  %v449_v53 = vld [vmem:[#allocation2 + $0x30] sm:$0xff] }
  0xb8   : > { %v426_v56 = vpop.xlane.xlu1 %425  ;;  %v423_v57 = vpop.xlane.xlu0 %422 }
  0xb9   : > { %v434_v58 = vadd.f32 %v426_v56, %v414_v54  ;;  %v433_v59 = vadd.f32 %v423_v57, %v413_v55  ;;  %v322_v54 = vld [vmem:[#allocation2 + $0x10] sm:$0xff]  ;;  %v447_v55 = vld [vmem:[#allocation2 + $0x20] sm:$0xff] }
  0xba   : > { %v651_v61 = vld [vmem:[#allocation3 + $0x20] sm:$0xff]  ;;  %v653_v2 = vld [vmem:[#allocation3 + $0x30] sm:$0xff] }
  0xbb   : > { %439 = vst.msk [vmem:[#allocation3 + $0x8] sm:$0xff] %vm296_vm0, %v434_v58  ;;  %438 = vst.msk [vmem:[#allocation3] sm:$0xff] %vm296_vm0, %v433_v59  ;;  %v663_v63 = vmax.f32 %v651_v61, 1.0  ;;  %v665_v9 = vmax.f32 %v653_v2, 1.0  ;;  %v320_v56 = vld [vmem:[#allocation2] sm:$0xff]  ;;  %v450_v58 = vld [vmem:[#allocation2 + $0x38] sm:$0xff] }
  0xbc   : > { %v432_v0 = vpop.xlane.xlu1 %431  ;;  %v429_v1 = vpop.xlane.xlu0 %428  ;;  %v321_v2 = vld [vmem:[#allocation2 + $0x8] sm:$0xff] }
  0xbd   : > { %v436_v3 = vadd.f32 %v432_v0, %v416_v60  ;;  %1333 = vrcp.f32 %v663_v63  ;;  %v435_v4 = vadd.f32 %v429_v1, %v415_v62  ;;  %v323_v60 = vld [vmem:[#allocation2 + $0x18] sm:$0xff]  ;;  %v448_v63 = vld [vmem:[#allocation2 + $0x28] sm:$0xff] }
  0xbe   : > { %v652_v6 = vld [vmem:[#allocation3 + $0x28] sm:$0xff]  ;;  %v654_v12 = vld [vmem:[#allocation3 + $0x38] sm:$0xff] }
  0xbf   : > { %441 = vst.msk [vmem:[#allocation3 + $0x18] sm:$0xff] %vm296_vm0, %v436_v3  ;;  %440 = vst.msk [vmem:[#allocation3 + $0x10] sm:$0xff] %vm296_vm0, %v435_v4  ;;  %v664_v8 = vmax.f32 %v652_v6, 1.0  ;;  %v666_v17 = vmax.f32 %v654_v12, 1.0 }
  0xc0   : > { %v629_v10 = vpop.xlane.xlu1 %628  ;;  %v626_v11 = vpop.xlane.xlu0 %625 }
  0xc1   : > { %v637_v13 = vadd.f32 %v629_v10, %v617_v5  ;;  %1335 = vrcp.f32 %v664_v8  ;;  %v636_v14 = vadd.f32 %v626_v11, %v616_v7 }
  0xc2   : > { %1337 = vrcp.f32 %v665_v9  ;;  %v647_v20 = vld [vmem:[#allocation3] sm:$0xff]  ;;  %v648_v25 = vld [vmem:[#allocation3 + $0x8] sm:$0xff] }
  0xc3   : > { %641 = vst.msk [vmem:[#allocation3 + $0x48] sm:$0xff] %vm296_vm0, %v637_v13  ;;  %640 = vst.msk [vmem:[#allocation3 + $0x40] sm:$0xff] %vm296_vm0, %v636_v14  ;;  %1339 = vrcp.f32 %v666_v17  ;;  %v659_v24 = vmax.f32 %v647_v20, 1.0  ;;  %v660_v29 = vmax.f32 %v648_v25, 1.0  ;;  %v550_v13 = vld [vmem:[#allocation2 + $0x50] sm:$0xff]  ;;  %v548_v14 = vld [vmem:[#allocation2 + $0x40] sm:$0xff] }
  0xc4   : > { %v635_v18 = vpop.xlane.xlu1 %634  ;;  %v632_v19 = vpop.xlane.xlu0 %631 }
  0xc5   : > { %v639_v21 = vadd.f32 %v635_v18, %v619_v15  ;;  %v638_v22 = vadd.f32 %v632_v19, %v618_v16  ;;  %1341 = vrcp.f32 %v659_v24  ;;  %v551_v16 = vld [vmem:[#allocation2 + $0x58] sm:$0xff]  ;;  %v549_v19 = vld [vmem:[#allocation2 + $0x48] sm:$0xff] }
  0xc6   : > { %v649_v30 = vld [vmem:[#allocation3 + $0x10] sm:$0xff]  ;;  %v650_v36 = vld [vmem:[#allocation3 + $0x18] sm:$0xff] }
  0xc7   : > { %v1334_v23 = vpop.eup %1333  ;;  %643 = vst.msk [vmem:[#allocation3 + $0x58] sm:$0xff] %vm296_vm0, %v639_v21  ;;  %642 = vst.msk [vmem:[#allocation3 + $0x50] sm:$0xff] %vm296_vm0, %v638_v22  ;;  %v661_v34 = vmax.f32 %v649_v30, 1.0  ;;  %v662_v39 = vmax.f32 %v650_v36, 1.0 }
  0xc8   : > { %729 = vperm.xlu0 %1321, %v1334_v23  }
  0xca   : > { %v656_v26 = vld [vmem:[#allocation3 + $0x48] sm:$0xff]  ;;  %v655_v40 = vld [vmem:[#allocation3 + $0x40] sm:$0xff] }
  0xcb   : > { %v1336_v27 = vpop.eup %1335  ;;  %v668_v28 = vmax.f32 %v656_v26, 1.0  ;;  %v667_v43 = vmax.f32 %v655_v40, 1.0 }
  0xcc   : > { %734 = vperm.xlu1 %1322, %v1336_v27   ;;  %v1338_v31 = vpop.eup %1337 }
  0xcd   : > { %1343 = vrcp.f32 %v668_v28  ;;  %v1340_v37 = vpop.eup %1339 }
  0xce   : > { %v658_v32 = vld [vmem:[#allocation3 + $0x58] sm:$0xff]  ;;  %1345 = vrcp.f32 %v660_v29  ;;  %v657_v44 = vld [vmem:[#allocation3 + $0x50] sm:$0xff] }
  0xcf   : > { %v670_v33 = vmax.f32 %v658_v32, 1.0  ;;  %v1342_v41 = vpop.eup %1341  ;;  %v669_v48 = vmax.f32 %v657_v44, 1.0 }
  0xd0   : > { %739 = vperm.xlu1 %1322, %v1338_v31  }
  0xd1   : > { %1347 = vrcp.f32 %v670_v33 }
  0xd2   : > { %1349 = vrcp.f32 %v661_v34 }
  0xd3   : > { %1351 = vrcp.f32 %v662_v39  ;;  %v1330_v39 = vld [vmem:[%s1653_s2 + $0x8] sm:$0xff]  }
  0xd4   : > { %744 = vperm.xlu1 %1322, %v1340_v37   ;;  %1353 = vrcp.f32 %v667_v43  ;;  %v1331_v43 = vld [vmem:[%s1653_s2 + $0x20] sm:$0xff]  }
  0xd5   : > { %1355 = vrcp.f32 %v669_v48 }
  0xd7   : > { %v1344_v42 = vpop.eup %1343 }
  0xd8   : > { %754 = vperm.xlu0 %1321, %v1344_v42   ;;  %709 = vperm.xlu1 %1322, %v1342_v41   ;;  %v1346_v46 = vpop.eup %1345 }
  0xdb   : > { %v1348_v47 = vpop.eup %1347 }
  0xdc   : > { %764 = vperm.xlu0 %1321, %v1348_v47   ;;  %714 = vperm.xlu1 %1322, %v1346_v46   ;;  %v1350_v49 = vpop.eup %1349 }
  0xdd   : > { %v1352_v50 = vpop.eup %1351 }
  0xde   : > { %v1354_v51 = vpop.eup %1353 }
  0xdf   : > { %v1356_v52 = vpop.eup %1355 }
  0xe0   : > { %719 = vperm.xlu1 %1322, %v1350_v49  }
  0xe4   : > { %724 = vperm.xlu1 %1322, %v1352_v50  }
  0xe8   : > { %749 = vperm.xlu1 %1322, %v1354_v51  }
  0xec   : > { %759 = vperm.xlu1 %1322, %v1356_v52  }
  0xfc   : > { %v1231_v57 = vpop.f32.mrb[0].mxu1  ;;  %v1219_v59 = vpop.f32.mrb[0].mxu0 }
  0xfd   : > { %v508_v61 = vadd.f32 %v1231_v57, %v449_v53  ;;  %v491_v62 = vpop.f32.mrb[1].mxu1  ;;  %v406_v0 = vadd.f32 %v1219_v59, %v322_v54  ;;  %v389_v1 = vpop.f32.mrb[1].mxu0 }
  0xfe   : > { %v506_v3 = vadd.f32 %v491_v62, %v447_v55  ;;  %v1232_v4 = vpop.f32.mrb[2].mxu1  ;;  %v404_v5 = vadd.f32 %v389_v1, %v320_v56  ;;  %v1220_v6 = vpop.f32.mrb[2].mxu0 }
  0xff   : > { %512 = vst.msk [vmem:[#allocation2 + $0x30] sm:$0xff] %vm283_vm2, %v508_v61  ;;  %v509_v7 = vadd.f32 %v1232_v4, %v450_v58  ;;  %v494_v8 = vpop.f32.mrb[3].mxu1  ;;  %411 = vst.msk [vmem:[#allocation2 + $0x10] sm:$0xff] %vm283_vm2, %v406_v0  ;;  %v407_v9 = vadd.f32 %v1220_v6, %v323_v60  ;;  %v392_v10 = vpop.f32.mrb[3].mxu0  ;;  %v1332_v58 = vld [vmem:[%s1653_s2 + $0x28] sm:$0xff]  }
 0x100   : > { %510 = vst.msk [vmem:[#allocation2 + $0x20] sm:$0xff] %vm283_vm2, %v506_v3  ;;  %v507_v11 = vadd.f32 %v494_v8, %v448_v63  ;;  %409 = vst.msk [vmem:[#allocation2] sm:$0xff] %vm283_vm2, %v404_v5  ;;  %v405_v12 = vadd.f32 %v392_v10, %v321_v2  ;;  %v1168_v6 = vld [vmem:[%s1654_s3] ss:$0 sm:$0xff] }
 0x101   : > { %513 = vst.msk [vmem:[#allocation2 + $0x38] sm:$0xff] %vm283_vm2, %v509_v7  ;;  %412 = vst.msk [vmem:[#allocation2 + $0x18] sm:$0xff] %vm283_vm2, %v407_v9 }
 0x102   : > { %511 = vst.msk [vmem:[#allocation2 + $0x28] sm:$0xff] %vm283_vm2, %v507_v11  ;;  %410 = vst.msk [vmem:[#allocation2 + $0x8] sm:$0xff] %vm283_vm2, %v405_v12 }
 0x106   : > { %v701_v33 = vld [vmem:[#allocation2 + $0x30] sm:$0xff] }
 0x107   : > { %v699_v25 = vld [vmem:[#allocation2 + $0x20] sm:$0xff]  ;;  %v697_v50 = vld [vmem:[#allocation2 + $0x10] sm:$0xff] }
 0x108   : > { %v702_v34 = vld [vmem:[#allocation2 + $0x38] sm:$0xff]  ;;  %v695_v41 = vld [vmem:[#allocation2] sm:$0xff] }
 0x109   : > { %v700_v27 = vld [vmem:[#allocation2 + $0x28] sm:$0xff]  ;;  %v698_v52 = vld [vmem:[#allocation2 + $0x18] sm:$0xff] }
 0x10a   : > { %v696_v42 = vld [vmem:[#allocation2 + $0x8] sm:$0xff] }
 0x10c   : > { %v1243_v15 = vpop.f32.mrb[4].mxu0 }
 0x10d   : > { %v609_v17 = vadd.f32 %v1243_v15, %v550_v13  ;;  %v592_v18 = vpop.f32.mrb[5].mxu0 }
 0x10e   : > { %v607_v20 = vadd.f32 %v592_v18, %v548_v14  ;;  %v1244_v21 = vpop.f32.mrb[6].mxu0 }
 0x10f   : > { %613 = vst.msk [vmem:[#allocation2 + $0x50] sm:$0xff] %vm283_vm2, %v609_v17  ;;  %v610_v22 = vadd.f32 %v1244_v21, %v551_v16  ;;  %v595_v23 = vpop.f32.mrb[7].mxu0 }
 0x110   : > { %611 = vst.msk [vmem:[#allocation2 + $0x40] sm:$0xff] %vm283_vm2, %v607_v20  ;;  %v608_v24 = vadd.f32 %v595_v23, %v549_v19 }
 0x111   : > { %614 = vst.msk [vmem:[#allocation2 + $0x58] sm:$0xff] %vm283_vm2, %v610_v22 }
 0x112   : > { %612 = vst.msk [vmem:[#allocation2 + $0x48] sm:$0xff] %vm283_vm2, %v608_v24 }
 0x116   : > { %v705_v0 = vld [vmem:[#allocation2 + $0x50] sm:$0xff] }
 0x117   : > { %v703_v56 = vld [vmem:[#allocation2 + $0x40] sm:$0xff] }
 0x118   : > { %v706_v2 = vld [vmem:[#allocation2 + $0x58] sm:$0xff] }
 0x119   : > { %v704_v55 = vld [vmem:[#allocation2 + $0x48] sm:$0xff] }
 0x147   : > { %v730_v26 = vpop.permute.xlu0 %729 }
 0x148   : > { %v771_v29 = vmul.f32 %v730_v26, %v699_v25 }
 0x14b   : > { %v735_v28 = vpop.permute.xlu1 %734 }
 0x14c   : > { %v772_v30 = vmul.f32 %v735_v28, %v700_v27 }
 0x14e   : > { %v785_v31 = vpack.c.bf16 %v772_v30, %v771_v29 }
 0x14f   : > { %v740_v32 = vpop.permute.xlu1 %739 }
 0x150   : > { %1249 = vmatprep.mubr.msk.bf16.mxu1 %vm283_vm2, %v785_v31  ;;  %v773_v36 = vmul.f32 %v740_v32, %v701_v33 }
 0x153   : > { %v745_v35 = vpop.permute.xlu1 %744 }
 0x154   : > { %v774_v37 = vmul.f32 %v745_v35, %v702_v34 }
 0x156   : > { %v786_v38 = vpack.c.bf16 %v774_v37, %v773_v36 }
 0x157   : > { %v710_v40 = vpop.permute.xlu1 %709 }
 0x158   : > { %1250 = vmatmul.mubr.msk.bf16.vlgmr.msra.gmra.mrb[4].mxu1 %vm283_vm2, %v786_v38  ;;  %v767_v46 = vmul.f32 %v710_v40, %v695_v41 }
 0x159   : > { %1254 = vmatpush3.bf16.msra.mxu1 %v1598_v45  ;;  %v755_v45 = vpop.permute.xlu0 %754 }
 0x15a   : > { %1255 = vmatprep.subr.bf16.mxu1 %v1330_v39  ;;  %v776_v60 = vmul.f32 %v755_v45, %v704_v55 }
 0x15b   : > { %v715_v44 = vpop.permute.xlu1 %714 }
 0x15c   : > { %v768_v47 = vmul.f32 %v715_v44, %v696_v42 }
 0x15d   : > { %1256 = vmatpush3.bf16.msra.mxu1 %v1330_v39  ;;  %v765_v1 = vpop.permute.xlu0 %764 }
 0x15e   : > { %v779_v48 = vpack.c.bf16 %v768_v47, %v767_v46  ;;  %1261 = vmatprep.subr.bf16.mxu1 %v1331_v43  ;;  %v778_v4 = vmul.f32 %v765_v1, %v706_v2 }
 0x15f   : > { %v720_v49 = vpop.permute.xlu1 %719 }
 0x160   : > { %1257 = vmatprep.mubr.msk.bf16.mxu1 %vm283_vm2, %v779_v48  ;;  %v769_v53 = vmul.f32 %v720_v49, %v697_v50 }
 0x163   : > { %v725_v51 = vpop.permute.xlu1 %724 }
 0x164   : > { %v770_v54 = vmul.f32 %v725_v51, %v698_v52 }
 0x166   : > { %v780_v57 = vpack.c.bf16 %v770_v54, %v769_v53 }
 0x167   : > { %v750_v59 = vpop.permute.xlu1 %749 }
 0x168   : > { %v775_v61 = vmul.f32 %v750_v59, %v703_v56  ;;  %1258 = vmatmul.mubr.msk.bf16.vlgmr.msra.gmra.mrb[4].mxu1 %vm283_vm2, %v780_v57 }
 0x169   : > { %1262 = vmatpush3.bf16.msra.mxu1 %v1331_v43 }
 0x16a   : > { %v926_v62 = vpack.c.bf16 %v776_v60, %v775_v61  ;;  %1263 = vmatprep.subr.bf16.mxu1 %v1332_v58 }
 0x16b   : > { %v760_v63 = vpop.permute.xlu1 %759 }
 0x16c   : > { %1265 = vmatprep.mubr.msk.bf16.mxu1 %vm283_vm2, %v926_v62  ;;  %v777_v3 = vmul.f32 %v760_v63, %v705_v0 }
 0x16d   : > { %1264 = vmatpush3.bf16.msra.mxu1 %v1332_v58 }
 0x16e   : > { %v927_v5 = vpack.c.bf16 %v778_v4, %v777_v3 }
 0x174   : > { %1266 = vmatmul.mubr.msk.bf16.vlgmr.msra.gmra.mrb[4].mxu1 %vm283_vm2, %v927_v5 }
 0x247   : > { %v1267_v7 = vpop.f32.mrb[4].mxu1 }
 0x248   : > { %v1013_v8 = vadd.f32 %v1267_v7, %v1168_v6  ;;  %v985_v9 = vpop.f32.mrb[5].mxu1 }
 0x249   : > { %v1011_v10 = vadd.f32 %v1168_v6, %v985_v9  ;;  %v1268_v11 = vpop.f32.mrb[6].mxu1 }
 0x24a   : > { %v1014_v12 = vadd.f32 %v1268_v11, %v1168_v6  ;;  %v988_v13 = vpop.f32.mrb[7].mxu1  ;;  %v1017_v16 = vmax.f32 %v1013_v8, 0.0 }
 0x24b   : > { %v1015_v14 = vmax.f32 %v1011_v10, 0.0  ;;  %v1012_v15 = vadd.f32 %v1168_v6, %v988_v13 }
 0x24c   : > { %v1018_v18 = vmax.f32 %v1014_v12, 0.0  ;;  %v1177_v21 = vpack.c.bf16 %v1017_v16, %v1017_v16 }
 0x24d   : > { %v1175_v17 = vpack.c.bf16 %v1015_v14, %v1015_v14  ;;  %v1016_v19 = vmax.f32 %v1012_v15, 0.0 }
 0x24e   : > { %v1178_v22 = vpack.c.bf16 %v1018_v18, %v1018_v18  ;;  %1038 = vst.msk [vmem:[%s276_s17 + $0x8] sm:$0xf] %vm1035_vm3, %v1177_v21 }
 0x24f   : > { %1036 = vst.msk [vmem:[%s276_s17] sm:$0xf] %vm1035_vm3, %v1175_v17  ;;  %v1176_v20 = vpack.c.bf16 %v1016_v19, %v1016_v19 }
 0x250   : > { %1039 = vst.msk [vmem:[%s276_s17 + $0xc] sm:$0xf] %vm1035_vm3, %v1178_v22 }
 0x251   : > { %1037 = vst.msk [vmem:[%s276_s17 + $0x4] sm:$0xf] %vm1035_vm3, %v1176_v20 }
 0x252 PF: > { %s14_s19 = sadd.s32 1, %s1395_s19   ;;  %s1656_s15 = smov %s1383_s16 }
 0x253   : > { %p11_p10 = scmp.ge.s32.totalorder %s14_s19, 4   ;;  %s1657_s16 = smov %s1459_s23 }
 0x254   : > { %s1658_s17 = smov %s1391_s18  ;;  %s1659_s18 = smov %s1661_s20 }
 0x255   :  { %13 = sbr.rel (!%p11_p10) target bundleno = 3 (0x3), region = 128 }

</bundles_post_ra>
